<compile_context>
chip_gen: v7x
topology: tpu7x:2x2x1
jax: 0.10.0
libtpu: 0.0.40
codegen_flags: <defaults>
</compile_context>

<pallas_src>
import math

import jax
import jax.numpy as jnp
from jax.experimental import pallas as pl
from jax.experimental.pallas import tpu as pltpu

LANE = 128
EPS = 1e-5


# ----------------------------- small utilities ------------------------------

def _make_divisible(v, divisor, min_value=None):
    if min_value is None:
        min_value = divisor
    new_v = max(min_value, int(v + divisor / 2) // divisor * divisor)
    if new_v < 0.9 * v:
        new_v += divisor
    return new_v


def _rup(v, m):
    return ((int(v) + m - 1) // m) * m


def _cp(c):
    """Pad a channel count up to a multiple of 128 lanes."""
    return _rup(max(int(c), 1), LANE)


def _pad2(a, rows, cols):
    return jnp.pad(a, ((0, rows - a.shape[0]), (0, cols - a.shape[1])))


def _pad_row(v, cols):
    v = v.reshape(1, -1)
    return jnp.pad(v, ((0, 0), (0, cols - v.shape[1])))


def _act(y, kind):
    if kind == "relu":
        return jnp.maximum(y, 0.0)
    if kind == "hswish":
        return y * jnp.clip(y + 3.0, 0.0, 6.0) * (1.0 / 6.0)
    if kind == "hsigmoid":
        return jnp.clip(y + 3.0, 0.0, 6.0) * (1.0 / 6.0)
    if kind == "sigmoid":
        return 1.0 / (1.0 + jnp.exp(-y))
    return y


# ----------------------------- parameters ------------------------------------

class KeyGen:
    def __init__(self, key):
        self.key = key

    def __call__(self):
        self.key, sub = jax.random.split(self.key)
        return sub


def _bn_fold(c):
    # Eval-mode BatchNorm fold (PyTorch init: gamma=1, beta=0, mean=0, var=1).
    gamma = jnp.ones((c,), jnp.float32)
    beta = jnp.zeros((c,), jnp.float32)
    mean = jnp.zeros((c,), jnp.float32)
    var = jnp.ones((c,), jnp.float32)
    scale = gamma / jnp.sqrt(var + EPS)
    bias = beta - mean * scale
    return scale, bias


def build_net(cfgs, mode, num_classes, width_mult, key):
    kg = KeyGen(key)
    net = {"num_classes": num_classes}
    bf16 = jnp.bfloat16

    # --- stem: 3x3, stride 2, BN, h-swish (folded) ---
    c1 = _make_divisible(16 * width_mult, 8)
    w = jax.random.normal(kg(), (3, 3, 3, c1), jnp.float32) * math.sqrt(2.0 / (9 * c1))
    sc, bi = _bn_fold(c1)
    k_in = 3 * 3 * 3
    net["stem"] = {"w": _pad2((w * sc).reshape(k_in, c1), _cp(k_in), _cp(c1)).astype(bf16),
                   "b": _pad_row(bi, _cp(c1)),
                   "cout": c1, "k": 3, "s": 2, "p": 1,
                   "k_in": k_in, "k_in_p": _cp(k_in)}

    # --- inverted residual blocks ---
    blocks = []
    inp = c1
    exp_size = c1
    for k_, t, c, use_se, use_hs, s in cfgs:
        k_ = int(k_)
        oup = _make_divisible(c * width_mult, 8)
        hid = _make_divisible(inp * t, 8)
        bd = {"k": k_, "s": int(s), "use_se": bool(use_se), "use_hs": bool(use_hs),
              "inp": inp, "hid": hid, "oup": oup,
              "inp_p": _cp(inp), "hid_p": _cp(hid), "oup_p": _cp(oup)}
        if inp != hid:
            w = jax.random.normal(kg(), (inp, hid), jnp.float32) * math.sqrt(2.0 / hid)
            sc, bi = _bn_fold(hid)
            bd["pw_w"] = _pad2(w * sc, bd["inp_p"], bd["hid_p"]).astype(bf16)
            bd["pw_b"] = _pad_row(bi, bd["hid_p"])
        w = jax.random.normal(kg(), (k_, k_, hid), jnp.float32) * math.sqrt(2.0 / (k_ * k_ * hid))
        sc, bi = _bn_fold(hid)
        bd["dw_w"] = _pad2((w * sc).reshape(k_ * k_, hid), k_ * k_, bd["hid_p"])  # f32 (VPU taps)
        bd["dw_b"] = _pad_row(bi, bd["hid_p"])
        if use_se:
            cr = _make_divisible(hid // 4, 8)
            bd["se_w1"] = _pad2(jax.random.normal(kg(), (hid, cr), jnp.float32) * 0.01,
                                bd["hid_p"], _cp(cr)).astype(bf16)
            bd["se_b1"] = _pad_row(jnp.zeros((cr,), jnp.float32), _cp(cr))
            bd["se_w2"] = _pad2(jax.random.normal(kg(), (cr, hid), jnp.float32) * 0.01,
                                _cp(cr), bd["hid_p"]).astype(bf16)
            bd["se_b2"] = _pad_row(jnp.zeros((hid,), jnp.float32), bd["hid_p"])
        w = jax.random.normal(kg(), (hid, oup), jnp.float32) * math.sqrt(2.0 / oup)
        sc, bi = _bn_fold(oup)
        bd["pwl_w"] = _pad2(w * sc, bd["hid_p"], bd["oup_p"]).astype(bf16)
        bd["pwl_b"] = _pad_row(bi, bd["oup_p"])
        blocks.append(bd)
        inp = oup
        exp_size = hid
    net["blocks"] = blocks

    # --- head: 1x1 conv + BN + h-swish, classifier, sigmoid ---
    w = jax.random.normal(kg(), (inp, exp_size), jnp.float32) * math.sqrt(2.0 / exp_size)
    sc, bi = _bn_fold(exp_size)
    head = {"conv_w": _pad2(w * sc, _cp(inp), _cp(exp_size)).astype(bf16),
            "conv_b": _pad_row(bi, _cp(exp_size))}
    oc = {"large": 1280, "small": 1024}[mode]
    oc = _make_divisible(oc * width_mult, 8) if width_mult > 1.0 else oc
    head["fc1_w"] = _pad2(jax.random.normal(kg(), (exp_size, oc), jnp.float32) * 0.01,
                          _cp(exp_size), _cp(oc)).astype(bf16)
    head["fc1_b"] = _pad_row(jnp.zeros((oc,), jnp.float32), _cp(oc))
    head["fc2_w"] = _pad2(jax.random.normal(kg(), (oc, num_classes), jnp.float32) * 0.01,
                          _cp(oc), _cp(num_classes)).astype(bf16)
    head["fc2_b"] = _pad_row(jnp.zeros((num_classes,), jnp.float32), _cp(num_classes))
    net["head"] = head
    return net


# ----------------------------- fused forward ---------------------------------

def make_forward(net, batch, in_hw):
    """Builds the single fused whole-network Pallas kernel; returns forward(x)."""
    n_img = batch
    h0, w0 = in_hw
    st = net["stem"]
    k0, s0, p0 = st["k"], st["s"], st["p"]
    h1 = (h0 + 2 * p0 - k0) // s0 + 1
    w1 = (w0 + 2 * p0 - k0) // s0 + 1
    k_in, k_in_p = st["k_in"], st["k_in_p"]

    weights = []                     # pallas_call inputs after the patches tensor

    def add_w(arr):
        weights.append(arr)
        return len(weights)          # index into kernel inputs (patches is 0)

    scratch = []

    def add_s(shape):
        scratch.append(pltpu.VMEM(shape, jnp.float32))
        return len(scratch) - 1

    def pick_chunk(h):
        for ch in (8, 4, 2, 1):
            if h % ch == 0:
                return ch
        return 1

    stem_plan = {"w": add_w(st["w"]), "b": add_w(st["b"])}
    act0 = add_s((h1 * w1, st["w"].shape[1]))          # per-image stem activation

    blocks_plan = []
    h, w = h1, w1
    cur = act0
    for bd in net["blocks"]:
        k_, s = bd["k"], bd["s"]
        p = (k_ - 1) // 2
        wp = w + 2 * p
        ho = (h + 2 * p - k_) // s + 1
        wo = (w + 2 * p - k_) // s + 1
        bp = {"k": k_, "s": s, "p": p, "h": h, "w": w, "wp": wp, "ho": ho, "wo": wo,
              "chunk": pick_chunk(h),
              "act": "hswish" if bd["use_hs"] else "relu",
              "use_se": bd["use_se"], "has_pw": "pw_w" in bd,
              "identity": (s == 1 and bd["inp"] == bd["oup"]),
              "in_scr": cur}
        if bp["has_pw"]:
            bp["pw_w"] = add_w(bd["pw_w"])
            bp["pw_b"] = add_w(bd["pw_b"])
            bp["hid_scr"] = add_s((h * w, bd["hid_p"]))
        else:
            bp["hid_scr"] = cur
        bp["dw_w"] = add_w(bd["dw_w"])
        bp["dw_b"] = add_w(bd["dw_b"])
        # zero-haloed flat input plane (+ (k-1) guard rows so every tap slab
        # read stays in bounds) and the "wide" stride-1 conv plane
        bp["halo_scr"] = add_s(((h + 2 * p) * wp + 2 * p, bd["hid_p"]))
        bp["wide_scr"] = add_s((h * wp, bd["hid_p"]))
        bp["dwout_scr"] = add_s((ho * wo, bd["hid_p"]))
        if bd["use_se"]:
            bp["se_w1"] = add_w(bd["se_w1"])
            bp["se_b1"] = add_w(bd["se_b1"])
            bp["se_w2"] = add_w(bd["se_w2"])
            bp["se_b2"] = add_w(bd["se_b2"])
        bp["pwl_w"] = add_w(bd["pwl_w"])
        bp["pwl_b"] = add_w(bd["pwl_b"])
        bp["out_scr"] = add_s((ho * wo, bd["oup_p"]))
        blocks_plan.append(bp)
        h, w = ho, wo
        cur = bp["out_scr"]

    hd = net["head"]
    head_plan = {"conv_w": add_w(hd["conv_w"]), "conv_b": add_w(hd["conv_b"]),
                 "fc1_w": add_w(hd["fc1_w"]), "fc1_b": add_w(hd["fc1_b"]),
                 "fc2_w": add_w(hd["fc2_w"]), "fc2_b": add_w(hd["fc2_b"]),
                 "in_scr": cur, "hw": h * w}
    ncls_p = hd["fc2_w"].shape[1]
    n_in = 1 + len(weights)

    def kernel(*refs):
        ins = refs[:n_in]
        out_ref = refs[n_in]
        scr = refs[n_in + 1:]

        def mm(x, wi, bi, act):
            # bf16 operands on the MXU, f32 accumulation, f32 element-wise.
            y = (jnp.dot(x.astype(jnp.bfloat16), ins[wi][...],
                         preferred_element_type=jnp.float32) + ins[bi][...])
            return _act(y, act)

        # ---- stem: lane-dense im2col patches @ folded 3x3 weights, h-swish ----
        scr[act0][...] = mm(ins[0][...], stem_plan["w"], stem_plan["b"], "hswish")

        # ---- inverted residual blocks (all activations stay in VMEM) ----
        for bp in blocks_plan:
            if bp["has_pw"]:
                scr[bp["hid_scr"]][...] = mm(scr[bp["in_scr"]][...],
                                             bp["pw_w"], bp["pw_b"], bp["act"])
            if bp["use_se"] and bp["has_pw"]:
                dw_act, se_act = "none", bp["act"]   # dw -> BN -> SE -> act
            else:
                dw_act, se_act = bp["act"], "none"   # dw -> BN -> act (-> SE)

            # ---------------- depthwise k x k conv (slab-vectorized) ---------
            h_, w_, k_, s_, p_ = bp["h"], bp["w"], bp["k"], bp["s"], bp["p"]
            wp_, ho_, wo_, CH = bp["wp"], bp["ho"], bp["wo"], bp["chunk"]
            hid_ref = scr[bp["hid_scr"]]
            halo = scr[bp["halo_scr"]]
            wide = scr[bp["wide_scr"]]
            dwout = scr[bp["dwout_scr"]]
            c_p = hid_ref.shape[1]
            w_ref = ins[bp["dw_w"]]
            bias = ins[bp["dw_b"]][...]                      # (1, c_p) f32

            # zero halo + guard once, then drop the h_ real rows in place
            halo[...] = jnp.zeros(halo.shape, jnp.float32)
            for r in range(h_):
                halo[pl.ds((r + p_) * wp_ + p_, w_), :] = hid_ref[pl.ds(r * w_, w_), :]

            taps = [w_ref[pl.ds(t, 1), :] for t in range(k_ * k_)]   # (1, c_p) each

            # chunked stride-1 "wide" conv: each tap is one contiguous slab FMA
            for r0 in range(0, h_, CH):
                acc = jnp.zeros((CH * wp_, c_p), jnp.float32)
                for di in range(k_):
                    for dj in range(k_):
                        acc = acc + halo[pl.ds((r0 + di) * wp_ + dj, CH * wp_), :] \
                            * taps[di * k_ + dj]
                wide[pl.ds(r0 * wp_, CH * wp_), :] = _act(acc + bias, dw_act)

            # compact (ho*wo, c_p) output; stride-2 uses strided sublane reads
            for ro in range(ho_):
                if s_ == 1:
                    dwout[pl.ds(ro * wo_, wo_), :] = wide[pl.ds(ro * wp_, wo_), :]
                else:
                    dwout[pl.ds(ro * wo_, wo_), :] = \
                        wide[pl.ds(s_ * ro * wp_, wo_, stride=s_), :]

            # ---------------- squeeze-and-excite (per image) -----------------
            if bp["use_se"]:
                x = dwout[...]
                pooled = jnp.sum(x, axis=0, keepdims=True) * (1.0 / (ho_ * wo_))
                hidden = jnp.maximum(
                    jnp.dot(pooled.astype(jnp.bfloat16), ins[bp["se_w1"]][...],
                            preferred_element_type=jnp.float32) + ins[bp["se_b1"]][...],
                    0.0)
                gate = _act(
                    jnp.dot(hidden.astype(jnp.bfloat16), ins[bp["se_w2"]][...],
                            preferred_element_type=jnp.float32) + ins[bp["se_b2"]][...],
                    "hsigmoid")                               # (1, c_p)
                dwout[...] = _act(x * gate, se_act)           # broadcast multiply

            # ---------------- linear pointwise (+ residual) ------------------
            y = mm(dwout[...], bp["pwl_w"], bp["pwl_b"], "none")
            if bp["identity"]:
                y = y + scr[bp["in_scr"]][...]
            scr[bp["out_scr"]][...] = y

        # ---- head: 1x1 conv, global avg pool, classifier, sigmoid ----
        feat = mm(scr[head_plan["in_scr"]][...],
                  head_plan["conv_w"], head_plan["conv_b"], "hswish")
        pooled = jnp.sum(feat, axis=0, keepdims=True) * (1.0 / head_plan["hw"])
        f1 = mm(pooled, head_plan["fc1_w"], head_plan["fc1_b"], "hswish")
        # TODO(synk): nn.Dropout(0.2) is identity at inference, so it is omitted.
        res = mm(f1, head_plan["fc2_w"], head_plan["fc2_b"], "sigmoid")   # (1, ncls_p)
        out_ref[...] = jnp.broadcast_to(res, out_ref.shape)               # row 0 used

    out_shape = jax.ShapeDtypeStruct((n_img * 8, ncls_p), jnp.float32)

    def forward(x_nchw):
        x = jnp.transpose(x_nchw, (0, 2, 3, 1)).astype(jnp.float32)   # NCHW -> NHWC
        # Stem im2col (tiny). Everything else is in-kernel.
        xp = jnp.pad(x, ((0, 0), (p0, p0), (p0, p0), (0, 0)))
        cols = []
        for di in range(k0):
            for dj in range(k0):
                cols.append(jax.lax.slice(
                    xp, (0, di, dj, 0),
                    (n_img, di + (h1 - 1) * s0 + 1, dj + (w1 - 1) * s0 + 1, 3),
                    (1, s0, s0, 1)))
        patches = jnp.stack(cols, axis=3).reshape(n_img * h1 * w1, k0 * k0 * 3)
        patches = jnp.pad(patches, ((0, 0), (0, k_in_p - k_in))).astype(jnp.bfloat16)

        all_in = [patches] + weights
        in_specs = ([pl.BlockSpec((h1 * w1, k_in_p), lambda i: (i, 0))] +
                    [pl.BlockSpec(a.shape, lambda i, nd=a.ndim: (0,) * nd)
                     for a in weights])
        out = pl.pallas_call(
            kernel,
            out_shape=out_shape,
            grid=(n_img,),
            in_specs=in_specs,
            out_specs=pl.BlockSpec((8, ncls_p), lambda i: (i, 0)),
            scratch_shapes=scratch,
            compiler_params=pltpu.CompilerParams(
                dimension_semantics=("parallel",)),
        )(*all_in)
        return out.reshape(n_img, 8, ncls_p)[:, 0, :net["num_classes"]]

    return forward


# ----------------------------- main ------------------------------------------

if __name__ == "__main__":
    # small MobileNetV3-style config: [k, t, c, use_se, use_hs, stride]
    cfgs = [
        [3, 1,   16, 1, 0, 2],
        [3, 4.5, 24, 0, 0, 2],
        [5, 4,   24, 1, 1, 1],
    ]
    key = jax.random.PRNGKey(0)
    kp, kx = jax.random.split(key)
    net = build_net(cfgs, mode="small", num_classes=10, width_mult=1.0, key=kp)
    x = jax.random.normal(kx, (2, 3, 32, 32), jnp.float32)

    fwd = jax.jit(make_forward(net, batch=2, in_hw=(32, 32)))
    out = jax.block_until_ready(fwd(x))

    assert out.shape == (2, 10), out.shape
    assert bool(jnp.all(jnp.isfinite(out)))
    assert bool(jnp.all((out >= 0.0) & (out <= 1.0)))
    print("KERNEL_OK")
</pallas_src>

<mosaic_0001>
module attributes {stable_mosaic.version = 11 : i64} {
  func.func @kernel(%arg0: i32, %arg1: memref<256x128xbf16, #tpu.memory_space<vmem>>, %arg2: memref<128x128xbf16, #tpu.memory_space<vmem>>, %arg3: memref<1x128xf32, #tpu.memory_space<vmem>>, %arg4: memref<9x128xf32, #tpu.memory_space<vmem>>, %arg5: memref<1x128xf32, #tpu.memory_space<vmem>>, %arg6: memref<128x128xbf16, #tpu.memory_space<vmem>>, %arg7: memref<1x128xf32, #tpu.memory_space<vmem>>, %arg8: memref<128x128xbf16, #tpu.memory_space<vmem>>, %arg9: memref<1x128xf32, #tpu.memory_space<vmem>>, %arg10: memref<128x128xbf16, #tpu.memory_space<vmem>>, %arg11: memref<1x128xf32, #tpu.memory_space<vmem>>, %arg12: memref<128x128xbf16, #tpu.memory_space<vmem>>, %arg13: memref<1x128xf32, #tpu.memory_space<vmem>>, %arg14: memref<9x128xf32, #tpu.memory_space<vmem>>, %arg15: memref<1x128xf32, #tpu.memory_space<vmem>>, %arg16: memref<128x128xbf16, #tpu.memory_space<vmem>>, %arg17: memref<1x128xf32, #tpu.memory_space<vmem>>, %arg18: memref<128x128xbf16, #tpu.memory_space<vmem>>, %arg19: memref<1x128xf32, #tpu.memory_space<vmem>>, %arg20: memref<25x128xf32, #tpu.memory_space<vmem>>, %arg21: memref<1x128xf32, #tpu.memory_space<vmem>>, %arg22: memref<128x128xbf16, #tpu.memory_space<vmem>>, %arg23: memref<1x128xf32, #tpu.memory_space<vmem>>, %arg24: memref<128x128xbf16, #tpu.memory_space<vmem>>, %arg25: memref<1x128xf32, #tpu.memory_space<vmem>>, %arg26: memref<128x128xbf16, #tpu.memory_space<vmem>>, %arg27: memref<1x128xf32, #tpu.memory_space<vmem>>, %arg28: memref<128x128xbf16, #tpu.memory_space<vmem>>, %arg29: memref<1x128xf32, #tpu.memory_space<vmem>>, %arg30: memref<128x1024xbf16, #tpu.memory_space<vmem>>, %arg31: memref<1x1024xf32, #tpu.memory_space<vmem>>, %arg32: memref<1024x128xbf16, #tpu.memory_space<vmem>>, %arg33: memref<1x128xf32, #tpu.memory_space<vmem>>, %arg34: memref<8x128xf32, #tpu.memory_space<vmem>>, %arg35: memref<256x128xf32, #tpu.memory_space<vmem>>, %arg36: memref<326x128xf32, #tpu.memory_space<vmem>>, %arg37: memref<288x128xf32, #tpu.memory_space<vmem>>, %arg38: memref<64x128xf32, #tpu.memory_space<vmem>>, %arg39: memref<64x128xf32, #tpu.memory_space<vmem>>, %arg40: memref<64x128xf32, #tpu.memory_space<vmem>>, %arg41: memref<102x128xf32, #tpu.memory_space<vmem>>, %arg42: memref<80x128xf32, #tpu.memory_space<vmem>>, %arg43: memref<16x128xf32, #tpu.memory_space<vmem>>, %arg44: memref<16x128xf32, #tpu.memory_space<vmem>>, %arg45: memref<16x128xf32, #tpu.memory_space<vmem>>, %arg46: memref<68x128xf32, #tpu.memory_space<vmem>>, %arg47: memref<32x128xf32, #tpu.memory_space<vmem>>, %arg48: memref<16x128xf32, #tpu.memory_space<vmem>>, %arg49: memref<16x128xf32, #tpu.memory_space<vmem>>) attributes {dimension_semantics = [#tpu.dimension_semantics<parallel>], iteration_bounds = array<i64: 2>, scalar_prefetch = 0 : i64, scratch_operands = 15 : i64, tpu.core_type = #tpu.core_type<tc>, window_params = [{transform_indices = @transform_0, window_bounds = array<i64: 256, 128>}, {pipeline_mode = #tpu.pipeline_mode<synchronous>, transform_indices = @transform_1, window_bounds = array<i64: 128, 128>}, {pipeline_mode = #tpu.pipeline_mode<synchronous>, transform_indices = @transform_2, window_bounds = array<i64: 1, 128>}, {pipeline_mode = #tpu.pipeline_mode<synchronous>, transform_indices = @transform_3, window_bounds = array<i64: 9, 128>}, {pipeline_mode = #tpu.pipeline_mode<synchronous>, transform_indices = @transform_4, window_bounds = array<i64: 1, 128>}, {pipeline_mode = #tpu.pipeline_mode<synchronous>, transform_indices = @transform_5, window_bounds = array<i64: 128, 128>}, {pipeline_mode = #tpu.pipeline_mode<synchronous>, transform_indices = @transform_6, window_bounds = array<i64: 1, 128>}, {pipeline_mode = #tpu.pipeline_mode<synchronous>, transform_indices = @transform_7, window_bounds = array<i64: 128, 128>}, {pipeline_mode = #tpu.pipeline_mode<synchronous>, transform_indices = @transform_8, window_bounds = array<i64: 1, 128>}, {pipeline_mode = #tpu.pipeline_mode<synchronous>, transform_indices = @transform_9, window_bounds = array<i64: 128, 128>}, {pipeline_mode = #tpu.pipeline_mode<synchronous>, transform_indices = @transform_10, window_bounds = array<i64: 1, 128>}, {pipeline_mode = #tpu.pipeline_mode<synchronous>, transform_indices = @transform_11, window_bounds = array<i64: 128, 128>}, {pipeline_mode = #tpu.pipeline_mode<synchronous>, transform_indices = @transform_12, window_bounds = array<i64: 1, 128>}, {pipeline_mode = #tpu.pipeline_mode<synchronous>, transform_indices = @transform_13, window_bounds = array<i64: 9, 128>}, {pipeline_mode = #tpu.pipeline_mode<synchronous>, transform_indices = @transform_14, window_bounds = array<i64: 1, 128>}, {pipeline_mode = #tpu.pipeline_mode<synchronous>, transform_indices = @transform_15, window_bounds = array<i64: 128, 128>}, {pipeline_mode = #tpu.pipeline_mode<synchronous>, transform_indices = @transform_16, window_bounds = array<i64: 1, 128>}, {pipeline_mode = #tpu.pipeline_mode<synchronous>, transform_indices = @transform_17, window_bounds = array<i64: 128, 128>}, {pipeline_mode = #tpu.pipeline_mode<synchronous>, transform_indices = @transform_18, window_bounds = array<i64: 1, 128>}, {pipeline_mode = #tpu.pipeline_mode<synchronous>, transform_indices = @transform_19, window_bounds = array<i64: 25, 128>}, {pipeline_mode = #tpu.pipeline_mode<synchronous>, transform_indices = @transform_20, window_bounds = array<i64: 1, 128>}, {pipeline_mode = #tpu.pipeline_mode<synchronous>, transform_indices = @transform_21, window_bounds = array<i64: 128, 128>}, {pipeline_mode = #tpu.pipeline_mode<synchronous>, transform_indices = @transform_22, window_bounds = array<i64: 1, 128>}, {pipeline_mode = #tpu.pipeline_mode<synchronous>, transform_indices = @transform_23, window_bounds = array<i64: 128, 128>}, {pipeline_mode = #tpu.pipeline_mode<synchronous>, transform_indices = @transform_24, window_bounds = array<i64: 1, 128>}, {pipeline_mode = #tpu.pipeline_mode<synchronous>, transform_indices = @transform_25, window_bounds = array<i64: 128, 128>}, {pipeline_mode = #tpu.pipeline_mode<synchronous>, transform_indices = @transform_26, window_bounds = array<i64: 1, 128>}, {pipeline_mode = #tpu.pipeline_mode<synchronous>, transform_indices = @transform_27, window_bounds = array<i64: 128, 128>}, {pipeline_mode = #tpu.pipeline_mode<synchronous>, transform_indices = @transform_28, window_bounds = array<i64: 1, 128>}, {pipeline_mode = #tpu.pipeline_mode<synchronous>, transform_indices = @transform_29, window_bounds = array<i64: 128, 1024>}, {pipeline_mode = #tpu.pipeline_mode<synchronous>, transform_indices = @transform_30, window_bounds = array<i64: 1, 1024>}, {pipeline_mode = #tpu.pipeline_mode<synchronous>, transform_indices = @transform_31, window_bounds = array<i64: 1024, 128>}, {pipeline_mode = #tpu.pipeline_mode<synchronous>, transform_indices = @transform_32, window_bounds = array<i64: 1, 128>}, {transform_indices = @transform_33, window_bounds = array<i64: 8, 128>}]} {
    %c0 = arith.constant 0 : index
    %c0_0 = arith.constant 0 : index
    %0 = vector.load %arg1[%c0, %c0_0] : memref<256x128xbf16, #tpu.memory_space<vmem>>, vector<256x128xbf16>
    %c0_1 = arith.constant 0 : index
    %c0_2 = arith.constant 0 : index
    %1 = vector.load %arg2[%c0_1, %c0_2] : memref<128x128xbf16, #tpu.memory_space<vmem>>, vector<128x128xbf16>
    %cst = arith.constant dense<0.000000e+00> : vector<256x128xf32>
    %2 = tpu.matmul %0, %1, %cst {dimension_numbers = #tpu.dot_dimension_numbers<[1], [0], [0], [1], [0, 0, 1, 1], [], []>} : vector<256x128xbf16>, vector<128x128xbf16>, vector<256x128xf32> -> vector<256x128xf32>
    %c0_3 = arith.constant 0 : index
    %c0_4 = arith.constant 0 : index
    %3 = vector.load %arg3[%c0_3, %c0_4] : memref<1x128xf32, #tpu.memory_space<vmem>>, vector<1x128xf32>
    %4 = vector.broadcast %3 : vector<1x128xf32> to vector<256x128xf32>
    %5 = arith.addf %2, %4 : vector<256x128xf32>
    %cst_5 = arith.constant 3.000000e+00 : f32
    %6 = vector.broadcast %cst_5 : f32 to vector<256x128xf32>
    %7 = arith.addf %5, %6 : vector<256x128xf32>
    %cst_6 = arith.constant 0.000000e+00 : f32
    %cst_7 = arith.constant 6.000000e+00 : f32
    %8 = vector.broadcast %cst_6 : f32 to vector<256x128xf32>
    %9 = arith.maximumf %8, %7 : vector<256x128xf32>
    %10 = vector.broadcast %cst_7 : f32 to vector<256x128xf32>
    %11 = arith.minimumf %10, %9 : vector<256x128xf32>
    %12 = arith.mulf %5, %11 : vector<256x128xf32>
    %cst_8 = arith.constant 0.166666672 : f32
    %13 = vector.broadcast %cst_8 : f32 to vector<256x128xf32>
    %14 = arith.mulf %12, %13 : vector<256x128xf32>
    %c0_9 = arith.constant 0 : index
    %c0_10 = arith.constant 0 : index
    %15 = vector.load %arg35[%c0_9, %c0_10] : memref<256x128xf32, #tpu.memory_space<vmem>>, vector<256x128xf32>
    tpu.vector_store %arg35[%c0_9, %c0_10], %14 {strides = array<i32>} : memref<256x128xf32, #tpu.memory_space<vmem>>, vector<256x128xf32>,
    %c0_11 = arith.constant 0 : index
    %c0_12 = arith.constant 0 : index
    %16 = vector.load %arg5[%c0_11, %c0_12] : memref<1x128xf32, #tpu.memory_space<vmem>>, vector<1x128xf32>
    %cst_13 = arith.constant 0.000000e+00 : f32
    %17 = vector.broadcast %cst_13 : f32 to vector<326x128xf32>
    %c0_14 = arith.constant 0 : index
    %c0_15 = arith.constant 0 : index
    %18 = vector.load %arg36[%c0_14, %c0_15] : memref<326x128xf32, #tpu.memory_space<vmem>>, vector<326x128xf32>
    tpu.vector_store %arg36[%c0_14, %c0_15], %17 {strides = array<i32>} : memref<326x128xf32, #tpu.memory_space<vmem>>, vector<326x128xf32>,
    %c0_16 = arith.constant 0 : index
    %c0_17 = arith.constant 0 : index
    %19 = vector.load %arg35[%c0_16, %c0_17] : memref<256x128xf32, #tpu.memory_space<vmem>>, vector<16x128xf32>
    %c19 = arith.constant 19 : index
    %c0_18 = arith.constant 0 : index
    %20 = vector.load %arg36[%c19, %c0_18] : memref<326x128xf32, #tpu.memory_space<vmem>>, vector<16x128xf32>
    tpu.vector_store %arg36[%c19, %c0_18], %19 {strides = array<i32>} : memref<326x128xf32, #tpu.memory_space<vmem>>, vector<16x128xf32>,
    %c16 = arith.constant 16 : index
    %c0_19 = arith.constant 0 : index
    %21 = vector.load %arg35[%c16, %c0_19] : memref<256x128xf32, #tpu.memory_space<vmem>>, vector<16x128xf32>
    %c37 = arith.constant 37 : index
    %c0_20 = arith.constant 0 : index
    %22 = vector.load %arg36[%c37, %c0_20] : memref<326x128xf32, #tpu.memory_space<vmem>>, vector<16x128xf32>
    tpu.vector_store %arg36[%c37, %c0_20], %21 {strides = array<i32>} : memref<326x128xf32, #tpu.memory_space<vmem>>, vector<16x128xf32>,
    %c32 = arith.constant 32 : index
    %c0_21 = arith.constant 0 : index
    %23 = vector.load %arg35[%c32, %c0_21] : memref<256x128xf32, #tpu.memory_space<vmem>>, vector<16x128xf32>
    %c55 = arith.constant 55 : index
    %c0_22 = arith.constant 0 : index
    %24 = vector.load %arg36[%c55, %c0_22] : memref<326x128xf32, #tpu.memory_space<vmem>>, vector<16x128xf32>
    tpu.vector_store %arg36[%c55, %c0_22], %23 {strides = array<i32>} : memref<326x128xf32, #tpu.memory_space<vmem>>, vector<16x128xf32>,
    %c48 = arith.constant 48 : index
    %c0_23 = arith.constant 0 : index
    %25 = vector.load %arg35[%c48, %c0_23] : memref<256x128xf32, #tpu.memory_space<vmem>>, vector<16x128xf32>
    %c73 = arith.constant 73 : index
    %c0_24 = arith.constant 0 : index
    %26 = vector.load %arg36[%c73, %c0_24] : memref<326x128xf32, #tpu.memory_space<vmem>>, vector<16x128xf32>
    tpu.vector_store %arg36[%c73, %c0_24], %25 {strides = array<i32>} : memref<326x128xf32, #tpu.memory_space<vmem>>, vector<16x128xf32>,
    %c64 = arith.constant 64 : index
    %c0_25 = arith.constant 0 : index
    %27 = vector.load %arg35[%c64, %c0_25] : memref<256x128xf32, #tpu.memory_space<vmem>>, vector<16x128xf32>
    %c91 = arith.constant 91 : index
    %c0_26 = arith.constant 0 : index
    %28 = vector.load %arg36[%c91, %c0_26] : memref<326x128xf32, #tpu.memory_space<vmem>>, vector<16x128xf32>
    tpu.vector_store %arg36[%c91, %c0_26], %27 {strides = array<i32>} : memref<326x128xf32, #tpu.memory_space<vmem>>, vector<16x128xf32>,
    %c80 = arith.constant 80 : index
    %c0_27 = arith.constant 0 : index
    %29 = vector.load %arg35[%c80, %c0_27] : memref<256x128xf32, #tpu.memory_space<vmem>>, vector<16x128xf32>
    %c109 = arith.constant 109 : index
    %c0_28 = arith.constant 0 : index
    %30 = vector.load %arg36[%c109, %c0_28] : memref<326x128xf32, #tpu.memory_space<vmem>>, vector<16x128xf32>
    tpu.vector_store %arg36[%c109, %c0_28], %29 {strides = array<i32>} : memref<326x128xf32, #tpu.memory_space<vmem>>, vector<16x128xf32>,
    %c96 = arith.constant 96 : index
    %c0_29 = arith.constant 0 : index
    %31 = vector.load %arg35[%c96, %c0_29] : memref<256x128xf32, #tpu.memory_space<vmem>>, vector<16x128xf32>
    %c127 = arith.constant 127 : index
    %c0_30 = arith.constant 0 : index
    %32 = vector.load %arg36[%c127, %c0_30] : memref<326x128xf32, #tpu.memory_space<vmem>>, vector<16x128xf32>
    tpu.vector_store %arg36[%c127, %c0_30], %31 {strides = array<i32>} : memref<326x128xf32, #tpu.memory_space<vmem>>, vector<16x128xf32>,
    %c112 = arith.constant 112 : index
    %c0_31 = arith.constant 0 : index
    %33 = vector.load %arg35[%c112, %c0_31] : memref<256x128xf32, #tpu.memory_space<vmem>>, vector<16x128xf32>
    %c145 = arith.constant 145 : index
    %c0_32 = arith.constant 0 : index
    %34 = vector.load %arg36[%c145, %c0_32] : memref<326x128xf32, #tpu.memory_space<vmem>>, vector<16x128xf32>
    tpu.vector_store %arg36[%c145, %c0_32], %33 {strides = array<i32>} : memref<326x128xf32, #tpu.memory_space<vmem>>, vector<16x128xf32>,
    %c128 = arith.constant 128 : index
    %c0_33 = arith.constant 0 : index
    %35 = vector.load %arg35[%c128, %c0_33] : memref<256x128xf32, #tpu.memory_space<vmem>>, vector<16x128xf32>
    %c163 = arith.constant 163 : index
    %c0_34 = arith.constant 0 : index
    %36 = vector.load %arg36[%c163, %c0_34] : memref<326x128xf32, #tpu.memory_space<vmem>>, vector<16x128xf32>
    tpu.vector_store %arg36[%c163, %c0_34], %35 {strides = array<i32>} : memref<326x128xf32, #tpu.memory_space<vmem>>, vector<16x128xf32>,
    %c144 = arith.constant 144 : index
    %c0_35 = arith.constant 0 : index
    %37 = vector.load %arg35[%c144, %c0_35] : memref<256x128xf32, #tpu.memory_space<vmem>>, vector<16x128xf32>
    %c181 = arith.constant 181 : index
    %c0_36 = arith.constant 0 : index
    %38 = vector.load %arg36[%c181, %c0_36] : memref<326x128xf32, #tpu.memory_space<vmem>>, vector<16x128xf32>
    tpu.vector_store %arg36[%c181, %c0_36], %37 {strides = array<i32>} : memref<326x128xf32, #tpu.memory_space<vmem>>, vector<16x128xf32>,
    %c160 = arith.constant 160 : index
    %c0_37 = arith.constant 0 : index
    %39 = vector.load %arg35[%c160, %c0_37] : memref<256x128xf32, #tpu.memory_space<vmem>>, vector<16x128xf32>
    %c199 = arith.constant 199 : index
    %c0_38 = arith.constant 0 : index
    %40 = vector.load %arg36[%c199, %c0_38] : memref<326x128xf32, #tpu.memory_space<vmem>>, vector<16x128xf32>
    tpu.vector_store %arg36[%c199, %c0_38], %39 {strides = array<i32>} : memref<326x128xf32, #tpu.memory_space<vmem>>, vector<16x128xf32>,
    %c176 = arith.constant 176 : index
    %c0_39 = arith.constant 0 : index
    %41 = vector.load %arg35[%c176, %c0_39] : memref<256x128xf32, #tpu.memory_space<vmem>>, vector<16x128xf32>
    %c217 = arith.constant 217 : index
    %c0_40 = arith.constant 0 : index
    %42 = vector.load %arg36[%c217, %c0_40] : memref<326x128xf32, #tpu.memory_space<vmem>>, vector<16x128xf32>
    tpu.vector_store %arg36[%c217, %c0_40], %41 {strides = array<i32>} : memref<326x128xf32, #tpu.memory_space<vmem>>, vector<16x128xf32>,
    %c192 = arith.constant 192 : index
    %c0_41 = arith.constant 0 : index
    %43 = vector.load %arg35[%c192, %c0_41] : memref<256x128xf32, #tpu.memory_space<vmem>>, vector<16x128xf32>
    %c235 = arith.constant 235 : index
    %c0_42 = arith.constant 0 : index
    %44 = vector.load %arg36[%c235, %c0_42] : memref<326x128xf32, #tpu.memory_space<vmem>>, vector<16x128xf32>
    tpu.vector_store %arg36[%c235, %c0_42], %43 {strides = array<i32>} : memref<326x128xf32, #tpu.memory_space<vmem>>, vector<16x128xf32>,
    %c208 = arith.constant 208 : index
    %c0_43 = arith.constant 0 : index
    %45 = vector.load %arg35[%c208, %c0_43] : memref<256x128xf32, #tpu.memory_space<vmem>>, vector<16x128xf32>
    %c253 = arith.constant 253 : index
    %c0_44 = arith.constant 0 : index
    %46 = vector.load %arg36[%c253, %c0_44] : memref<326x128xf32, #tpu.memory_space<vmem>>, vector<16x128xf32>
    tpu.vector_store %arg36[%c253, %c0_44], %45 {strides = array<i32>} : memref<326x128xf32, #tpu.memory_space<vmem>>, vector<16x128xf32>,
    %c224 = arith.constant 224 : index
    %c0_45 = arith.constant 0 : index
    %47 = vector.load %arg35[%c224, %c0_45] : memref<256x128xf32, #tpu.memory_space<vmem>>, vector<16x128xf32>
    %c271 = arith.constant 271 : index
    %c0_46 = arith.constant 0 : index
    %48 = vector.load %arg36[%c271, %c0_46] : memref<326x128xf32, #tpu.memory_space<vmem>>, vector<16x128xf32>
    tpu.vector_store %arg36[%c271, %c0_46], %47 {strides = array<i32>} : memref<326x128xf32, #tpu.memory_space<vmem>>, vector<16x128xf32>,
    %c240 = arith.constant 240 : index
    %c0_47 = arith.constant 0 : index
    %49 = vector.load %arg35[%c240, %c0_47] : memref<256x128xf32, #tpu.memory_space<vmem>>, vector<16x128xf32>
    %c289 = arith.constant 289 : index
    %c0_48 = arith.constant 0 : index
    %50 = vector.load %arg36[%c289, %c0_48] : memref<326x128xf32, #tpu.memory_space<vmem>>, vector<16x128xf32>
    tpu.vector_store %arg36[%c289, %c0_48], %49 {strides = array<i32>} : memref<326x128xf32, #tpu.memory_space<vmem>>, vector<16x128xf32>,
    %c0_49 = arith.constant 0 : index
    %c0_50 = arith.constant 0 : index
    %51 = vector.load %arg4[%c0_49, %c0_50] : memref<9x128xf32, #tpu.memory_space<vmem>>, vector<1x128xf32>
    %c1 = arith.constant 1 : index
    %c0_51 = arith.constant 0 : index
    %52 = vector.load %arg4[%c1, %c0_51] : memref<9x128xf32, #tpu.memory_space<vmem>>, vector<1x128xf32>
    %c2 = arith.constant 2 : index
    %c0_52 = arith.constant 0 : index
    %53 = vector.load %arg4[%c2, %c0_52] : memref<9x128xf32, #tpu.memory_space<vmem>>, vector<1x128xf32>
    %c3 = arith.constant 3 : index
    %c0_53 = arith.constant 0 : index
    %54 = vector.load %arg4[%c3, %c0_53] : memref<9x128xf32, #tpu.memory_space<vmem>>, vector<1x128xf32>
    %c4 = arith.constant 4 : index
    %c0_54 = arith.constant 0 : index
    %55 = vector.load %arg4[%c4, %c0_54] : memref<9x128xf32, #tpu.memory_space<vmem>>, vector<1x128xf32>
    %c5 = arith.constant 5 : index
    %c0_55 = arith.constant 0 : index
    %56 = vector.load %arg4[%c5, %c0_55] : memref<9x128xf32, #tpu.memory_space<vmem>>, vector<1x128xf32>
    %c6 = arith.constant 6 : index
    %c0_56 = arith.constant 0 : index
    %57 = vector.load %arg4[%c6, %c0_56] : memref<9x128xf32, #tpu.memory_space<vmem>>, vector<1x128xf32>
    %c7 = arith.constant 7 : index
    %c0_57 = arith.constant 0 : index
    %58 = vector.load %arg4[%c7, %c0_57] : memref<9x128xf32, #tpu.memory_space<vmem>>, vector<1x128xf32>
    %c8 = arith.constant 8 : index
    %c0_58 = arith.constant 0 : index
    %59 = vector.load %arg4[%c8, %c0_58] : memref<9x128xf32, #tpu.memory_space<vmem>>, vector<1x128xf32>
    %cst_59 = arith.constant 0.000000e+00 : f32
    %60 = vector.broadcast %cst_59 : f32 to vector<144x128xf32>
    %c0_60 = arith.constant 0 : index
    %c0_61 = arith.constant 0 : index
    %61 = vector.load %arg36[%c0_60, %c0_61] : memref<326x128xf32, #tpu.memory_space<vmem>>, vector<144x128xf32>
    %62 = vector.broadcast %51 : vector<1x128xf32> to vector<144x128xf32>
    %63 = arith.mulf %61, %62 : vector<144x128xf32>
    %64 = arith.addf %60, %63 : vector<144x128xf32>
    %c1_62 = arith.constant 1 : index
    %c0_63 = arith.constant 0 : index
    %65 = vector.load %arg36[%c1_62, %c0_63] : memref<326x128xf32, #tpu.memory_space<vmem>>, vector<144x128xf32>
    %66 = vector.broadcast %52 : vector<1x128xf32> to vector<144x128xf32>
    %67 = arith.mulf %65, %66 : vector<144x128xf32>
    %68 = arith.addf %64, %67 : vector<144x128xf32>
    %c2_64 = arith.constant 2 : index
    %c0_65 = arith.constant 0 : index
    %69 = vector.load %arg36[%c2_64, %c0_65] : memref<326x128xf32, #tpu.memory_space<vmem>>, vector<144x128xf32>
    %70 = vector.broadcast %53 : vector<1x128xf32> to vector<144x128xf32>
    %71 = arith.mulf %69, %70 : vector<144x128xf32>
    %72 = arith.addf %68, %71 : vector<144x128xf32>
    %c18 = arith.constant 18 : index
    %c0_66 = arith.constant 0 : index
    %73 = vector.load %arg36[%c18, %c0_66] : memref<326x128xf32, #tpu.memory_space<vmem>>, vector<144x128xf32>
    %74 = vector.broadcast %54 : vector<1x128xf32> to vector<144x128xf32>
    %75 = arith.mulf %73, %74 : vector<144x128xf32>
    %76 = arith.addf %72, %75 : vector<144x128xf32>
    %c19_67 = arith.constant 19 : index
    %c0_68 = arith.constant 0 : index
    %77 = vector.load %arg36[%c19_67, %c0_68] : memref<326x128xf32, #tpu.memory_space<vmem>>, vector<144x128xf32>
    %78 = vector.broadcast %55 : vector<1x128xf32> to vector<144x128xf32>
    %79 = arith.mulf %77, %78 : vector<144x128xf32>
    %80 = arith.addf %76, %79 : vector<144x128xf32>
    %c20 = arith.constant 20 : index
    %c0_69 = arith.constant 0 : index
    %81 = vector.load %arg36[%c20, %c0_69] : memref<326x128xf32, #tpu.memory_space<vmem>>, vector<144x128xf32>
    %82 = vector.broadcast %56 : vector<1x128xf32> to vector<144x128xf32>
    %83 = arith.mulf %81, %82 : vector<144x128xf32>
    %84 = arith.addf %80, %83 : vector<144x128xf32>
    %c36 = arith.constant 36 : index
    %c0_70 = arith.constant 0 : index
    %85 = vector.load %arg36[%c36, %c0_70] : memref<326x128xf32, #tpu.memory_space<vmem>>, vector<144x128xf32>
    %86 = vector.broadcast %57 : vector<1x128xf32> to vector<144x128xf32>
    %87 = arith.mulf %85, %86 : vector<144x128xf32>
    %88 = arith.addf %84, %87 : vector<144x128xf32>
    %c37_71 = arith.constant 37 : index
    %c0_72 = arith.constant 0 : index
    %89 = vector.load %arg36[%c37_71, %c0_72] : memref<326x128xf32, #tpu.memory_space<vmem>>, vector<144x128xf32>
    %90 = vector.broadcast %58 : vector<1x128xf32> to vector<144x128xf32>
    %91 = arith.mulf %89, %90 : vector<144x128xf32>
    %92 = arith.addf %88, %91 : vector<144x128xf32>
    %c38 = arith.constant 38 : index
    %c0_73 = arith.constant 0 : index
    %93 = vector.load %arg36[%c38, %c0_73] : memref<326x128xf32, #tpu.memory_space<vmem>>, vector<144x128xf32>
    %94 = vector.broadcast %59 : vector<1x128xf32> to vector<144x128xf32>
    %95 = arith.mulf %93, %94 : vector<144x128xf32>
    %96 = arith.addf %92, %95 : vector<144x128xf32>
    %97 = vector.broadcast %16 : vector<1x128xf32> to vector<144x128xf32>
    %98 = arith.addf %96, %97 : vector<144x128xf32>
    %cst_74 = arith.constant 0.000000e+00 : f32
    %99 = vector.broadcast %cst_74 : f32 to vector<144x128xf32>
    %100 = arith.maximumf %98, %99 : vector<144x128xf32>
    %c0_75 = arith.constant 0 : index
    %c0_76 = arith.constant 0 : index
    %101 = vector.load %arg37[%c0_75, %c0_76] : memref<288x128xf32, #tpu.memory_space<vmem>>, vector<144x128xf32>
    tpu.vector_store %arg37[%c0_75, %c0_76], %100 {strides = array<i32>} : memref<288x128xf32, #tpu.memory_space<vmem>>, vector<144x128xf32>,
    %cst_77 = arith.constant 0.000000e+00 : f32
    %102 = vector.broadcast %cst_77 : f32 to vector<144x128xf32>
    %c144_78 = arith.constant 144 : index
    %c0_79 = arith.constant 0 : index
    %103 = vector.load %arg36[%c144_78, %c0_79] : memref<326x128xf32, #tpu.memory_space<vmem>>, vector<144x128xf32>
    %104 = vector.broadcast %51 : vector<1x128xf32> to vector<144x128xf32>
    %105 = arith.mulf %103, %104 : vector<144x128xf32>
    %106 = arith.addf %102, %105 : vector<144x128xf32>
    %c145_80 = arith.constant 145 : index
    %c0_81 = arith.constant 0 : index
    %107 = vector.load %arg36[%c145_80, %c0_81] : memref<326x128xf32, #tpu.memory_space<vmem>>, vector<144x128xf32>
    %108 = vector.broadcast %52 : vector<1x128xf32> to vector<144x128xf32>
    %109 = arith.mulf %107, %108 : vector<144x128xf32>
    %110 = arith.addf %106, %109 : vector<144x128xf32>
    %c146 = arith.constant 146 : index
    %c0_82 = arith.constant 0 : index
    %111 = vector.load %arg36[%c146, %c0_82] : memref<326x128xf32, #tpu.memory_space<vmem>>, vector<144x128xf32>
    %112 = vector.broadcast %53 : vector<1x128xf32> to vector<144x128xf32>
    %113 = arith.mulf %111, %112 : vector<144x128xf32>
    %114 = arith.addf %110, %113 : vector<144x128xf32>
    %c162 = arith.constant 162 : index
    %c0_83 = arith.constant 0 : index
    %115 = vector.load %arg36[%c162, %c0_83] : memref<326x128xf32, #tpu.memory_space<vmem>>, vector<144x128xf32>
    %116 = vector.broadcast %54 : vector<1x128xf32> to vector<144x128xf32>
    %117 = arith.mulf %115, %116 : vector<144x128xf32>
    %118 = arith.addf %114, %117 : vector<144x128xf32>
    %c163_84 = arith.constant 163 : index
    %c0_85 = arith.constant 0 : index
    %119 = vector.load %arg36[%c163_84, %c0_85] : memref<326x128xf32, #tpu.memory_space<vmem>>, vector<144x128xf32>
    %120 = vector.broadcast %55 : vector<1x128xf32> to vector<144x128xf32>
    %121 = arith.mulf %119, %120 : vector<144x128xf32>
    %122 = arith.addf %118, %121 : vector<144x128xf32>
    %c164 = arith.constant 164 : index
    %c0_86 = arith.constant 0 : index
    %123 = vector.load %arg36[%c164, %c0_86] : memref<326x128xf32, #tpu.memory_space<vmem>>, vector<144x128xf32>
    %124 = vector.broadcast %56 : vector<1x128xf32> to vector<144x128xf32>
    %125 = arith.mulf %123, %124 : vector<144x128xf32>
    %126 = arith.addf %122, %125 : vector<144x128xf32>
    %c180 = arith.constant 180 : index
    %c0_87 = arith.constant 0 : index
    %127 = vector.load %arg36[%c180, %c0_87] : memref<326x128xf32, #tpu.memory_space<vmem>>, vector<144x128xf32>
    %128 = vector.broadcast %57 : vector<1x128xf32> to vector<144x128xf32>
    %129 = arith.mulf %127, %128 : vector<144x128xf32>
    %130 = arith.addf %126, %129 : vector<144x128xf32>
    %c181_88 = arith.constant 181 : index
    %c0_89 = arith.constant 0 : index
    %131 = vector.load %arg36[%c181_88, %c0_89] : memref<326x128xf32, #tpu.memory_space<vmem>>, vector<144x128xf32>
    %132 = vector.broadcast %58 : vector<1x128xf32> to vector<144x128xf32>
    %133 = arith.mulf %131, %132 : vector<144x128xf32>
    %134 = arith.addf %130, %133 : vector<144x128xf32>
    %c182 = arith.constant 182 : index
    %c0_90 = arith.constant 0 : index
    %135 = vector.load %arg36[%c182, %c0_90] : memref<326x128xf32, #tpu.memory_space<vmem>>, vector<144x128xf32>
    %136 = vector.broadcast %59 : vector<1x128xf32> to vector<144x128xf32>
    %137 = arith.mulf %135, %136 : vector<144x128xf32>
    %138 = arith.addf %134, %137 : vector<144x128xf32>
    %139 = vector.broadcast %16 : vector<1x128xf32> to vector<144x128xf32>
    %140 = arith.addf %138, %139 : vector<144x128xf32>
    %cst_91 = arith.constant 0.000000e+00 : f32
    %141 = vector.broadcast %cst_91 : f32 to vector<144x128xf32>
    %142 = arith.maximumf %140, %141 : vector<144x128xf32>
    %c144_92 = arith.constant 144 : index
    %c0_93 = arith.constant 0 : index
    %143 = vector.load %arg37[%c144_92, %c0_93] : memref<288x128xf32, #tpu.memory_space<vmem>>, vector<144x128xf32>
    tpu.vector_store %arg37[%c144_92, %c0_93], %142 {strides = array<i32>} : memref<288x128xf32, #tpu.memory_space<vmem>>, vector<144x128xf32>,
    %c0_94 = arith.constant 0 : index
    %c0_95 = arith.constant 0 : index
    %144 = tpu.strided_load %arg37[%c0_94, %c0_95] {strides = array<i32: 2, 1>} : memref<288x128xf32, #tpu.memory_space<vmem>>, vector<8x128xf32>
    %c0_96 = arith.constant 0 : index
    %c0_97 = arith.constant 0 : index
    %145 = vector.load %arg38[%c0_96, %c0_97] : memref<64x128xf32, #tpu.memory_space<vmem>>, vector<8x128xf32>
    tpu.vector_store %arg38[%c0_96, %c0_97], %144 {strides = array<i32>} : memref<64x128xf32, #tpu.memory_space<vmem>>, vector<8x128xf32>,
    %c36_98 = arith.constant 36 : index
    %c0_99 = arith.constant 0 : index
    %146 = tpu.strided_load %arg37[%c36_98, %c0_99] {strides = array<i32: 2, 1>} : memref<288x128xf32, #tpu.memory_space<vmem>>, vector<8x128xf32>
    %c8_100 = arith.constant 8 : index
    %c0_101 = arith.constant 0 : index
    %147 = vector.load %arg38[%c8_100, %c0_101] : memref<64x128xf32, #tpu.memory_space<vmem>>, vector<8x128xf32>
    tpu.vector_store %arg38[%c8_100, %c0_101], %146 {strides = array<i32>} : memref<64x128xf32, #tpu.memory_space<vmem>>, vector<8x128xf32>,
    %c72 = arith.constant 72 : index
    %c0_102 = arith.constant 0 : index
    %148 = tpu.strided_load %arg37[%c72, %c0_102] {strides = array<i32: 2, 1>} : memref<288x128xf32, #tpu.memory_space<vmem>>, vector<8x128xf32>
    %c16_103 = arith.constant 16 : index
    %c0_104 = arith.constant 0 : index
    %149 = vector.load %arg38[%c16_103, %c0_104] : memref<64x128xf32, #tpu.memory_space<vmem>>, vector<8x128xf32>
    tpu.vector_store %arg38[%c16_103, %c0_104], %148 {strides = array<i32>} : memref<64x128xf32, #tpu.memory_space<vmem>>, vector<8x128xf32>,
    %c108 = arith.constant 108 : index
    %c0_105 = arith.constant 0 : index
    %150 = tpu.strided_load %arg37[%c108, %c0_105] {strides = array<i32: 2, 1>} : memref<288x128xf32, #tpu.memory_space<vmem>>, vector<8x128xf32>
    %c24 = arith.constant 24 : index
    %c0_106 = arith.constant 0 : index
    %151 = vector.load %arg38[%c24, %c0_106] : memref<64x128xf32, #tpu.memory_space<vmem>>, vector<8x128xf32>
    tpu.vector_store %arg38[%c24, %c0_106], %150 {strides = array<i32>} : memref<64x128xf32, #tpu.memory_space<vmem>>, vector<8x128xf32>,
    %c144_107 = arith.constant 144 : index
    %c0_108 = arith.constant 0 : index
    %152 = tpu.strided_load %arg37[%c144_107, %c0_108] {strides = array<i32: 2, 1>} : memref<288x128xf32, #tpu.memory_space<vmem>>, vector<8x128xf32>
    %c32_109 = arith.constant 32 : index
    %c0_110 = arith.constant 0 : index
    %153 = vector.load %arg38[%c32_109, %c0_110] : memref<64x128xf32, #tpu.memory_space<vmem>>, vector<8x128xf32>
    tpu.vector_store %arg38[%c32_109, %c0_110], %152 {strides = array<i32>} : memref<64x128xf32, #tpu.memory_space<vmem>>, vector<8x128xf32>,
    %c180_111 = arith.constant 180 : index
    %c0_112 = arith.constant 0 : index
    %154 = tpu.strided_load %arg37[%c180_111, %c0_112] {strides = array<i32: 2, 1>} : memref<288x128xf32, #tpu.memory_space<vmem>>, vector<8x128xf32>
    %c40 = arith.constant 40 : index
    %c0_113 = arith.constant 0 : index
    %155 = vector.load %arg38[%c40, %c0_113] : memref<64x128xf32, #tpu.memory_space<vmem>>, vector<8x128xf32>
    tpu.vector_store %arg38[%c40, %c0_113], %154 {strides = array<i32>} : memref<64x128xf32, #tpu.memory_space<vmem>>, vector<8x128xf32>,
    %c216 = arith.constant 216 : index
    %c0_114 = arith.constant 0 : index
    %156 = tpu.strided_load %arg37[%c216, %c0_114] {strides = array<i32: 2, 1>} : memref<288x128xf32, #tpu.memory_space<vmem>>, vector<8x128xf32>
    %c48_115 = arith.constant 48 : index
    %c0_116 = arith.constant 0 : index
    %157 = vector.load %arg38[%c48_115, %c0_116] : memref<64x128xf32, #tpu.memory_space<vmem>>, vector<8x128xf32>
    tpu.vector_store %arg38[%c48_115, %c0_116], %156 {strides = array<i32>} : memref<64x128xf32, #tpu.memory_space<vmem>>, vector<8x128xf32>,
    %c252 = arith.constant 252 : index
    %c0_117 = arith.constant 0 : index
    %158 = tpu.strided_load %arg37[%c252, %c0_117] {strides = array<i32: 2, 1>} : memref<288x128xf32, #tpu.memory_space<vmem>>, vector<8x128xf32>
    %c56 = arith.constant 56 : index
    %c0_118 = arith.constant 0 : index
    %159 = vector.load %arg38[%c56, %c0_118] : memref<64x128xf32, #tpu.memory_space<vmem>>, vector<8x128xf32>
    tpu.vector_store %arg38[%c56, %c0_118], %158 {strides = array<i32>} : memref<64x128xf32, #tpu.memory_space<vmem>>, vector<8x128xf32>,
    %c0_119 = arith.constant 0 : index
    %c0_120 = arith.constant 0 : index
    %160 = vector.load %arg38[%c0_119, %c0_120] : memref<64x128xf32, #tpu.memory_space<vmem>>, vector<64x128xf32>
    %cst_121 = arith.constant dense<0.000000e+00> : vector<128xf32>
    %161 = vector.multi_reduction <add>, %160, %cst_121 [0] : vector<64x128xf32> to vector<128xf32>
    %162 = vector.shape_cast %161 : vector<128xf32> to vector<1x128xf32>
    %cst_122 = arith.constant 1.562500e-02 : f32
    %163 = vector.broadcast %cst_122 : f32 to vector<1x128xf32>
    %164 = arith.mulf %162, %163 : vector<1x128xf32>
    %165 = arith.truncf %164 : vector<1x128xf32> to vector<1x128xbf16>
    %c0_123 = arith.constant 0 : index
    %c0_124 = arith.constant 0 : index
    %166 = vector.load %arg6[%c0_123, %c0_124] : memref<128x128xbf16, #tpu.memory_space<vmem>>, vector<128x128xbf16>
    %cst_125 = arith.constant dense<0.000000e+00> : vector<1x128xf32>
    %167 = tpu.matmul %165, %166, %cst_125 {dimension_numbers = #tpu.dot_dimension_numbers<[1], [0], [0], [1], [0, 0, 1, 1], [], []>} : vector<1x128xbf16>, vector<128x128xbf16>, vector<1x128xf32> -> vector<1x128xf32>
    %c0_126 = arith.constant 0 : index
    %c0_127 = arith.constant 0 : index
    %168 = vector.load %arg7[%c0_126, %c0_127] : memref<1x128xf32, #tpu.memory_space<vmem>>, vector<1x128xf32>
    %169 = arith.addf %167, %168 : vector<1x128xf32>
    %cst_128 = arith.constant 0.000000e+00 : f32
    %170 = vector.broadcast %cst_128 : f32 to vector<1x128xf32>
    %171 = arith.maximumf %169, %170 : vector<1x128xf32>
    %172 = arith.truncf %171 : vector<1x128xf32> to vector<1x128xbf16>
    %c0_129 = arith.constant 0 : index
    %c0_130 = arith.constant 0 : index
    %173 = vector.load %arg8[%c0_129, %c0_130] : memref<128x128xbf16, #tpu.memory_space<vmem>>, vector<128x128xbf16>
    %cst_131 = arith.constant dense<0.000000e+00> : vector<1x128xf32>
    %174 = tpu.matmul %172, %173, %cst_131 {dimension_numbers = #tpu.dot_dimension_numbers<[1], [0], [0], [1], [0, 0, 1, 1], [], []>} : vector<1x128xbf16>, vector<128x128xbf16>, vector<1x128xf32> -> vector<1x128xf32>
    %c0_132 = arith.constant 0 : index
    %c0_133 = arith.constant 0 : index
    %175 = vector.load %arg9[%c0_132, %c0_133] : memref<1x128xf32, #tpu.memory_space<vmem>>, vector<1x128xf32>
    %176 = arith.addf %174, %175 : vector<1x128xf32>
    %cst_134 = arith.constant 3.000000e+00 : f32
    %177 = vector.broadcast %cst_134 : f32 to vector<1x128xf32>
    %178 = arith.addf %176, %177 : vector<1x128xf32>
    %cst_135 = arith.constant 0.000000e+00 : f32
    %cst_136 = arith.constant 6.000000e+00 : f32
    %179 = vector.broadcast %cst_135 : f32 to vector<1x128xf32>
    %180 = arith.maximumf %179, %178 : vector<1x128xf32>
    %181 = vector.broadcast %cst_136 : f32 to vector<1x128xf32>
    %182 = arith.minimumf %181, %180 : vector<1x128xf32>
    %cst_137 = arith.constant 0.166666672 : f32
    %183 = vector.broadcast %cst_137 : f32 to vector<1x128xf32>
    %184 = arith.mulf %182, %183 : vector<1x128xf32>
    %185 = vector.broadcast %184 : vector<1x128xf32> to vector<64x128xf32>
    %186 = arith.mulf %160, %185 : vector<64x128xf32>
    %c0_138 = arith.constant 0 : index
    %c0_139 = arith.constant 0 : index
    %187 = vector.load %arg38[%c0_138, %c0_139] : memref<64x128xf32, #tpu.memory_space<vmem>>, vector<64x128xf32>
    tpu.vector_store %arg38[%c0_138, %c0_139], %186 {strides = array<i32>} : memref<64x128xf32, #tpu.memory_space<vmem>>, vector<64x128xf32>,
    %c0_140 = arith.constant 0 : index
    %c0_141 = arith.constant 0 : index
    %188 = vector.load %arg38[%c0_140, %c0_141] : memref<64x128xf32, #tpu.memory_space<vmem>>, vector<64x128xf32>
    %189 = arith.truncf %188 : vector<64x128xf32> to vector<64x128xbf16>
    %c0_142 = arith.constant 0 : index
    %c0_143 = arith.constant 0 : index
    %190 = vector.load %arg10[%c0_142, %c0_143] : memref<128x128xbf16, #tpu.memory_space<vmem>>, vector<128x128xbf16>
    %cst_144 = arith.constant dense<0.000000e+00> : vector<64x128xf32>
    %191 = tpu.matmul %189, %190, %cst_144 {dimension_numbers = #tpu.dot_dimension_numbers<[1], [0], [0], [1], [0, 0, 1, 1], [], []>} : vector<64x128xbf16>, vector<128x128xbf16>, vector<64x128xf32> -> vector<64x128xf32>
    %c0_145 = arith.constant 0 : index
    %c0_146 = arith.constant 0 : index
    %192 = vector.load %arg11[%c0_145, %c0_146] : memref<1x128xf32, #tpu.memory_space<vmem>>, vector<1x128xf32>
    %193 = vector.broadcast %192 : vector<1x128xf32> to vector<64x128xf32>
    %194 = arith.addf %191, %193 : vector<64x128xf32>
    %c0_147 = arith.constant 0 : index
    %c0_148 = arith.constant 0 : index
    %195 = vector.load %arg39[%c0_147, %c0_148] : memref<64x128xf32, #tpu.memory_space<vmem>>, vector<64x128xf32>
    tpu.vector_store %arg39[%c0_147, %c0_148], %194 {strides = array<i32>} : memref<64x128xf32, #tpu.memory_space<vmem>>, vector<64x128xf32>,
    %c0_149 = arith.constant 0 : index
    %c0_150 = arith.constant 0 : index
    %196 = vector.load %arg39[%c0_149, %c0_150] : memref<64x128xf32, #tpu.memory_space<vmem>>, vector<64x128xf32>
    %197 = arith.truncf %196 : vector<64x128xf32> to vector<64x128xbf16>
    %c0_151 = arith.constant 0 : index
    %c0_152 = arith.constant 0 : index
    %198 = vector.load %arg12[%c0_151, %c0_152] : memref<128x128xbf16, #tpu.memory_space<vmem>>, vector<128x128xbf16>
    %cst_153 = arith.constant dense<0.000000e+00> : vector<64x128xf32>
    %199 = tpu.matmul %197, %198, %cst_153 {dimension_numbers = #tpu.dot_dimension_numbers<[1], [0], [0], [1], [0, 0, 1, 1], [], []>} : vector<64x128xbf16>, vector<128x128xbf16>, vector<64x128xf32> -> vector<64x128xf32>
    %c0_154 = arith.constant 0 : index
    %c0_155 = arith.constant 0 : index
    %200 = vector.load %arg13[%c0_154, %c0_155] : memref<1x128xf32, #tpu.memory_space<vmem>>, vector<1x128xf32>
    %201 = vector.broadcast %200 : vector<1x128xf32> to vector<64x128xf32>
    %202 = arith.addf %199, %201 : vector<64x128xf32>
    %cst_156 = arith.constant 0.000000e+00 : f32
    %203 = vector.broadcast %cst_156 : f32 to vector<64x128xf32>
    %204 = arith.maximumf %202, %203 : vector<64x128xf32>
    %c0_157 = arith.constant 0 : index
    %c0_158 = arith.constant 0 : index
    %205 = vector.load %arg40[%c0_157, %c0_158] : memref<64x128xf32, #tpu.memory_space<vmem>>, vector<64x128xf32>
    tpu.vector_store %arg40[%c0_157, %c0_158], %204 {strides = array<i32>} : memref<64x128xf32, #tpu.memory_space<vmem>>, vector<64x128xf32>,
    %c0_159 = arith.constant 0 : index
    %c0_160 = arith.constant 0 : index
    %206 = vector.load %arg15[%c0_159, %c0_160] : memref<1x128xf32, #tpu.memory_space<vmem>>, vector<1x128xf32>
    %cst_161 = arith.constant 0.000000e+00 : f32
    %207 = vector.broadcast %cst_161 : f32 to vector<102x128xf32>
    %c0_162 = arith.constant 0 : index
    %c0_163 = arith.constant 0 : index
    %208 = vector.load %arg41[%c0_162, %c0_163] : memref<102x128xf32, #tpu.memory_space<vmem>>, vector<102x128xf32>
    tpu.vector_store %arg41[%c0_162, %c0_163], %207 {strides = array<i32>} : memref<102x128xf32, #tpu.memory_space<vmem>>, vector<102x128xf32>,
    %c0_164 = arith.constant 0 : index
    %c0_165 = arith.constant 0 : index
    %209 = vector.load %arg40[%c0_164, %c0_165] : memref<64x128xf32, #tpu.memory_space<vmem>>, vector<8x128xf32>
    %c11 = arith.constant 11 : index
    %c0_166 = arith.constant 0 : index
    %210 = vector.load %arg41[%c11, %c0_166] : memref<102x128xf32, #tpu.memory_space<vmem>>, vector<8x128xf32>
    tpu.vector_store %arg41[%c11, %c0_166], %209 {strides = array<i32>} : memref<102x128xf32, #tpu.memory_space<vmem>>, vector<8x128xf32>,
    %c8_167 = arith.constant 8 : index
    %c0_168 = arith.constant 0 : index
    %211 = vector.load %arg40[%c8_167, %c0_168] : memref<64x128xf32, #tpu.memory_space<vmem>>, vector<8x128xf32>
    %c21 = arith.constant 21 : index
    %c0_169 = arith.constant 0 : index
    %212 = vector.load %arg41[%c21, %c0_169] : memref<102x128xf32, #tpu.memory_space<vmem>>, vector<8x128xf32>
    tpu.vector_store %arg41[%c21, %c0_169], %211 {strides = array<i32>} : memref<102x128xf32, #tpu.memory_space<vmem>>, vector<8x128xf32>,
    %c16_170 = arith.constant 16 : index
    %c0_171 = arith.constant 0 : index
    %213 = vector.load %arg40[%c16_170, %c0_171] : memref<64x128xf32, #tpu.memory_space<vmem>>, vector<8x128xf32>
    %c31 = arith.constant 31 : index
    %c0_172 = arith.constant 0 : index
    %214 = vector.load %arg41[%c31, %c0_172] : memref<102x128xf32, #tpu.memory_space<vmem>>, vector<8x128xf32>
    tpu.vector_store %arg41[%c31, %c0_172], %213 {strides = array<i32>} : memref<102x128xf32, #tpu.memory_space<vmem>>, vector<8x128xf32>,
    %c24_173 = arith.constant 24 : index
    %c0_174 = arith.constant 0 : index
    %215 = vector.load %arg40[%c24_173, %c0_174] : memref<64x128xf32, #tpu.memory_space<vmem>>, vector<8x128xf32>
    %c41 = arith.constant 41 : index
    %c0_175 = arith.constant 0 : index
    %216 = vector.load %arg41[%c41, %c0_175] : memref<102x128xf32, #tpu.memory_space<vmem>>, vector<8x128xf32>
    tpu.vector_store %arg41[%c41, %c0_175], %215 {strides = array<i32>} : memref<102x128xf32, #tpu.memory_space<vmem>>, vector<8x128xf32>,
    %c32_176 = arith.constant 32 : index
    %c0_177 = arith.constant 0 : index
    %217 = vector.load %arg40[%c32_176, %c0_177] : memref<64x128xf32, #tpu.memory_space<vmem>>, vector<8x128xf32>
    %c51 = arith.constant 51 : index
    %c0_178 = arith.constant 0 : index
    %218 = vector.load %arg41[%c51, %c0_178] : memref<102x128xf32, #tpu.memory_space<vmem>>, vector<8x128xf32>
    tpu.vector_store %arg41[%c51, %c0_178], %217 {strides = array<i32>} : memref<102x128xf32, #tpu.memory_space<vmem>>, vector<8x128xf32>,
    %c40_179 = arith.constant 40 : index
    %c0_180 = arith.constant 0 : index
    %219 = vector.load %arg40[%c40_179, %c0_180] : memref<64x128xf32, #tpu.memory_space<vmem>>, vector<8x128xf32>
    %c61 = arith.constant 61 : index
    %c0_181 = arith.constant 0 : index
    %220 = vector.load %arg41[%c61, %c0_181] : memref<102x128xf32, #tpu.memory_space<vmem>>, vector<8x128xf32>
    tpu.vector_store %arg41[%c61, %c0_181], %219 {strides = array<i32>} : memref<102x128xf32, #tpu.memory_space<vmem>>, vector<8x128xf32>,
    %c48_182 = arith.constant 48 : index
    %c0_183 = arith.constant 0 : index
    %221 = vector.load %arg40[%c48_182, %c0_183] : memref<64x128xf32, #tpu.memory_space<vmem>>, vector<8x128xf32>
    %c71 = arith.constant 71 : index
    %c0_184 = arith.constant 0 : index
    %222 = vector.load %arg41[%c71, %c0_184] : memref<102x128xf32, #tpu.memory_space<vmem>>, vector<8x128xf32>
    tpu.vector_store %arg41[%c71, %c0_184], %221 {strides = array<i32>} : memref<102x128xf32, #tpu.memory_space<vmem>>, vector<8x128xf32>,
    %c56_185 = arith.constant 56 : index
    %c0_186 = arith.constant 0 : index
    %223 = vector.load %arg40[%c56_185, %c0_186] : memref<64x128xf32, #tpu.memory_space<vmem>>, vector<8x128xf32>
    %c81 = arith.constant 81 : index
    %c0_187 = arith.constant 0 : index
    %224 = vector.load %arg41[%c81, %c0_187] : memref<102x128xf32, #tpu.memory_space<vmem>>, vector<8x128xf32>
    tpu.vector_store %arg41[%c81, %c0_187], %223 {strides = array<i32>} : memref<102x128xf32, #tpu.memory_space<vmem>>, vector<8x128xf32>,
    %c0_188 = arith.constant 0 : index
    %c0_189 = arith.constant 0 : index
    %225 = vector.load %arg14[%c0_188, %c0_189] : memref<9x128xf32, #tpu.memory_space<vmem>>, vector<1x128xf32>
    %c1_190 = arith.constant 1 : index
    %c0_191 = arith.constant 0 : index
    %226 = vector.load %arg14[%c1_190, %c0_191] : memref<9x128xf32, #tpu.memory_space<vmem>>, vector<1x128xf32>
    %c2_192 = arith.constant 2 : index
    %c0_193 = arith.constant 0 : index
    %227 = vector.load %arg14[%c2_192, %c0_193] : memref<9x128xf32, #tpu.memory_space<vmem>>, vector<1x128xf32>
    %c3_194 = arith.constant 3 : index
    %c0_195 = arith.constant 0 : index
    %228 = vector.load %arg14[%c3_194, %c0_195] : memref<9x128xf32, #tpu.memory_space<vmem>>, vector<1x128xf32>
    %c4_196 = arith.constant 4 : index
    %c0_197 = arith.constant 0 : index
    %229 = vector.load %arg14[%c4_196, %c0_197] : memref<9x128xf32, #tpu.memory_space<vmem>>, vector<1x128xf32>
    %c5_198 = arith.constant 5 : index
    %c0_199 = arith.constant 0 : index
    %230 = vector.load %arg14[%c5_198, %c0_199] : memref<9x128xf32, #tpu.memory_space<vmem>>, vector<1x128xf32>
    %c6_200 = arith.constant 6 : index
    %c0_201 = arith.constant 0 : index
    %231 = vector.load %arg14[%c6_200, %c0_201] : memref<9x128xf32, #tpu.memory_space<vmem>>, vector<1x128xf32>
    %c7_202 = arith.constant 7 : index
    %c0_203 = arith.constant 0 : index
    %232 = vector.load %arg14[%c7_202, %c0_203] : memref<9x128xf32, #tpu.memory_space<vmem>>, vector<1x128xf32>
    %c8_204 = arith.constant 8 : index
    %c0_205 = arith.constant 0 : index
    %233 = vector.load %arg14[%c8_204, %c0_205] : memref<9x128xf32, #tpu.memory_space<vmem>>, vector<1x128xf32>
    %cst_206 = arith.constant 0.000000e+00 : f32
    %234 = vector.broadcast %cst_206 : f32 to vector<80x128xf32>
    %c0_207 = arith.constant 0 : index
    %c0_208 = arith.constant 0 : index
    %235 = vector.load %arg41[%c0_207, %c0_208] : memref<102x128xf32, #tpu.memory_space<vmem>>, vector<80x128xf32>
    %236 = vector.broadcast %225 : vector<1x128xf32> to vector<80x128xf32>
    %237 = arith.mulf %235, %236 : vector<80x128xf32>
    %238 = arith.addf %234, %237 : vector<80x128xf32>
    %c1_209 = arith.constant 1 : index
    %c0_210 = arith.constant 0 : index
    %239 = vector.load %arg41[%c1_209, %c0_210] : memref<102x128xf32, #tpu.memory_space<vmem>>, vector<80x128xf32>
    %240 = vector.broadcast %226 : vector<1x128xf32> to vector<80x128xf32>
    %241 = arith.mulf %239, %240 : vector<80x128xf32>
    %242 = arith.addf %238, %241 : vector<80x128xf32>
    %c2_211 = arith.constant 2 : index
    %c0_212 = arith.constant 0 : index
    %243 = vector.load %arg41[%c2_211, %c0_212] : memref<102x128xf32, #tpu.memory_space<vmem>>, vector<80x128xf32>
    %244 = vector.broadcast %227 : vector<1x128xf32> to vector<80x128xf32>
    %245 = arith.mulf %243, %244 : vector<80x128xf32>
    %246 = arith.addf %242, %245 : vector<80x128xf32>
    %c10 = arith.constant 10 : index
    %c0_213 = arith.constant 0 : index
    %247 = vector.load %arg41[%c10, %c0_213] : memref<102x128xf32, #tpu.memory_space<vmem>>, vector<80x128xf32>
    %248 = vector.broadcast %228 : vector<1x128xf32> to vector<80x128xf32>
    %249 = arith.mulf %247, %248 : vector<80x128xf32>
    %250 = arith.addf %246, %249 : vector<80x128xf32>
    %c11_214 = arith.constant 11 : index
    %c0_215 = arith.constant 0 : index
    %251 = vector.load %arg41[%c11_214, %c0_215] : memref<102x128xf32, #tpu.memory_space<vmem>>, vector<80x128xf32>
    %252 = vector.broadcast %229 : vector<1x128xf32> to vector<80x128xf32>
    %253 = arith.mulf %251, %252 : vector<80x128xf32>
    %254 = arith.addf %250, %253 : vector<80x128xf32>
    %c12 = arith.constant 12 : index
    %c0_216 = arith.constant 0 : index
    %255 = vector.load %arg41[%c12, %c0_216] : memref<102x128xf32, #tpu.memory_space<vmem>>, vector<80x128xf32>
    %256 = vector.broadcast %230 : vector<1x128xf32> to vector<80x128xf32>
    %257 = arith.mulf %255, %256 : vector<80x128xf32>
    %258 = arith.addf %254, %257 : vector<80x128xf32>
    %c20_217 = arith.constant 20 : index
    %c0_218 = arith.constant 0 : index
    %259 = vector.load %arg41[%c20_217, %c0_218] : memref<102x128xf32, #tpu.memory_space<vmem>>, vector<80x128xf32>
    %260 = vector.broadcast %231 : vector<1x128xf32> to vector<80x128xf32>
    %261 = arith.mulf %259, %260 : vector<80x128xf32>
    %262 = arith.addf %258, %261 : vector<80x128xf32>
    %c21_219 = arith.constant 21 : index
    %c0_220 = arith.constant 0 : index
    %263 = vector.load %arg41[%c21_219, %c0_220] : memref<102x128xf32, #tpu.memory_space<vmem>>, vector<80x128xf32>
    %264 = vector.broadcast %232 : vector<1x128xf32> to vector<80x128xf32>
    %265 = arith.mulf %263, %264 : vector<80x128xf32>
    %266 = arith.addf %262, %265 : vector<80x128xf32>
    %c22 = arith.constant 22 : index
    %c0_221 = arith.constant 0 : index
    %267 = vector.load %arg41[%c22, %c0_221] : memref<102x128xf32, #tpu.memory_space<vmem>>, vector<80x128xf32>
    %268 = vector.broadcast %233 : vector<1x128xf32> to vector<80x128xf32>
    %269 = arith.mulf %267, %268 : vector<80x128xf32>
    %270 = arith.addf %266, %269 : vector<80x128xf32>
    %271 = vector.broadcast %206 : vector<1x128xf32> to vector<80x128xf32>
    %272 = arith.addf %270, %271 : vector<80x128xf32>
    %cst_222 = arith.constant 0.000000e+00 : f32
    %273 = vector.broadcast %cst_222 : f32 to vector<80x128xf32>
    %274 = arith.maximumf %272, %273 : vector<80x128xf32>
    %c0_223 = arith.constant 0 : index
    %c0_224 = arith.constant 0 : index
    %275 = vector.load %arg42[%c0_223, %c0_224] : memref<80x128xf32, #tpu.memory_space<vmem>>, vector<80x128xf32>
    tpu.vector_store %arg42[%c0_223, %c0_224], %274 {strides = array<i32>} : memref<80x128xf32, #tpu.memory_space<vmem>>, vector<80x128xf32>,
    %c0_225 = arith.constant 0 : index
    %c0_226 = arith.constant 0 : index
    %276 = tpu.strided_load %arg42[%c0_225, %c0_226] {strides = array<i32: 2, 1>} : memref<80x128xf32, #tpu.memory_space<vmem>>, vector<4x128xf32>
    %c0_227 = arith.constant 0 : index
    %c0_228 = arith.constant 0 : index
    %277 = vector.load %arg43[%c0_227, %c0_228] : memref<16x128xf32, #tpu.memory_space<vmem>>, vector<4x128xf32>
    tpu.vector_store %arg43[%c0_227, %c0_228], %276 {strides = array<i32>} : memref<16x128xf32, #tpu.memory_space<vmem>>, vector<4x128xf32>,
    %c20_229 = arith.constant 20 : index
    %c0_230 = arith.constant 0 : index
    %278 = tpu.strided_load %arg42[%c20_229, %c0_230] {strides = array<i32: 2, 1>} : memref<80x128xf32, #tpu.memory_space<vmem>>, vector<4x128xf32>
    %c4_231 = arith.constant 4 : index
    %c0_232 = arith.constant 0 : index
    %279 = vector.load %arg43[%c4_231, %c0_232] : memref<16x128xf32, #tpu.memory_space<vmem>>, vector<4x128xf32>
    tpu.vector_store %arg43[%c4_231, %c0_232], %278 {strides = array<i32>} : memref<16x128xf32, #tpu.memory_space<vmem>>, vector<4x128xf32>,
    %c40_233 = arith.constant 40 : index
    %c0_234 = arith.constant 0 : index
    %280 = tpu.strided_load %arg42[%c40_233, %c0_234] {strides = array<i32: 2, 1>} : memref<80x128xf32, #tpu.memory_space<vmem>>, vector<4x128xf32>
    %c8_235 = arith.constant 8 : index
    %c0_236 = arith.constant 0 : index
    %281 = vector.load %arg43[%c8_235, %c0_236] : memref<16x128xf32, #tpu.memory_space<vmem>>, vector<4x128xf32>
    tpu.vector_store %arg43[%c8_235, %c0_236], %280 {strides = array<i32>} : memref<16x128xf32, #tpu.memory_space<vmem>>, vector<4x128xf32>,
    %c60 = arith.constant 60 : index
    %c0_237 = arith.constant 0 : index
    %282 = tpu.strided_load %arg42[%c60, %c0_237] {strides = array<i32: 2, 1>} : memref<80x128xf32, #tpu.memory_space<vmem>>, vector<4x128xf32>
    %c12_238 = arith.constant 12 : index
    %c0_239 = arith.constant 0 : index
    %283 = vector.load %arg43[%c12_238, %c0_239] : memref<16x128xf32, #tpu.memory_space<vmem>>, vector<4x128xf32>
    tpu.vector_store %arg43[%c12_238, %c0_239], %282 {strides = array<i32>} : memref<16x128xf32, #tpu.memory_space<vmem>>, vector<4x128xf32>,
    %c0_240 = arith.constant 0 : index
    %c0_241 = arith.constant 0 : index
    %284 = vector.load %arg43[%c0_240, %c0_241] : memref<16x128xf32, #tpu.memory_space<vmem>>, vector<16x128xf32>
    %285 = arith.truncf %284 : vector<16x128xf32> to vector<16x128xbf16>
    %c0_242 = arith.constant 0 : index
    %c0_243 = arith.constant 0 : index
    %286 = vector.load %arg16[%c0_242, %c0_243] : memref<128x128xbf16, #tpu.memory_space<vmem>>, vector<128x128xbf16>
    %cst_244 = arith.constant dense<0.000000e+00> : vector<16x128xf32>
    %287 = tpu.matmul %285, %286, %cst_244 {dimension_numbers = #tpu.dot_dimension_numbers<[1], [0], [0], [1], [0, 0, 1, 1], [], []>} : vector<16x128xbf16>, vector<128x128xbf16>, vector<16x128xf32> -> vector<16x128xf32>
    %c0_245 = arith.constant 0 : index
    %c0_246 = arith.constant 0 : index
    %288 = vector.load %arg17[%c0_245, %c0_246] : memref<1x128xf32, #tpu.memory_space<vmem>>, vector<1x128xf32>
    %289 = vector.broadcast %288 : vector<1x128xf32> to vector<16x128xf32>
    %290 = arith.addf %287, %289 : vector<16x128xf32>
    %c0_247 = arith.constant 0 : index
    %c0_248 = arith.constant 0 : index
    %291 = vector.load %arg44[%c0_247, %c0_248] : memref<16x128xf32, #tpu.memory_space<vmem>>, vector<16x128xf32>
    tpu.vector_store %arg44[%c0_247, %c0_248], %290 {strides = array<i32>} : memref<16x128xf32, #tpu.memory_space<vmem>>, vector<16x128xf32>,
    %c0_249 = arith.constant 0 : index
    %c0_250 = arith.constant 0 : index
    %292 = vector.load %arg44[%c0_249, %c0_250] : memref<16x128xf32, #tpu.memory_space<vmem>>, vector<16x128xf32>
    %293 = arith.truncf %292 : vector<16x128xf32> to vector<16x128xbf16>
    %c0_251 = arith.constant 0 : index
    %c0_252 = arith.constant 0 : index
    %294 = vector.load %arg18[%c0_251, %c0_252] : memref<128x128xbf16, #tpu.memory_space<vmem>>, vector<128x128xbf16>
    %cst_253 = arith.constant dense<0.000000e+00> : vector<16x128xf32>
    %295 = tpu.matmul %293, %294, %cst_253 {dimension_numbers = #tpu.dot_dimension_numbers<[1], [0], [0], [1], [0, 0, 1, 1], [], []>} : vector<16x128xbf16>, vector<128x128xbf16>, vector<16x128xf32> -> vector<16x128xf32>
    %c0_254 = arith.constant 0 : index
    %c0_255 = arith.constant 0 : index
    %296 = vector.load %arg19[%c0_254, %c0_255] : memref<1x128xf32, #tpu.memory_space<vmem>>, vector<1x128xf32>
    %297 = vector.broadcast %296 : vector<1x128xf32> to vector<16x128xf32>
    %298 = arith.addf %295, %297 : vector<16x128xf32>
    %cst_256 = arith.constant 3.000000e+00 : f32
    %299 = vector.broadcast %cst_256 : f32 to vector<16x128xf32>
    %300 = arith.addf %298, %299 : vector<16x128xf32>
    %cst_257 = arith.constant 0.000000e+00 : f32
    %cst_258 = arith.constant 6.000000e+00 : f32
    %301 = vector.broadcast %cst_257 : f32 to vector<16x128xf32>
    %302 = arith.maximumf %301, %300 : vector<16x128xf32>
    %303 = vector.broadcast %cst_258 : f32 to vector<16x128xf32>
    %304 = arith.minimumf %303, %302 : vector<16x128xf32>
    %305 = arith.mulf %298, %304 : vector<16x128xf32>
    %cst_259 = arith.constant 0.166666672 : f32
    %306 = vector.broadcast %cst_259 : f32 to vector<16x128xf32>
    %307 = arith.mulf %305, %306 : vector<16x128xf32>
    %c0_260 = arith.constant 0 : index
    %c0_261 = arith.constant 0 : index
    %308 = vector.load %arg45[%c0_260, %c0_261] : memref<16x128xf32, #tpu.memory_space<vmem>>, vector<16x128xf32>
    tpu.vector_store %arg45[%c0_260, %c0_261], %307 {strides = array<i32>} : memref<16x128xf32, #tpu.memory_space<vmem>>, vector<16x128xf32>,
    %c0_262 = arith.constant 0 : index
    %c0_263 = arith.constant 0 : index
    %309 = vector.load %arg21[%c0_262, %c0_263] : memref<1x128xf32, #tpu.memory_space<vmem>>, vector<1x128xf32>
    %cst_264 = arith.constant 0.000000e+00 : f32
    %310 = vector.broadcast %cst_264 : f32 to vector<68x128xf32>
    %c0_265 = arith.constant 0 : index
    %c0_266 = arith.constant 0 : index
    %311 = vector.load %arg46[%c0_265, %c0_266] : memref<68x128xf32, #tpu.memory_space<vmem>>, vector<68x128xf32>
    tpu.vector_store %arg46[%c0_265, %c0_266], %310 {strides = array<i32>} : memref<68x128xf32, #tpu.memory_space<vmem>>, vector<68x128xf32>,
    %c0_267 = arith.constant 0 : index
    %c0_268 = arith.constant 0 : index
    %312 = vector.load %arg45[%c0_267, %c0_268] : memref<16x128xf32, #tpu.memory_space<vmem>>, vector<4x128xf32>
    %c18_269 = arith.constant 18 : index
    %c0_270 = arith.constant 0 : index
    %313 = vector.load %arg46[%c18_269, %c0_270] : memref<68x128xf32, #tpu.memory_space<vmem>>, vector<4x128xf32>
    tpu.vector_store %arg46[%c18_269, %c0_270], %312 {strides = array<i32>} : memref<68x128xf32, #tpu.memory_space<vmem>>, vector<4x128xf32>,
    %c4_271 = arith.constant 4 : index
    %c0_272 = arith.constant 0 : index
    %314 = vector.load %arg45[%c4_271, %c0_272] : memref<16x128xf32, #tpu.memory_space<vmem>>, vector<4x128xf32>
    %c26 = arith.constant 26 : index
    %c0_273 = arith.constant 0 : index
    %315 = vector.load %arg46[%c26, %c0_273] : memref<68x128xf32, #tpu.memory_space<vmem>>, vector<4x128xf32>
    tpu.vector_store %arg46[%c26, %c0_273], %314 {strides = array<i32>} : memref<68x128xf32, #tpu.memory_space<vmem>>, vector<4x128xf32>,
    %c8_274 = arith.constant 8 : index
    %c0_275 = arith.constant 0 : index
    %316 = vector.load %arg45[%c8_274, %c0_275] : memref<16x128xf32, #tpu.memory_space<vmem>>, vector<4x128xf32>
    %c34 = arith.constant 34 : index
    %c0_276 = arith.constant 0 : index
    %317 = vector.load %arg46[%c34, %c0_276] : memref<68x128xf32, #tpu.memory_space<vmem>>, vector<4x128xf32>
    tpu.vector_store %arg46[%c34, %c0_276], %316 {strides = array<i32>} : memref<68x128xf32, #tpu.memory_space<vmem>>, vector<4x128xf32>,
    %c12_277 = arith.constant 12 : index
    %c0_278 = arith.constant 0 : index
    %318 = vector.load %arg45[%c12_277, %c0_278] : memref<16x128xf32, #tpu.memory_space<vmem>>, vector<4x128xf32>
    %c42 = arith.constant 42 : index
    %c0_279 = arith.constant 0 : index
    %319 = vector.load %arg46[%c42, %c0_279] : memref<68x128xf32, #tpu.memory_space<vmem>>, vector<4x128xf32>
    tpu.vector_store %arg46[%c42, %c0_279], %318 {strides = array<i32>} : memref<68x128xf32, #tpu.memory_space<vmem>>, vector<4x128xf32>,
    %c0_280 = arith.constant 0 : index
    %c0_281 = arith.constant 0 : index
    %320 = vector.load %arg20[%c0_280, %c0_281] : memref<25x128xf32, #tpu.memory_space<vmem>>, vector<1x128xf32>
    %c1_282 = arith.constant 1 : index
    %c0_283 = arith.constant 0 : index
    %321 = vector.load %arg20[%c1_282, %c0_283] : memref<25x128xf32, #tpu.memory_space<vmem>>, vector<1x128xf32>
    %c2_284 = arith.constant 2 : index
    %c0_285 = arith.constant 0 : index
    %322 = vector.load %arg20[%c2_284, %c0_285] : memref<25x128xf32, #tpu.memory_space<vmem>>, vector<1x128xf32>
    %c3_286 = arith.constant 3 : index
    %c0_287 = arith.constant 0 : index
    %323 = vector.load %arg20[%c3_286, %c0_287] : memref<25x128xf32, #tpu.memory_space<vmem>>, vector<1x128xf32>
    %c4_288 = arith.constant 4 : index
    %c0_289 = arith.constant 0 : index
    %324 = vector.load %arg20[%c4_288, %c0_289] : memref<25x128xf32, #tpu.memory_space<vmem>>, vector<1x128xf32>
    %c5_290 = arith.constant 5 : index
    %c0_291 = arith.constant 0 : index
    %325 = vector.load %arg20[%c5_290, %c0_291] : memref<25x128xf32, #tpu.memory_space<vmem>>, vector<1x128xf32>
    %c6_292 = arith.constant 6 : index
    %c0_293 = arith.constant 0 : index
    %326 = vector.load %arg20[%c6_292, %c0_293] : memref<25x128xf32, #tpu.memory_space<vmem>>, vector<1x128xf32>
    %c7_294 = arith.constant 7 : index
    %c0_295 = arith.constant 0 : index
    %327 = vector.load %arg20[%c7_294, %c0_295] : memref<25x128xf32, #tpu.memory_space<vmem>>, vector<1x128xf32>
    %c8_296 = arith.constant 8 : index
    %c0_297 = arith.constant 0 : index
    %328 = vector.load %arg20[%c8_296, %c0_297] : memref<25x128xf32, #tpu.memory_space<vmem>>, vector<1x128xf32>
    %c9 = arith.constant 9 : index
    %c0_298 = arith.constant 0 : index
    %329 = vector.load %arg20[%c9, %c0_298] : memref<25x128xf32, #tpu.memory_space<vmem>>, vector<1x128xf32>
    %c10_299 = arith.constant 10 : index
    %c0_300 = arith.constant 0 : index
    %330 = vector.load %arg20[%c10_299, %c0_300] : memref<25x128xf32, #tpu.memory_space<vmem>>, vector<1x128xf32>
    %c11_301 = arith.constant 11 : index
    %c0_302 = arith.constant 0 : index
    %331 = vector.load %arg20[%c11_301, %c0_302] : memref<25x128xf32, #tpu.memory_space<vmem>>, vector<1x128xf32>
    %c12_303 = arith.constant 12 : index
    %c0_304 = arith.constant 0 : index
    %332 = vector.load %arg20[%c12_303, %c0_304] : memref<25x128xf32, #tpu.memory_space<vmem>>, vector<1x128xf32>
    %c13 = arith.constant 13 : index
    %c0_305 = arith.constant 0 : index
    %333 = vector.load %arg20[%c13, %c0_305] : memref<25x128xf32, #tpu.memory_space<vmem>>, vector<1x128xf32>
    %c14 = arith.constant 14 : index
    %c0_306 = arith.constant 0 : index
    %334 = vector.load %arg20[%c14, %c0_306] : memref<25x128xf32, #tpu.memory_space<vmem>>, vector<1x128xf32>
    %c15 = arith.constant 15 : index
    %c0_307 = arith.constant 0 : index
    %335 = vector.load %arg20[%c15, %c0_307] : memref<25x128xf32, #tpu.memory_space<vmem>>, vector<1x128xf32>
    %c16_308 = arith.constant 16 : index
    %c0_309 = arith.constant 0 : index
    %336 = vector.load %arg20[%c16_308, %c0_309] : memref<25x128xf32, #tpu.memory_space<vmem>>, vector<1x128xf32>
    %c17 = arith.constant 17 : index
    %c0_310 = arith.constant 0 : index
    %337 = vector.load %arg20[%c17, %c0_310] : memref<25x128xf32, #tpu.memory_space<vmem>>, vector<1x128xf32>
    %c18_311 = arith.constant 18 : index
    %c0_312 = arith.constant 0 : index
    %338 = vector.load %arg20[%c18_311, %c0_312] : memref<25x128xf32, #tpu.memory_space<vmem>>, vector<1x128xf32>
    %c19_313 = arith.constant 19 : index
    %c0_314 = arith.constant 0 : index
    %339 = vector.load %arg20[%c19_313, %c0_314] : memref<25x128xf32, #tpu.memory_space<vmem>>, vector<1x128xf32>
    %c20_315 = arith.constant 20 : index
    %c0_316 = arith.constant 0 : index
    %340 = vector.load %arg20[%c20_315, %c0_316] : memref<25x128xf32, #tpu.memory_space<vmem>>, vector<1x128xf32>
    %c21_317 = arith.constant 21 : index
    %c0_318 = arith.constant 0 : index
    %341 = vector.load %arg20[%c21_317, %c0_318] : memref<25x128xf32, #tpu.memory_space<vmem>>, vector<1x128xf32>
    %c22_319 = arith.constant 22 : index
    %c0_320 = arith.constant 0 : index
    %342 = vector.load %arg20[%c22_319, %c0_320] : memref<25x128xf32, #tpu.memory_space<vmem>>, vector<1x128xf32>
    %c23 = arith.constant 23 : index
    %c0_321 = arith.constant 0 : index
    %343 = vector.load %arg20[%c23, %c0_321] : memref<25x128xf32, #tpu.memory_space<vmem>>, vector<1x128xf32>
    %c24_322 = arith.constant 24 : index
    %c0_323 = arith.constant 0 : index
    %344 = vector.load %arg20[%c24_322, %c0_323] : memref<25x128xf32, #tpu.memory_space<vmem>>, vector<1x128xf32>
    %cst_324 = arith.constant 0.000000e+00 : f32
    %345 = vector.broadcast %cst_324 : f32 to vector<32x128xf32>
    %c0_325 = arith.constant 0 : index
    %c0_326 = arith.constant 0 : index
    %346 = vector.load %arg46[%c0_325, %c0_326] : memref<68x128xf32, #tpu.memory_space<vmem>>, vector<32x128xf32>
    %347 = vector.broadcast %320 : vector<1x128xf32> to vector<32x128xf32>
    %348 = arith.mulf %346, %347 : vector<32x128xf32>
    %349 = arith.addf %345, %348 : vector<32x128xf32>
    %c1_327 = arith.constant 1 : index
    %c0_328 = arith.constant 0 : index
    %350 = vector.load %arg46[%c1_327, %c0_328] : memref<68x128xf32, #tpu.memory_space<vmem>>, vector<32x128xf32>
    %351 = vector.broadcast %321 : vector<1x128xf32> to vector<32x128xf32>
    %352 = arith.mulf %350, %351 : vector<32x128xf32>
    %353 = arith.addf %349, %352 : vector<32x128xf32>
    %c2_329 = arith.constant 2 : index
    %c0_330 = arith.constant 0 : index
    %354 = vector.load %arg46[%c2_329, %c0_330] : memref<68x128xf32, #tpu.memory_space<vmem>>, vector<32x128xf32>
    %355 = vector.broadcast %322 : vector<1x128xf32> to vector<32x128xf32>
    %356 = arith.mulf %354, %355 : vector<32x128xf32>
    %357 = arith.addf %353, %356 : vector<32x128xf32>
    %c3_331 = arith.constant 3 : index
    %c0_332 = arith.constant 0 : index
    %358 = vector.load %arg46[%c3_331, %c0_332] : memref<68x128xf32, #tpu.memory_space<vmem>>, vector<32x128xf32>
    %359 = vector.broadcast %323 : vector<1x128xf32> to vector<32x128xf32>
    %360 = arith.mulf %358, %359 : vector<32x128xf32>
    %361 = arith.addf %357, %360 : vector<32x128xf32>
    %c4_333 = arith.constant 4 : index
    %c0_334 = arith.constant 0 : index
    %362 = vector.load %arg46[%c4_333, %c0_334] : memref<68x128xf32, #tpu.memory_space<vmem>>, vector<32x128xf32>
    %363 = vector.broadcast %324 : vector<1x128xf32> to vector<32x128xf32>
    %364 = arith.mulf %362, %363 : vector<32x128xf32>
    %365 = arith.addf %361, %364 : vector<32x128xf32>
    %c8_335 = arith.constant 8 : index
    %c0_336 = arith.constant 0 : index
    %366 = vector.load %arg46[%c8_335, %c0_336] : memref<68x128xf32, #tpu.memory_space<vmem>>, vector<32x128xf32>
    %367 = vector.broadcast %325 : vector<1x128xf32> to vector<32x128xf32>
    %368 = arith.mulf %366, %367 : vector<32x128xf32>
    %369 = arith.addf %365, %368 : vector<32x128xf32>
    %c9_337 = arith.constant 9 : index
    %c0_338 = arith.constant 0 : index
    %370 = vector.load %arg46[%c9_337, %c0_338] : memref<68x128xf32, #tpu.memory_space<vmem>>, vector<32x128xf32>
    %371 = vector.broadcast %326 : vector<1x128xf32> to vector<32x128xf32>
    %372 = arith.mulf %370, %371 : vector<32x128xf32>
    %373 = arith.addf %369, %372 : vector<32x128xf32>
    %c10_339 = arith.constant 10 : index
    %c0_340 = arith.constant 0 : index
    %374 = vector.load %arg46[%c10_339, %c0_340] : memref<68x128xf32, #tpu.memory_space<vmem>>, vector<32x128xf32>
    %375 = vector.broadcast %327 : vector<1x128xf32> to vector<32x128xf32>
    %376 = arith.mulf %374, %375 : vector<32x128xf32>
    %377 = arith.addf %373, %376 : vector<32x128xf32>
    %c11_341 = arith.constant 11 : index
    %c0_342 = arith.constant 0 : index
    %378 = vector.load %arg46[%c11_341, %c0_342] : memref<68x128xf32, #tpu.memory_space<vmem>>, vector<32x128xf32>
    %379 = vector.broadcast %328 : vector<1x128xf32> to vector<32x128xf32>
    %380 = arith.mulf %378, %379 : vector<32x128xf32>
    %381 = arith.addf %377, %380 : vector<32x128xf32>
    %c12_343 = arith.constant 12 : index
    %c0_344 = arith.constant 0 : index
    %382 = vector.load %arg46[%c12_343, %c0_344] : memref<68x128xf32, #tpu.memory_space<vmem>>, vector<32x128xf32>
    %383 = vector.broadcast %329 : vector<1x128xf32> to vector<32x128xf32>
    %384 = arith.mulf %382, %383 : vector<32x128xf32>
    %385 = arith.addf %381, %384 : vector<32x128xf32>
    %c16_345 = arith.constant 16 : index
    %c0_346 = arith.constant 0 : index
    %386 = vector.load %arg46[%c16_345, %c0_346] : memref<68x128xf32, #tpu.memory_space<vmem>>, vector<32x128xf32>
    %387 = vector.broadcast %330 : vector<1x128xf32> to vector<32x128xf32>
    %388 = arith.mulf %386, %387 : vector<32x128xf32>
    %389 = arith.addf %385, %388 : vector<32x128xf32>
    %c17_347 = arith.constant 17 : index
    %c0_348 = arith.constant 0 : index
    %390 = vector.load %arg46[%c17_347, %c0_348] : memref<68x128xf32, #tpu.memory_space<vmem>>, vector<32x128xf32>
    %391 = vector.broadcast %331 : vector<1x128xf32> to vector<32x128xf32>
    %392 = arith.mulf %390, %391 : vector<32x128xf32>
    %393 = arith.addf %389, %392 : vector<32x128xf32>
    %c18_349 = arith.constant 18 : index
    %c0_350 = arith.constant 0 : index
    %394 = vector.load %arg46[%c18_349, %c0_350] : memref<68x128xf32, #tpu.memory_space<vmem>>, vector<32x128xf32>
    %395 = vector.broadcast %332 : vector<1x128xf32> to vector<32x128xf32>
    %396 = arith.mulf %394, %395 : vector<32x128xf32>
    %397 = arith.addf %393, %396 : vector<32x128xf32>
    %c19_351 = arith.constant 19 : index
    %c0_352 = arith.constant 0 : index
    %398 = vector.load %arg46[%c19_351, %c0_352] : memref<68x128xf32, #tpu.memory_space<vmem>>, vector<32x128xf32>
    %399 = vector.broadcast %333 : vector<1x128xf32> to vector<32x128xf32>
    %400 = arith.mulf %398, %399 : vector<32x128xf32>
    %401 = arith.addf %397, %400 : vector<32x128xf32>
    %c20_353 = arith.constant 20 : index
    %c0_354 = arith.constant 0 : index
    %402 = vector.load %arg46[%c20_353, %c0_354] : memref<68x128xf32, #tpu.memory_space<vmem>>, vector<32x128xf32>
    %403 = vector.broadcast %334 : vector<1x128xf32> to vector<32x128xf32>
    %404 = arith.mulf %402, %403 : vector<32x128xf32>
    %405 = arith.addf %401, %404 : vector<32x128xf32>
    %c24_355 = arith.constant 24 : index
    %c0_356 = arith.constant 0 : index
    %406 = vector.load %arg46[%c24_355, %c0_356] : memref<68x128xf32, #tpu.memory_space<vmem>>, vector<32x128xf32>
    %407 = vector.broadcast %335 : vector<1x128xf32> to vector<32x128xf32>
    %408 = arith.mulf %406, %407 : vector<32x128xf32>
    %409 = arith.addf %405, %408 : vector<32x128xf32>
    %c25 = arith.constant 25 : index
    %c0_357 = arith.constant 0 : index
    %410 = vector.load %arg46[%c25, %c0_357] : memref<68x128xf32, #tpu.memory_space<vmem>>, vector<32x128xf32>
    %411 = vector.broadcast %336 : vector<1x128xf32> to vector<32x128xf32>
    %412 = arith.mulf %410, %411 : vector<32x128xf32>
    %413 = arith.addf %409, %412 : vector<32x128xf32>
    %c26_358 = arith.constant 26 : index
    %c0_359 = arith.constant 0 : index
    %414 = vector.load %arg46[%c26_358, %c0_359] : memref<68x128xf32, #tpu.memory_space<vmem>>, vector<32x128xf32>
    %415 = vector.broadcast %337 : vector<1x128xf32> to vector<32x128xf32>
    %416 = arith.mulf %414, %415 : vector<32x128xf32>
    %417 = arith.addf %413, %416 : vector<32x128xf32>
    %c27 = arith.constant 27 : index
    %c0_360 = arith.constant 0 : index
    %418 = vector.load %arg46[%c27, %c0_360] : memref<68x128xf32, #tpu.memory_space<vmem>>, vector<32x128xf32>
    %419 = vector.broadcast %338 : vector<1x128xf32> to vector<32x128xf32>
    %420 = arith.mulf %418, %419 : vector<32x128xf32>
    %421 = arith.addf %417, %420 : vector<32x128xf32>
    %c28 = arith.constant 28 : index
    %c0_361 = arith.constant 0 : index
    %422 = vector.load %arg46[%c28, %c0_361] : memref<68x128xf32, #tpu.memory_space<vmem>>, vector<32x128xf32>
    %423 = vector.broadcast %339 : vector<1x128xf32> to vector<32x128xf32>
    %424 = arith.mulf %422, %423 : vector<32x128xf32>
    %425 = arith.addf %421, %424 : vector<32x128xf32>
    %c32_362 = arith.constant 32 : index
    %c0_363 = arith.constant 0 : index
    %426 = vector.load %arg46[%c32_362, %c0_363] : memref<68x128xf32, #tpu.memory_space<vmem>>, vector<32x128xf32>
    %427 = vector.broadcast %340 : vector<1x128xf32> to vector<32x128xf32>
    %428 = arith.mulf %426, %427 : vector<32x128xf32>
    %429 = arith.addf %425, %428 : vector<32x128xf32>
    %c33 = arith.constant 33 : index
    %c0_364 = arith.constant 0 : index
    %430 = vector.load %arg46[%c33, %c0_364] : memref<68x128xf32, #tpu.memory_space<vmem>>, vector<32x128xf32>
    %431 = vector.broadcast %341 : vector<1x128xf32> to vector<32x128xf32>
    %432 = arith.mulf %430, %431 : vector<32x128xf32>
    %433 = arith.addf %429, %432 : vector<32x128xf32>
    %c34_365 = arith.constant 34 : index
    %c0_366 = arith.constant 0 : index
    %434 = vector.load %arg46[%c34_365, %c0_366] : memref<68x128xf32, #tpu.memory_space<vmem>>, vector<32x128xf32>
    %435 = vector.broadcast %342 : vector<1x128xf32> to vector<32x128xf32>
    %436 = arith.mulf %434, %435 : vector<32x128xf32>
    %437 = arith.addf %433, %436 : vector<32x128xf32>
    %c35 = arith.constant 35 : index
    %c0_367 = arith.constant 0 : index
    %438 = vector.load %arg46[%c35, %c0_367] : memref<68x128xf32, #tpu.memory_space<vmem>>, vector<32x128xf32>
    %439 = vector.broadcast %343 : vector<1x128xf32> to vector<32x128xf32>
    %440 = arith.mulf %438, %439 : vector<32x128xf32>
    %441 = arith.addf %437, %440 : vector<32x128xf32>
    %c36_368 = arith.constant 36 : index
    %c0_369 = arith.constant 0 : index
    %442 = vector.load %arg46[%c36_368, %c0_369] : memref<68x128xf32, #tpu.memory_space<vmem>>, vector<32x128xf32>
    %443 = vector.broadcast %344 : vector<1x128xf32> to vector<32x128xf32>
    %444 = arith.mulf %442, %443 : vector<32x128xf32>
    %445 = arith.addf %441, %444 : vector<32x128xf32>
    %446 = vector.broadcast %309 : vector<1x128xf32> to vector<32x128xf32>
    %447 = arith.addf %445, %446 : vector<32x128xf32>
    %c0_370 = arith.constant 0 : index
    %c0_371 = arith.constant 0 : index
    %448 = vector.load %arg47[%c0_370, %c0_371] : memref<32x128xf32, #tpu.memory_space<vmem>>, vector<32x128xf32>
    tpu.vector_store %arg47[%c0_370, %c0_371], %447 {strides = array<i32>} : memref<32x128xf32, #tpu.memory_space<vmem>>, vector<32x128xf32>,
    %c0_372 = arith.constant 0 : index
    %c0_373 = arith.constant 0 : index
    %449 = vector.load %arg47[%c0_372, %c0_373] : memref<32x128xf32, #tpu.memory_space<vmem>>, vector<4x128xf32>
    %c0_374 = arith.constant 0 : index
    %c0_375 = arith.constant 0 : index
    %450 = vector.load %arg48[%c0_374, %c0_375] : memref<16x128xf32, #tpu.memory_space<vmem>>, vector<4x128xf32>
    tpu.vector_store %arg48[%c0_374, %c0_375], %449 {strides = array<i32>} : memref<16x128xf32, #tpu.memory_space<vmem>>, vector<4x128xf32>,
    %c8_376 = arith.constant 8 : index
    %c0_377 = arith.constant 0 : index
    %451 = vector.load %arg47[%c8_376, %c0_377] : memref<32x128xf32, #tpu.memory_space<vmem>>, vector<4x128xf32>
    %c4_378 = arith.constant 4 : index
    %c0_379 = arith.constant 0 : index
    %452 = vector.load %arg48[%c4_378, %c0_379] : memref<16x128xf32, #tpu.memory_space<vmem>>, vector<4x128xf32>
    tpu.vector_store %arg48[%c4_378, %c0_379], %451 {strides = array<i32>} : memref<16x128xf32, #tpu.memory_space<vmem>>, vector<4x128xf32>,
    %c16_380 = arith.constant 16 : index
    %c0_381 = arith.constant 0 : index
    %453 = vector.load %arg47[%c16_380, %c0_381] : memref<32x128xf32, #tpu.memory_space<vmem>>, vector<4x128xf32>
    %c8_382 = arith.constant 8 : index
    %c0_383 = arith.constant 0 : index
    %454 = vector.load %arg48[%c8_382, %c0_383] : memref<16x128xf32, #tpu.memory_space<vmem>>, vector<4x128xf32>
    tpu.vector_store %arg48[%c8_382, %c0_383], %453 {strides = array<i32>} : memref<16x128xf32, #tpu.memory_space<vmem>>, vector<4x128xf32>,
    %c24_384 = arith.constant 24 : index
    %c0_385 = arith.constant 0 : index
    %455 = vector.load %arg47[%c24_384, %c0_385] : memref<32x128xf32, #tpu.memory_space<vmem>>, vector<4x128xf32>
    %c12_386 = arith.constant 12 : index
    %c0_387 = arith.constant 0 : index
    %456 = vector.load %arg48[%c12_386, %c0_387] : memref<16x128xf32, #tpu.memory_space<vmem>>, vector<4x128xf32>
    tpu.vector_store %arg48[%c12_386, %c0_387], %455 {strides = array<i32>} : memref<16x128xf32, #tpu.memory_space<vmem>>, vector<4x128xf32>,
    %c0_388 = arith.constant 0 : index
    %c0_389 = arith.constant 0 : index
    %457 = vector.load %arg48[%c0_388, %c0_389] : memref<16x128xf32, #tpu.memory_space<vmem>>, vector<16x128xf32>
    %cst_390 = arith.constant dense<0.000000e+00> : vector<128xf32>
    %458 = vector.multi_reduction <add>, %457, %cst_390 [0] : vector<16x128xf32> to vector<128xf32>
    %459 = vector.shape_cast %458 : vector<128xf32> to vector<1x128xf32>
    %cst_391 = arith.constant 6.250000e-02 : f32
    %460 = vector.broadcast %cst_391 : f32 to vector<1x128xf32>
    %461 = arith.mulf %459, %460 : vector<1x128xf32>
    %462 = arith.truncf %461 : vector<1x128xf32> to vector<1x128xbf16>
    %c0_392 = arith.constant 0 : index
    %c0_393 = arith.constant 0 : index
    %463 = vector.load %arg22[%c0_392, %c0_393] : memref<128x128xbf16, #tpu.memory_space<vmem>>, vector<128x128xbf16>
    %cst_394 = arith.constant dense<0.000000e+00> : vector<1x128xf32>
    %464 = tpu.matmul %462, %463, %cst_394 {dimension_numbers = #tpu.dot_dimension_numbers<[1], [0], [0], [1], [0, 0, 1, 1], [], []>} : vector<1x128xbf16>, vector<128x128xbf16>, vector<1x128xf32> -> vector<1x128xf32>
    %c0_395 = arith.constant 0 : index
    %c0_396 = arith.constant 0 : index
    %465 = vector.load %arg23[%c0_395, %c0_396] : memref<1x128xf32, #tpu.memory_space<vmem>>, vector<1x128xf32>
    %466 = arith.addf %464, %465 : vector<1x128xf32>
    %cst_397 = arith.constant 0.000000e+00 : f32
    %467 = vector.broadcast %cst_397 : f32 to vector<1x128xf32>
    %468 = arith.maximumf %466, %467 : vector<1x128xf32>
    %469 = arith.truncf %468 : vector<1x128xf32> to vector<1x128xbf16>
    %c0_398 = arith.constant 0 : index
    %c0_399 = arith.constant 0 : index
    %470 = vector.load %arg24[%c0_398, %c0_399] : memref<128x128xbf16, #tpu.memory_space<vmem>>, vector<128x128xbf16>
    %cst_400 = arith.constant dense<0.000000e+00> : vector<1x128xf32>
    %471 = tpu.matmul %469, %470, %cst_400 {dimension_numbers = #tpu.dot_dimension_numbers<[1], [0], [0], [1], [0, 0, 1, 1], [], []>} : vector<1x128xbf16>, vector<128x128xbf16>, vector<1x128xf32> -> vector<1x128xf32>
    %c0_401 = arith.constant 0 : index
    %c0_402 = arith.constant 0 : index
    %472 = vector.load %arg25[%c0_401, %c0_402] : memref<1x128xf32, #tpu.memory_space<vmem>>, vector<1x128xf32>
    %473 = arith.addf %471, %472 : vector<1x128xf32>
    %cst_403 = arith.constant 3.000000e+00 : f32
    %474 = vector.broadcast %cst_403 : f32 to vector<1x128xf32>
    %475 = arith.addf %473, %474 : vector<1x128xf32>
    %cst_404 = arith.constant 0.000000e+00 : f32
    %cst_405 = arith.constant 6.000000e+00 : f32
    %476 = vector.broadcast %cst_404 : f32 to vector<1x128xf32>
    %477 = arith.maximumf %476, %475 : vector<1x128xf32>
    %478 = vector.broadcast %cst_405 : f32 to vector<1x128xf32>
    %479 = arith.minimumf %478, %477 : vector<1x128xf32>
    %cst_406 = arith.constant 0.166666672 : f32
    %480 = vector.broadcast %cst_406 : f32 to vector<1x128xf32>
    %481 = arith.mulf %479, %480 : vector<1x128xf32>
    %482 = vector.broadcast %481 : vector<1x128xf32> to vector<16x128xf32>
    %483 = arith.mulf %457, %482 : vector<16x128xf32>
    %cst_407 = arith.constant 3.000000e+00 : f32
    %484 = vector.broadcast %cst_407 : f32 to vector<16x128xf32>
    %485 = arith.addf %483, %484 : vector<16x128xf32>
    %cst_408 = arith.constant 0.000000e+00 : f32
    %cst_409 = arith.constant 6.000000e+00 : f32
    %486 = vector.broadcast %cst_408 : f32 to vector<16x128xf32>
    %487 = arith.maximumf %486, %485 : vector<16x128xf32>
    %488 = vector.broadcast %cst_409 : f32 to vector<16x128xf32>
    %489 = arith.minimumf %488, %487 : vector<16x128xf32>
    %490 = arith.mulf %483, %489 : vector<16x128xf32>
    %cst_410 = arith.constant 0.166666672 : f32
    %491 = vector.broadcast %cst_410 : f32 to vector<16x128xf32>
    %492 = arith.mulf %490, %491 : vector<16x128xf32>
    %c0_411 = arith.constant 0 : index
    %c0_412 = arith.constant 0 : index
    %493 = vector.load %arg48[%c0_411, %c0_412] : memref<16x128xf32, #tpu.memory_space<vmem>>, vector<16x128xf32>
    tpu.vector_store %arg48[%c0_411, %c0_412], %492 {strides = array<i32>} : memref<16x128xf32, #tpu.memory_space<vmem>>, vector<16x128xf32>,
    %c0_413 = arith.constant 0 : index
    %c0_414 = arith.constant 0 : index
    %494 = vector.load %arg48[%c0_413, %c0_414] : memref<16x128xf32, #tpu.memory_space<vmem>>, vector<16x128xf32>
    %495 = arith.truncf %494 : vector<16x128xf32> to vector<16x128xbf16>
    %c0_415 = arith.constant 0 : index
    %c0_416 = arith.constant 0 : index
    %496 = vector.load %arg26[%c0_415, %c0_416] : memref<128x128xbf16, #tpu.memory_space<vmem>>, vector<128x128xbf16>
    %cst_417 = arith.constant dense<0.000000e+00> : vector<16x128xf32>
    %497 = tpu.matmul %495, %496, %cst_417 {dimension_numbers = #tpu.dot_dimension_numbers<[1], [0], [0], [1], [0, 0, 1, 1], [], []>} : vector<16x128xbf16>, vector<128x128xbf16>, vector<16x128xf32> -> vector<16x128xf32>
    %c0_418 = arith.constant 0 : index
    %c0_419 = arith.constant 0 : index
    %498 = vector.load %arg27[%c0_418, %c0_419] : memref<1x128xf32, #tpu.memory_space<vmem>>, vector<1x128xf32>
    %499 = vector.broadcast %498 : vector<1x128xf32> to vector<16x128xf32>
    %500 = arith.addf %497, %499 : vector<16x128xf32>
    %c0_420 = arith.constant 0 : index
    %c0_421 = arith.constant 0 : index
    %501 = vector.load %arg44[%c0_420, %c0_421] : memref<16x128xf32, #tpu.memory_space<vmem>>, vector<16x128xf32>
    %502 = arith.addf %500, %501 : vector<16x128xf32>
    %c0_422 = arith.constant 0 : index
    %c0_423 = arith.constant 0 : index
    %503 = vector.load %arg49[%c0_422, %c0_423] : memref<16x128xf32, #tpu.memory_space<vmem>>, vector<16x128xf32>
    tpu.vector_store %arg49[%c0_422, %c0_423], %502 {strides = array<i32>} : memref<16x128xf32, #tpu.memory_space<vmem>>, vector<16x128xf32>,
    %c0_424 = arith.constant 0 : index
    %c0_425 = arith.constant 0 : index
    %504 = vector.load %arg49[%c0_424, %c0_425] : memref<16x128xf32, #tpu.memory_space<vmem>>, vector<16x128xf32>
    %505 = arith.truncf %504 : vector<16x128xf32> to vector<16x128xbf16>
    %c0_426 = arith.constant 0 : index
    %c0_427 = arith.constant 0 : index
    %506 = vector.load %arg28[%c0_426, %c0_427] : memref<128x128xbf16, #tpu.memory_space<vmem>>, vector<128x128xbf16>
    %cst_428 = arith.constant dense<0.000000e+00> : vector<16x128xf32>
    %507 = tpu.matmul %505, %506, %cst_428 {dimension_numbers = #tpu.dot_dimension_numbers<[1], [0], [0], [1], [0, 0, 1, 1], [], []>} : vector<16x128xbf16>, vector<128x128xbf16>, vector<16x128xf32> -> vector<16x128xf32>
    %c0_429 = arith.constant 0 : index
    %c0_430 = arith.constant 0 : index
    %508 = vector.load %arg29[%c0_429, %c0_430] : memref<1x128xf32, #tpu.memory_space<vmem>>, vector<1x128xf32>
    %509 = vector.broadcast %508 : vector<1x128xf32> to vector<16x128xf32>
    %510 = arith.addf %507, %509 : vector<16x128xf32>
    %cst_431 = arith.constant 3.000000e+00 : f32
    %511 = vector.broadcast %cst_431 : f32 to vector<16x128xf32>
    %512 = arith.addf %510, %511 : vector<16x128xf32>
    %cst_432 = arith.constant 0.000000e+00 : f32
    %cst_433 = arith.constant 6.000000e+00 : f32
    %513 = vector.broadcast %cst_432 : f32 to vector<16x128xf32>
    %514 = arith.maximumf %513, %512 : vector<16x128xf32>
    %515 = vector.broadcast %cst_433 : f32 to vector<16x128xf32>
    %516 = arith.minimumf %515, %514 : vector<16x128xf32>
    %517 = arith.mulf %510, %516 : vector<16x128xf32>
    %cst_434 = arith.constant 0.166666672 : f32
    %518 = vector.broadcast %cst_434 : f32 to vector<16x128xf32>
    %519 = arith.mulf %517, %518 : vector<16x128xf32>
    %cst_435 = arith.constant dense<0.000000e+00> : vector<128xf32>
    %520 = vector.multi_reduction <add>, %519, %cst_435 [0] : vector<16x128xf32> to vector<128xf32>
    %521 = vector.shape_cast %520 : vector<128xf32> to vector<1x128xf32>
    %cst_436 = arith.constant 6.250000e-02 : f32
    %522 = vector.broadcast %cst_436 : f32 to vector<1x128xf32>
    %523 = arith.mulf %521, %522 : vector<1x128xf32>
    %524 = arith.truncf %523 : vector<1x128xf32> to vector<1x128xbf16>
    %c0_437 = arith.constant 0 : index
    %c0_438 = arith.constant 0 : index
    %525 = vector.load %arg30[%c0_437, %c0_438] : memref<128x1024xbf16, #tpu.memory_space<vmem>>, vector<128x1024xbf16>
    %cst_439 = arith.constant dense<0.000000e+00> : vector<1x1024xf32>
    %526 = tpu.matmul %524, %525, %cst_439 {dimension_numbers = #tpu.dot_dimension_numbers<[1], [0], [0], [1], [0, 0, 1, 1], [], []>} : vector<1x128xbf16>, vector<128x1024xbf16>, vector<1x1024xf32> -> vector<1x1024xf32>
    %c0_440 = arith.constant 0 : index
    %c0_441 = arith.constant 0 : index
    %527 = vector.load %arg31[%c0_440, %c0_441] : memref<1x1024xf32, #tpu.memory_space<vmem>>, vector<1x1024xf32>
    %528 = arith.addf %526, %527 : vector<1x1024xf32>
    %cst_442 = arith.constant 3.000000e+00 : f32
    %529 = vector.broadcast %cst_442 : f32 to vector<1x1024xf32>
    %530 = arith.addf %528, %529 : vector<1x1024xf32>
    %cst_443 = arith.constant 0.000000e+00 : f32
    %cst_444 = arith.constant 6.000000e+00 : f32
    %531 = vector.broadcast %cst_443 : f32 to vector<1x1024xf32>
    %532 = arith.maximumf %531, %530 : vector<1x1024xf32>
    %533 = vector.broadcast %cst_444 : f32 to vector<1x1024xf32>
    %534 = arith.minimumf %533, %532 : vector<1x1024xf32>
    %535 = arith.mulf %528, %534 : vector<1x1024xf32>
    %cst_445 = arith.constant 0.166666672 : f32
    %536 = vector.broadcast %cst_445 : f32 to vector<1x1024xf32>
    %537 = arith.mulf %535, %536 : vector<1x1024xf32>
    %538 = arith.truncf %537 : vector<1x1024xf32> to vector<1x1024xbf16>
    %c0_446 = arith.constant 0 : index
    %c0_447 = arith.constant 0 : index
    %539 = vector.load %arg32[%c0_446, %c0_447] : memref<1024x128xbf16, #tpu.memory_space<vmem>>, vector<1024x128xbf16>
    %cst_448 = arith.constant dense<0.000000e+00> : vector<1x128xf32>
    %540 = tpu.matmul %538, %539, %cst_448 {dimension_numbers = #tpu.dot_dimension_numbers<[1], [0], [0], [1], [0, 0, 1, 1], [], []>} : vector<1x1024xbf16>, vector<1024x128xbf16>, vector<1x128xf32> -> vector<1x128xf32>
    %c0_449 = arith.constant 0 : index
    %c0_450 = arith.constant 0 : index
    %541 = vector.load %arg33[%c0_449, %c0_450] : memref<1x128xf32, #tpu.memory_space<vmem>>, vector<1x128xf32>
    %542 = arith.addf %540, %541 : vector<1x128xf32>
    %cst_451 = arith.constant 0.000000e+00 : f32
    %543 = vector.broadcast %cst_451 : f32 to vector<1x128xf32>
    %544 = arith.subf %543, %542 : vector<1x128xf32>
    %545 = math.exp %544 : vector<1x128xf32>
    %cst_452 = arith.constant 1.000000e+00 : f32
    %546 = vector.broadcast %cst_452 : f32 to vector<1x128xf32>
    %547 = arith.addf %546, %545 : vector<1x128xf32>
    %cst_453 = arith.constant 1.000000e+00 : f32
    %548 = vector.broadcast %cst_453 : f32 to vector<1x128xf32>
    %549 = arith.divf %548, %547 : vector<1x128xf32>
    %550 = vector.shape_cast %549 : vector<1x128xf32> to vector<1x128xf32>
    %551 = vector.broadcast %550 : vector<1x128xf32> to vector<8x128xf32>
    %c0_454 = arith.constant 0 : index
    %c0_455 = arith.constant 0 : index
    %552 = vector.load %arg34[%c0_454, %c0_455] : memref<8x128xf32, #tpu.memory_space<vmem>>, vector<8x128xf32>
    tpu.vector_store %arg34[%c0_454, %c0_455], %551 {strides = array<i32>} : memref<8x128xf32, #tpu.memory_space<vmem>>, vector<8x128xf32>,
    return
  }
  func.func @transform_0(%arg0: i32) -> (i32, i32) {
    %c0_i32 = arith.constant 0 : i32
    %c0_i32_0 = arith.constant 0 : i32
    return %arg0, %c0_i32 : i32, i32
  }
  func.func @transform_1(%arg0: i32) -> (i32, i32) {
    %c0_i32 = arith.constant 0 : i32
    %c0_i32_0 = arith.constant 0 : i32
    %c0_i32_1 = arith.constant 0 : i32
    return %c0_i32, %c0_i32_0 : i32, i32
  }
  func.func @transform_2(%arg0: i32) -> (i32, i32) {
    %c0_i32 = arith.constant 0 : i32
    %c0_i32_0 = arith.constant 0 : i32
    %c0_i32_1 = arith.constant 0 : i32
    return %c0_i32, %c0_i32_0 : i32, i32
  }
  func.func @transform_3(%arg0: i32) -> (i32, i32) {
    %c0_i32 = arith.constant 0 : i32
    %c0_i32_0 = arith.constant 0 : i32
    %c0_i32_1 = arith.constant 0 : i32
    return %c0_i32, %c0_i32_0 : i32, i32
  }
  func.func @transform_4(%arg0: i32) -> (i32, i32) {
    %c0_i32 = arith.constant 0 : i32
    %c0_i32_0 = arith.constant 0 : i32
    %c0_i32_1 = arith.constant 0 : i32
    return %c0_i32, %c0_i32_0 : i32, i32
  }
  func.func @transform_5(%arg0: i32) -> (i32, i32) {
    %c0_i32 = arith.constant 0 : i32
    %c0_i32_0 = arith.constant 0 : i32
    %c0_i32_1 = arith.constant 0 : i32
    return %c0_i32, %c0_i32_0 : i32, i32
  }
  func.func @transform_6(%arg0: i32) -> (i32, i32) {
    %c0_i32 = arith.constant 0 : i32
    %c0_i32_0 = arith.constant 0 : i32
    %c0_i32_1 = arith.constant 0 : i32
    return %c0_i32, %c0_i32_0 : i32, i32
  }
  func.func @transform_7(%arg0: i32) -> (i32, i32) {
    %c0_i32 = arith.constant 0 : i32
    %c0_i32_0 = arith.constant 0 : i32
    %c0_i32_1 = arith.constant 0 : i32
    return %c0_i32, %c0_i32_0 : i32, i32
  }
  func.func @transform_8(%arg0: i32) -> (i32, i32) {
    %c0_i32 = arith.constant 0 : i32
    %c0_i32_0 = arith.constant 0 : i32
    %c0_i32_1 = arith.constant 0 : i32
    return %c0_i32, %c0_i32_0 : i32, i32
  }
  func.func @transform_9(%arg0: i32) -> (i32, i32) {
    %c0_i32 = arith.constant 0 : i32
    %c0_i32_0 = arith.constant 0 : i32
    %c0_i32_1 = arith.constant 0 : i32
    return %c0_i32, %c0_i32_0 : i32, i32
  }
  func.func @transform_10(%arg0: i32) -> (i32, i32) {
    %c0_i32 = arith.constant 0 : i32
    %c0_i32_0 = arith.constant 0 : i32
    %c0_i32_1 = arith.constant 0 : i32
    return %c0_i32, %c0_i32_0 : i32, i32
  }
  func.func @transform_11(%arg0: i32) -> (i32, i32) {
    %c0_i32 = arith.constant 0 : i32
    %c0_i32_0 = arith.constant 0 : i32
    %c0_i32_1 = arith.constant 0 : i32
    return %c0_i32, %c0_i32_0 : i32, i32
  }
  func.func @transform_12(%arg0: i32) -> (i32, i32) {
    %c0_i32 = arith.constant 0 : i32
    %c0_i32_0 = arith.constant 0 : i32
    %c0_i32_1 = arith.constant 0 : i32
    return %c0_i32, %c0_i32_0 : i32, i32
  }
  func.func @transform_13(%arg0: i32) -> (i32, i32) {
    %c0_i32 = arith.constant 0 : i32
    %c0_i32_0 = arith.constant 0 : i32
    %c0_i32_1 = arith.constant 0 : i32
    return %c0_i32, %c0_i32_0 : i32, i32
  }
  func.func @transform_14(%arg0: i32) -> (i32, i32) {
    %c0_i32 = arith.constant 0 : i32
    %c0_i32_0 = arith.constant 0 : i32
    %c0_i32_1 = arith.constant 0 : i32
    return %c0_i32, %c0_i32_0 : i32, i32
  }
  func.func @transform_15(%arg0: i32) -> (i32, i32) {
    %c0_i32 = arith.constant 0 : i32
    %c0_i32_0 = arith.constant 0 : i32
    %c0_i32_1 = arith.constant 0 : i32
    return %c0_i32, %c0_i32_0 : i32, i32
  }
  func.func @transform_16(%arg0: i32) -> (i32, i32) {
    %c0_i32 = arith.constant 0 : i32
    %c0_i32_0 = arith.constant 0 : i32
    %c0_i32_1 = arith.constant 0 : i32
    return %c0_i32, %c0_i32_0 : i32, i32
  }
  func.func @transform_17(%arg0: i32) -> (i32, i32) {
    %c0_i32 = arith.constant 0 : i32
    %c0_i32_0 = arith.constant 0 : i32
    %c0_i32_1 = arith.constant 0 : i32
    return %c0_i32, %c0_i32_0 : i32, i32
  }
  func.func @transform_18(%arg0: i32) -> (i32, i32) {
    %c0_i32 = arith.constant 0 : i32
    %c0_i32_0 = arith.constant 0 : i32
    %c0_i32_1 = arith.constant 0 : i32
    return %c0_i32, %c0_i32_0 : i32, i32
  }
  func.func @transform_19(%arg0: i32) -> (i32, i32) {
    %c0_i32 = arith.constant 0 : i32
    %c0_i32_0 = arith.constant 0 : i32
    %c0_i32_1 = arith.constant 0 : i32
    return %c0_i32, %c0_i32_0 : i32, i32
  }
  func.func @transform_20(%arg0: i32) -> (i32, i32) {
    %c0_i32 = arith.constant 0 : i32
    %c0_i32_0 = arith.constant 0 : i32
    %c0_i32_1 = arith.constant 0 : i32
    return %c0_i32, %c0_i32_0 : i32, i32
  }
  func.func @transform_21(%arg0: i32) -> (i32, i32) {
    %c0_i32 = arith.constant 0 : i32
    %c0_i32_0 = arith.constant 0 : i32
    %c0_i32_1 = arith.constant 0 : i32
    return %c0_i32, %c0_i32_0 : i32, i32
  }
  func.func @transform_22(%arg0: i32) -> (i32, i32) {
    %c0_i32 = arith.constant 0 : i32
    %c0_i32_0 = arith.constant 0 : i32
    %c0_i32_1 = arith.constant 0 : i32
    return %c0_i32, %c0_i32_0 : i32, i32
  }
  func.func @transform_23(%arg0: i32) -> (i32, i32) {
    %c0_i32 = arith.constant 0 : i32
    %c0_i32_0 = arith.constant 0 : i32
    %c0_i32_1 = arith.constant 0 : i32
    return %c0_i32, %c0_i32_0 : i32, i32
  }
  func.func @transform_24(%arg0: i32) -> (i32, i32) {
    %c0_i32 = arith.constant 0 : i32
    %c0_i32_0 = arith.constant 0 : i32
    %c0_i32_1 = arith.constant 0 : i32
    return %c0_i32, %c0_i32_0 : i32, i32
  }
  func.func @transform_25(%arg0: i32) -> (i32, i32) {
    %c0_i32 = arith.constant 0 : i32
    %c0_i32_0 = arith.constant 0 : i32
    %c0_i32_1 = arith.constant 0 : i32
    return %c0_i32, %c0_i32_0 : i32, i32
  }
  func.func @transform_26(%arg0: i32) -> (i32, i32) {
    %c0_i32 = arith.constant 0 : i32
    %c0_i32_0 = arith.constant 0 : i32
    %c0_i32_1 = arith.constant 0 : i32
    return %c0_i32, %c0_i32_0 : i32, i32
  }
  func.func @transform_27(%arg0: i32) -> (i32, i32) {
    %c0_i32 = arith.constant 0 : i32
    %c0_i32_0 = arith.constant 0 : i32
    %c0_i32_1 = arith.constant 0 : i32
    return %c0_i32, %c0_i32_0 : i32, i32
  }
  func.func @transform_28(%arg0: i32) -> (i32, i32) {
    %c0_i32 = arith.constant 0 : i32
    %c0_i32_0 = arith.constant 0 : i32
    %c0_i32_1 = arith.constant 0 : i32
    return %c0_i32, %c0_i32_0 : i32, i32
  }
  func.func @transform_29(%arg0: i32) -> (i32, i32) {
    %c0_i32 = arith.constant 0 : i32
    %c0_i32_0 = arith.constant 0 : i32
    %c0_i32_1 = arith.constant 0 : i32
    return %c0_i32, %c0_i32_0 : i32, i32
  }
  func.func @transform_30(%arg0: i32) -> (i32, i32) {
    %c0_i32 = arith.constant 0 : i32
    %c0_i32_0 = arith.constant 0 : i32
    %c0_i32_1 = arith.constant 0 : i32
    return %c0_i32, %c0_i32_0 : i32, i32
  }
  func.func @transform_31(%arg0: i32) -> (i32, i32) {
    %c0_i32 = arith.constant 0 : i32
    %c0_i32_0 = arith.constant 0 : i32
    %c0_i32_1 = arith.constant 0 : i32
    return %c0_i32, %c0_i32_0 : i32, i32
  }
  func.func @transform_32(%arg0: i32) -> (i32, i32) {
    %c0_i32 = arith.constant 0 : i32
    %c0_i32_0 = arith.constant 0 : i32
    %c0_i32_1 = arith.constant 0 : i32
    return %c0_i32, %c0_i32_0 : i32, i32
  }
  func.func @transform_33(%arg0: i32) -> (i32, i32) {
    %c0_i32 = arith.constant 0 : i32
    %c0_i32_0 = arith.constant 0 : i32
    return %arg0, %c0_i32 : i32, i32
  }
}

</mosaic_0001>

<bundles_post_ra>
// kernel: forward.1
= control target key start
LH: loop header
LB: loop body
LE: loop exit
PB: predicated region body
PF: predicated region fallthrough
CT: control target
= control target key end

     0   :  { %s7284_s6 = smov 1   ;;  %s7285_s10 = smov 2   ;;  %s8924_s0 = inlined_call_operand.smem [shape: u32[34], index: -1, kind: input, shape index: {}] }
   0x1   :  { %s7328_s5 = sld [smem:[%s8924_s0]]   ;;  %s7286_s14 = smov 3  }
   0x2   :  { %s7333_s9 = sld [smem:[%s8924_s0 + %s7284_s6]]   ;;  %s7287_s18 = smov 4  }
   0x3   :  { %s7338_s13 = sld [smem:[%s8924_s0 + %s7285_s10]]   ;;  %s7288_s22 = smov 5  }
   0x4   :  { %s7343_s17 = sld [smem:[%s8924_s0 + %s7286_s14]]   ;;  %s7289_s26 = smov 6  }
   0x5   :  { %s7348_s21 = sld [smem:[%s8924_s0 + %s7287_s18]]   ;;  %s7290_s30 = smov 7  }
   0x6   :  { %s7353_s25 = sld [smem:[%s8924_s0 + %s7288_s22]]   ;;  %s7291_s4 = smov 8  }
   0x7   :  { %s7358_s29 = sld [smem:[%s8924_s0 + %s7289_s26]]   ;;  %s7292_s10 = smov 9  }
   0x8   :  { %s7363_s3 = sld [smem:[%s8924_s0 + %s7290_s30]]   ;;  %s7293_s15 = smov 10  }
   0x9   :  { %s7368_s8 = sld [smem:[%s8924_s0 + %s7291_s4]]   ;;  %s7294_s20 = smov 11  }
   0xa   :  { %s7373_s14 = sld [smem:[%s8924_s0 + %s7292_s10]]   ;;  %s7295_s26 = smov 12  }
   0xb   :  { %s7378_s19 = sld [smem:[%s8924_s0 + %s7293_s15]]   ;;  %s7296_s1 = smov 13  }
   0xc   :  { %s7383_s24 = sld [smem:[%s8924_s0 + %s7294_s20]]   ;;  %s7297_s7 = smov 14  }
   0xd   :  { %s7388_s30 = sld [smem:[%s8924_s0 + %s7295_s26]]   ;;  %s7298_s15 = smov 15  }
   0xe   :  { %s7393_s6 = sld [smem:[%s8924_s0 + %s7296_s1]]   ;;  %s7299_s22 = smov 16  }
   0xf   :  { %s7398_s12 = sld [smem:[%s8924_s0 + %s7297_s7]]   ;;  %s7300_s28 = smov 17  }
  0x10   :  { %s7403_s20 = sld [smem:[%s8924_s0 + %s7298_s15]]   ;;  %s7301_s7 = smov 18  }
  0x11   :  { %s7408_s27 = sld [smem:[%s8924_s0 + %s7299_s22]]   ;;  %s7302_s15 = smov 19  }
  0x12   :  { %s7413_s4 = sld [smem:[%s8924_s0 + %s7300_s28]]   ;;  %s7303_s22 = smov 20  }
  0x13   :  { %8932 = sst [smem:[#allocation17_spill]] %s7388_s30  ;;  %s7304_s28 = smov 21  }
  0x14   :  { %8933 = sst [smem:[#allocation18_spill]] %s7393_s6 }
  0x15   :  { %8934 = sst [smem:[#allocation19_spill]] %s7398_s12 }
  0x16   :  { %s7418_s12 = sld [smem:[%s8924_s0 + %s7301_s7]]   ;;  %s7305_s7 = smov 22  }
  0x17   :  { %8935 = sst [smem:[#allocation20_spill]] %s7408_s27 }
  0x18   :  { %s7423_s6 = sld [smem:[%s8924_s0 + %s7302_s15]]   ;;  %s7306_s15 = smov 23  }
  0x19   :  { %s7428_s27 = sld [smem:[%s8924_s0 + %s7303_s22]]   ;;  %s7307_s22 = smov 24  }
  0x1a   :  { %s7433_s30 = sld [smem:[%s8924_s0 + %s7304_s28]]   ;;  %s7308_s28 = smov 25  }
  0x1c   :  { %8936 = sst [smem:[#allocation21_spill]] %s7418_s12 }
  0x1d   :  { %s7438_s12 = sld [smem:[%s8924_s0 + %s7305_s7]]   ;;  %s7309_s7 = smov 26  }
  0x1e   :  { %8937 = sst [smem:[#allocation22_spill]] %s7423_s6 }
  0x1f   :  { %8938 = sst [smem:[#allocation23_spill]] %s7428_s27 }
  0x20   :  { %8939 = sst [smem:[#allocation24_spill]] %s7433_s30 }
  0x21   :  { %s7443_s6 = sld [smem:[%s8924_s0 + %s7306_s15]]   ;;  %s7310_s15 = smov 27  }
  0x22   :  { %s7448_s27 = sld [smem:[%s8924_s0 + %s7307_s22]]   ;;  %s7311_s22 = smov 28  }
  0x23   :  { %8940 = sst [smem:[#allocation25_spill]] %s7438_s12 }
  0x24   :  { %s7453_s30 = sld [smem:[%s8924_s0 + %s7308_s28]]   ;;  %s7312_s28 = smov 29  }
  0x25   :  { %s7458_s12 = sld [smem:[%s8924_s0 + %s7309_s7]]   ;;  %s7313_s7 = smov 30  }
  0x27   :  { %8941 = sst [smem:[#allocation26_spill]] %s7443_s6 }
  0x28   :  { %8942 = sst [smem:[#allocation27_spill]] %s7448_s27 }
  0x29   :  { %s7463_s6 = sld [smem:[%s8924_s0 + %s7310_s15]]   ;;  %s7314_s15 = smov 31  }
  0x2a   :  { %8943 = sst [smem:[#allocation28_spill]] %s7453_s30 }
  0x2b   :  { %8944 = sst [smem:[#allocation29_spill]] %s7458_s12 }
  0x2c   :  { %s7468_s27 = sld [smem:[%s8924_s0 + %s7311_s22]]   ;;  %s7315_s22 = smov 32  }
  0x2d   :  { %s7473_s30 = sld [smem:[%s8924_s0 + %s7312_s28]]   ;;  %s7316_s28 = smov 33  }
  0x2e   :  { %s7478_s12 = sld [smem:[%s8924_s0 + %s7313_s7]]   ;;  %s7495_s7 = smov 0  }
  0x2f   :  { %8945 = sst [smem:[#allocation30_spill]] %s7463_s6 }
  0x30   :  { %s7483_s6 = sld [smem:[%s8924_s0 + %s7314_s15]]  }
  0x32   :  { %8946 = sst [smem:[#allocation31_spill]] %s7468_s27 }
  0x33   :  { %8947 = sst [smem:[#allocation32_spill]] %s7473_s30 }
  0x34   :  { %s7488_s27 = sld [smem:[%s8924_s0 + %s7315_s22]]  }
  0x35   :  { %s7493_s30 = sld [smem:[%s8924_s0 + %s7316_s28]]  }
  0x36 LB: > { %s7501_s10 = sadd.s32 4294967295, %s7282_s7   ;;  %p6281_p0 = scmp.ge.s32.totalorder %s7282_s7, 1  ;;  %s7282_s7 = sphi %s7495_s7, %s77_s7  }
  0x37   : > { %p922_p1 = scmp.lt.s32.totalorder %s7282_s7, 3 }
  0x39   : > { %p923_p2 = pnand %p6281_p0, %p922_p1 }
  0x3b   : > { %926 = sbr.rel (%p923_p2) target bundleno = 3437 (0xd6d), region = 152 }
  0x42   : > { %v7080_v0 = vld [vmem:[%s7333_s9] sm:$0xff]   ;;  %s6282_s0 = sshll.u32 %s7501_s10, 5  ;;  %v7081_v1 = vld [vmem:[%s7333_s9 + $0x8] sm:$0xff]   ;;  %v7082_v2 = vld [vmem:[%s7333_s9 + $0x10] sm:$0xff]   ;;  %v7317_v24 = vmov 0.0   ;;  %vm7318_vm0 = vmmov 0  }
  0x43   : > { %p1006_p3 = scmp.lt.s32.totalorder %s6282_s0, 63  ;;  %6780 = vmatprep.subr.bf16.mxu0 %v7080_v0  ;;  %v7083_v3 = vld [vmem:[%s7333_s9 + $0x18] sm:$0xff]   ;;  %v7084_v5 = vld [vmem:[%s7333_s9 + $0x20] sm:$0xff]   ;;  %v7085_v6 = vld [vmem:[%s7333_s9 + $0x28] sm:$0xff]   ;;  %1573 = vst [vmem:[#allocation3 + $0x20] sm:$0xff] %v7317_v24  ;;  %6828 = vmatprep.subr.bf16.mxu1 %v7317_v24  ;;  %s8951_s16 = sld [smem:[#allocation17_spill]] }
  0x44   : > { %6781 = vmatpush3.bf16.msra.mxu0 %v7080_v0  ;;  %v7086_v7 = vld [vmem:[%s7333_s9 + $0x30] sm:$0xff]   ;;  %v7087_v8 = vld [vmem:[%s7333_s9 + $0x38] sm:$0xff]   ;;  %1574 = vst [vmem:[#allocation3 + $0x28] sm:$0xff] %v7317_v24  ;;  %1569 = vst [vmem:[#allocation3] sm:$0xff] %v7317_v24  ;;  %s8952_s18 = sld [smem:[#allocation18_spill]]  ;;  %s8953_s22 = sld [smem:[#allocation19_spill]] }
  0x45   : > { %s8968_s0 = smov (!%p1006_p3, %s6282_s0), 63  ;;  %6782 = vmatprep.subr.bf16.mxu0 %v7081_v1  ;;  %1570 = vst [vmem:[#allocation3 + $0x8] sm:$0xff] %v7317_v24  ;;  %1571 = vst [vmem:[#allocation3 + $0x10] sm:$0xff] %v7317_v24  ;;  %v7598_v25 = vld [vmem:[%s7338_s13] ss:$0 sm:$0xff]  ;;  %s8954_s23 = sld [smem:[#allocation20_spill]] }
  0x46   : > { %s6283_s11 = sshll.u32 %s8968_s0, 2  ;;  %1572 = vst [vmem:[#allocation3 + $0x18] sm:$0xff] %v7317_v24  ;;  %1575 = vst [vmem:[#allocation3 + $0x30] sm:$0xff] %v7317_v24  ;;  %v7605_v39 = vld [vmem:[%s7343_s17] ss:$0 sm:$0xff]  ;;  %s8955_s26 = sld [smem:[#allocation24_spill]] }
  0x47   : > { %s7510_s15 = scalar_lea.vmem %s7328_s5, %s6283_s11  ;;  %1576 = vst [vmem:[#allocation3 + $0x38] sm:$0xff] %v7317_v24  ;;  %1577 = vst [vmem:[#allocation3 + $0x40] sm:$0xff] %v7317_v24  ;;  %v7608_v42 = vld [vmem:[%s7343_s17 + $0x1] ss:$0 sm:$0xff]  ;;  %v1705_v49 = vmul.f32 0.0, %v7605_v39  ;;  %s8956_s28 = sld [smem:[#allocation26_spill]] }
  0x48   : > { %6783 = vmatpush3.bf16.msra.mxu0 %v7081_v1  ;;  %v7088_v4 = vld [vmem:[%s7510_s15] sm:$0xff]   ;;  %v7089_v9 = vld [vmem:[%s7510_s15 + $0x8] sm:$0xff]   ;;  %v7090_v10 = vld [vmem:[%s7510_s15 + $0x10] sm:$0xff]   ;;  %1578 = vst [vmem:[#allocation3 + $0x48] sm:$0xff] %v7317_v24  ;;  %s8957_s1 = sld [smem:[#allocation21_spill]]  ;;  %s8958_s2 = sld [smem:[#allocation22_spill]] }
  0x49   : > { %6784 = vmatprep.subr.bf16.mxu0 %v7082_v2  ;;  %6796 = vmatprep.mubr.bf16.mxu0 %v7088_v4  ;;  %v7091_v11 = vld [vmem:[%s7510_s15 + $0x18] sm:$0xff]   ;;  %v7092_v12 = vld [vmem:[%s7510_s15 + $0x20] sm:$0xff]   ;;  %v7093_v13 = vld [vmem:[%s7510_s15 + $0x28] sm:$0xff]   ;;  %1579 = vst [vmem:[#allocation3 + $0x50] sm:$0xff] %v7317_v24  ;;  %s8959_s0 = sld [smem:[#allocation23_spill]]  ;;  %s8960_s11 = sld [smem:[#allocation25_spill]] }
  0x4a   : > { %v7094_v14 = vld [vmem:[%s7510_s15 + $0x30] sm:$0xff]   ;;  %v7095_v15 = vld [vmem:[%s7510_s15 + $0x38] sm:$0xff]   ;;  %v7096_v16 = vld [vmem:[%s7510_s15 + $0x40] sm:$0xff]   ;;  %1580 = vst [vmem:[#allocation3 + $0x58] sm:$0xff] %v7317_v24  ;;  %p1011_p4 = scmp.lt.s32.totalorder %s7501_s10, 1 }
  0x4b   : > { %v7097_v17 = vld [vmem:[%s7510_s15 + $0x48] sm:$0xff]   ;;  %v7098_v18 = vld [vmem:[%s7510_s15 + $0x50] sm:$0xff]   ;;  %v7099_v19 = vld [vmem:[%s7510_s15 + $0x58] sm:$0xff]   ;;  %1581 = vst [vmem:[#allocation3 + $0x60] sm:$0xff] %v7317_v24 }
  0x4c   : > { %6785 = vmatpush3.bf16.msra.mxu0 %v7082_v2  ;;  %v7100_v20 = vld [vmem:[%s7510_s15 + $0x60] sm:$0xff]   ;;  %v7101_v21 = vld [vmem:[%s7510_s15 + $0x68] sm:$0xff]   ;;  %v7102_v22 = vld [vmem:[%s7510_s15 + $0x70] sm:$0xff]   ;;  %1582 = vst [vmem:[#allocation3 + $0x68] sm:$0xff] %v7317_v24  ;;  %s8970_s10 = smov (!%p1011_p4, %s7501_s10), 1 }
  0x4d   : > { %6786 = vmatprep.subr.bf16.mxu0 %v7083_v3  ;;  %v7103_v23 = vld [vmem:[%s7510_s15 + $0x78] sm:$0xff]   ;;  %1583 = vst [vmem:[#allocation3 + $0x70] sm:$0xff] %v7317_v24  ;;  %1584 = vst [vmem:[#allocation3 + $0x78] sm:$0xff] %v7317_v24  ;;  %v1741_v43 = vld [vmem:[#allocation3 + $0x1] sm:$0xff]  ;;  %s8961_s15 = sld [smem:[#allocation28_spill]] }
  0x4e   : > { %1585 = vst [vmem:[#allocation3 + $0x80] sm:$0xff] %v7317_v24  ;;  %1586 = vst [vmem:[#allocation3 + $0x88] sm:$0xff] %v7317_v24  ;;  %v1763_v54 = vmul.f32 %v7608_v42, %v1741_v43  ;;  %v7616_v0 = vld [vmem:[%s7343_s17 + $0x2] ss:$0 sm:$0xff]  ;;  %v1742_v1 = vld [vmem:[#allocation3 + $0x9] sm:$0xff] }
  0x4f   : > { %1587 = vst [vmem:[#allocation3 + $0x90] sm:$0xff] %v7317_v24  ;;  %1588 = vst [vmem:[#allocation3 + $0x98] sm:$0xff] %v7317_v24 }
  0x50   : > { %6787 = vmatpush3.bf16.msra.mxu0 %v7083_v3  ;;  %1589 = vst [vmem:[#allocation3 + $0xa0] sm:$0xff] %v7317_v24  ;;  %1590 = vst [vmem:[#allocation3 + $0xa8] sm:$0xff] %v7317_v24 }
  0x51   : > { %6788 = vmatprep.subr.bf16.mxu0 %v7084_v5  ;;  %1591 = vst [vmem:[#allocation3 + $0xb0] sm:$0xff] %v7317_v24  ;;  %1592 = vst [vmem:[#allocation3 + $0xb8] sm:$0xff] %v7317_v24 }
  0x52   : > { %1593 = vst [vmem:[#allocation3 + $0xc0] sm:$0xff] %v7317_v24  ;;  %1594 = vst [vmem:[#allocation3 + $0xc8] sm:$0xff] %v7317_v24 }
  0x53   : > { %1595 = vst [vmem:[#allocation3 + $0xd0] sm:$0xff] %v7317_v24  ;;  %1596 = vst [vmem:[#allocation3 + $0xd8] sm:$0xff] %v7317_v24 }
  0x54   : > { %6789 = vmatpush3.bf16.msra.mxu0 %v7084_v5  ;;  %1597 = vst [vmem:[#allocation3 + $0xe0] sm:$0xff] %v7317_v24  ;;  %1598 = vst [vmem:[#allocation3 + $0xe8] sm:$0xff] %v7317_v24  ;;  %v1799_v5 = vld [vmem:[#allocation3 + $0x2] sm:$0xff] }
  0x55   : > { %6790 = vmatprep.subr.bf16.mxu0 %v7085_v6  ;;  %1599 = vst [vmem:[#allocation3 + $0xf0] sm:$0xff] %v7317_v24  ;;  %1600 = vst [vmem:[#allocation3 + $0xf8] sm:$0xff] %v7317_v24 }
  0x56   : > { %1601 = vst [vmem:[#allocation3 + $0x100] sm:$0xff] %v7317_v24  ;;  %1602 = vst [vmem:[#allocation3 + $0x108] sm:$0xff] %v7317_v24 }
  0x57   : > { %1603 = vst [vmem:[#allocation3 + $0x110] sm:$0xff] %v7317_v24  ;;  %1604 = vst [vmem:[#allocation3 + $0x118] sm:$0xff] %v7317_v24 }
  0x58   : > { %6791 = vmatpush3.bf16.msra.mxu0 %v7085_v6  ;;  %1605 = vst [vmem:[#allocation3 + $0x120] sm:$0xff] %v7317_v24  ;;  %1606 = vst [vmem:[#allocation3 + $0x128] sm:$0xff] %v7317_v24 }
  0x59   : > { %6792 = vmatprep.subr.bf16.mxu0 %v7086_v7  ;;  %1607 = vst [vmem:[#allocation3 + $0x130] sm:$0xff] %v7317_v24  ;;  %1608 = vst [vmem:[#allocation3 + $0x138] sm:$0xff] %v7317_v24 }
  0x5a   : > { %1609 = vst [vmem:[#allocation3 + $0x140] sm:$0x3f] %v7317_v24  ;;  %3344 = vst [vmem:[#allocation8] sm:$0xff] %v7317_v24 }
  0x5b   : > { %3345 = vst [vmem:[#allocation8 + $0x8] sm:$0xff] %v7317_v24  ;;  %3346 = vst [vmem:[#allocation8 + $0x10] sm:$0xff] %v7317_v24 }
  0x5c   : > { %6793 = vmatpush3.bf16.msra.mxu0 %v7086_v7  ;;  %3347 = vst [vmem:[#allocation8 + $0x18] sm:$0xff] %v7317_v24  ;;  %3348 = vst [vmem:[#allocation8 + $0x20] sm:$0xff] %v7317_v24 }
  0x5d   : > { %6794 = vmatprep.subr.bf16.mxu0 %v7087_v8  ;;  %3349 = vst [vmem:[#allocation8 + $0x28] sm:$0xff] %v7317_v24  ;;  %3350 = vst [vmem:[#allocation8 + $0x30] sm:$0xff] %v7317_v24 }
  0x5e   : > { %3351 = vst [vmem:[#allocation8 + $0x38] sm:$0xff] %v7317_v24  ;;  %3352 = vst [vmem:[#allocation8 + $0x40] sm:$0xff] %v7317_v24 }
  0x5f   : > { %3353 = vst [vmem:[#allocation8 + $0x48] sm:$0xff] %v7317_v24  ;;  %3354 = vst [vmem:[#allocation8 + $0x50] sm:$0xff] %v7317_v24 }
  0x60   : > { %6795 = vmatpush3.bf16.msra.mxu0 %v7087_v8  ;;  %3355 = vst [vmem:[#allocation8 + $0x58] sm:$0xff] %v7317_v24  ;;  %3356 = vst [vmem:[#allocation8 + $0x60] sm:$0x3f] %v7317_v24 }
  0x61   : > { %3962 = vst [vmem:[#allocation13] sm:$0xff] %v7317_v24  ;;  %3963 = vst [vmem:[#allocation13 + $0x8] sm:$0xff] %v7317_v24 }
  0x62   : > { %3964 = vst [vmem:[#allocation13 + $0x10] sm:$0xff] %v7317_v24  ;;  %3965 = vst [vmem:[#allocation13 + $0x18] sm:$0xff] %v7317_v24 }
  0x63   : > { %6797 = vmatmul.mubr.bf16.vlgmr.msra.gmra.mrb[0].mxu0 %v7089_v9  ;;  %3966 = vst [vmem:[#allocation13 + $0x20] sm:$0xff] %v7317_v24  ;;  %3967 = vst [vmem:[#allocation13 + $0x28] sm:$0xff] %v7317_v24 }
  0x64   : > { %6800 = vmatprep.mubr.bf16.mxu0 %v7090_v10  ;;  %3968 = vst [vmem:[#allocation13 + $0x30] sm:$0xff] %v7317_v24  ;;  %3969 = vst [vmem:[#allocation13 + $0x38] sm:$0xff] %v7317_v24 }
  0x65   : > { %3970 = vst [vmem:[#allocation13 + $0x40] sm:$0xf] %v7317_v24 }
  0x6b   : > { %6801 = vmatmul.mubr.bf16.gmra.mrb[4].mxu0 %v7091_v11 }
  0x6c   : > { %6804 = vmatprep.mubr.bf16.mxu0 %v7092_v12  ;;  %v1764_v12 = vmul.f32 %v7608_v42, %v1742_v1 }
  0x73   : > { %6805 = vmatmul.mubr.bf16.gmra.mrb[8].mxu0 %v7093_v13 }
  0x74   : > { %6808 = vmatprep.mubr.bf16.mxu0 %v7094_v14  ;;  %v1781_v14 = vadd.f32 %v1763_v54, %v1705_v49 }
  0x7b   : > { %6809 = vmatmul.mubr.bf16.gmra.mrb[12].mxu0 %v7095_v15  ;;  %v1821_v15 = vmul.f32 %v7616_v0, %v1799_v5 }
  0x7c   : > { %6812 = vmatprep.mubr.bf16.mxu0 %v7096_v16  ;;  %v1800_v16 = vld [vmem:[#allocation3 + $0xa] sm:$0xff] }
  0x83   : > { %6813 = vmatmul.mubr.bf16.gmra.mrb[16].mxu0 %v7097_v17 }
  0x84   : > { %6816 = vmatprep.mubr.bf16.mxu0 %v7098_v18 }
  0x8b   : > { %6817 = vmatmul.mubr.bf16.gmra.mrb[20].mxu0 %v7099_v19 }
  0x8c   : > { %6820 = vmatprep.mubr.bf16.mxu0 %v7100_v20 }
  0x93   : > { %6821 = vmatmul.mubr.bf16.gmra.mrb[24].mxu0 %v7101_v21 }
  0x94   : > { %6824 = vmatprep.mubr.bf16.mxu0 %v7102_v22 }
  0x9b   : > { %6825 = vmatmul.mubr.bf16.gmra.mrb[28].mxu0 %v7103_v23 }
 0x136   : > { %v6798_v26 = vpop.f32.mrb[0].mxu0 }
 0x137   : > { %v1258_v27 = vadd.f32 %v6798_v26, %v7598_v25  ;;  %v1249_v28 = vpop.f32.mrb[1].mxu0  ;;  %v7622_v26 = vld [vmem:[%s7343_s17 + $0x3] ss:$0 sm:$0xff] }
 0x138   : > { %v1250_v29 = vadd.f32 %v7598_v25, %v1249_v28  ;;  %v6799_v30 = vpop.f32.mrb[2].mxu0  ;;  %v1822_v28 = vmul.f32 %v7616_v0, %v1800_v16 }
 0x139   : > { %v1378_v31 = vadd.f32 3.0, %v1258_v27  ;;  %v1261_v32 = vadd.f32 %v6799_v30, %v7598_v25  ;;  %v1252_v33 = vpop.f32.mrb[3].mxu0 }
 0x13a   : > { %v1376_v34 = vadd.f32 3.0, %v1250_v29  ;;  %v1253_v35 = vadd.f32 %v7598_v25, %v1252_v33  ;;  %v1839_v33 = vadd.f32 %v1821_v15, %v1781_v14  ;;  %v7675_v14 = vld [vmem:[%s7343_s17 + $0x8] ss:$0 sm:$0xff] }
 0x13b   : > { %v1410_v36 = vmax.f32 %v1378_v31, 0.0  ;;  %v1379_v37 = vadd.f32 3.0, %v1261_v32  ;;  %v7628_v31 = vld [vmem:[%s7343_s17 + $0x4] ss:$0 sm:$0xff] }
 0x13c   : > { %v1408_v38 = vmax.f32 %v1376_v34, 0.0  ;;  %v1377_v40 = vadd.f32 3.0, %v1253_v35 }
 0x13d   : > { %v1442_v41 = vmin.f32 %v1410_v36, 6.0  ;;  %v1411_v44 = vmax.f32 %v1379_v37, 0.0 }
 0x13e   : > { %v1440_v45 = vmin.f32 %v1408_v38, 6.0  ;;  %v1409_v46 = vmax.f32 %v1377_v40, 0.0  ;;  %v6802_v47 = vpop.f32.mrb[4].mxu0 }
 0x13f   : > { %v1474_v48 = vmul.f32 %v1442_v41, %v1258_v27  ;;  %v1443_v50 = vmin.f32 %v1411_v44, 6.0  ;;  %v1274_v51 = vadd.f32 %v6802_v47, %v7598_v25  ;;  %v1265_v52 = vpop.f32.mrb[5].mxu0  ;;  %v1782_v27 = vadd.f32 %v1764_v12, %v1705_v49 }
 0x140   : > { %v1472_v53 = vmul.f32 %v1440_v45, %v1250_v29  ;;  %v1441_v55 = vmin.f32 %v1409_v46, 6.0  ;;  %v1266_v56 = vadd.f32 %v7598_v25, %v1265_v52  ;;  %v6803_v57 = vpop.f32.mrb[6].mxu0  ;;  %v7643_v45 = vld [vmem:[%s7343_s17 + $0x5] ss:$0 sm:$0xff]  ;;  %v7646_v46 = vld [vmem:[%s7343_s17 + $0x6] ss:$0 sm:$0xff] }
 0x141   : > { %v1506_v58 = vmul.f32 0.16666667, %v1474_v48  ;;  %v1475_v59 = vmul.f32 %v1443_v50, %v1261_v32  ;;  %v1382_v60 = vadd.f32 3.0, %v1274_v51  ;;  %v1277_v61 = vadd.f32 %v6803_v57, %v7598_v25  ;;  %v1268_v62 = vpop.f32.mrb[7].mxu0  ;;  %v7631_v32 = vld [vmem:[%s7343_s17 + $0x7] ss:$0 sm:$0xff] }
 0x142   : > { %v1504_v63 = vmul.f32 0.16666667, %v1472_v53  ;;  %v1473_v2 = vmul.f32 %v1441_v55, %v1253_v35  ;;  %v1380_v3 = vadd.f32 3.0, %v1266_v56  ;;  %v1269_v4 = vadd.f32 %v7598_v25, %v1268_v62 }
 0x143   : > { %1616 = vst [vmem:[#allocation3 + $0x25] sm:$0xff] %v1506_v58  ;;  %v1507_v6 = vmul.f32 0.16666667, %v1475_v59  ;;  %v1414_v7 = vmax.f32 %v1382_v60, 0.0  ;;  %v1383_v8 = vadd.f32 3.0, %v1277_v61  ;;  %v2079_v41 = vmul.f32 %v7631_v32, %v1506_v58 }
 0x144   : > { %1612 = vst [vmem:[#allocation3 + $0x13] sm:$0xff] %v1504_v63  ;;  %v1505_v9 = vmul.f32 0.16666667, %v1473_v2  ;;  %v1412_v10 = vmax.f32 %v1380_v3, 0.0  ;;  %v1381_v11 = vadd.f32 3.0, %v1269_v4  ;;  %v1840_v43 = vadd.f32 %v1822_v28, %v1782_v27 }
 0x145   : > { %1617 = vst [vmem:[#allocation3 + $0x2d] sm:$0xff] %v1507_v6  ;;  %v1446_v13 = vmin.f32 %v1414_v7, 6.0  ;;  %v1415_v20 = vmax.f32 %v1383_v8, 0.0  ;;  %v1921_v49 = vmul.f32 %v7628_v31, %v1504_v63 }
 0x146   : > { %1613 = vst [vmem:[#allocation3 + $0x1b] sm:$0xff] %v1505_v9  ;;  %v1444_v17 = vmin.f32 %v1412_v10, 6.0  ;;  %v6806_v18 = vpop.f32.mrb[8].mxu0  ;;  %v1413_v23 = vmax.f32 %v1381_v11, 0.0  ;;  %v1922_v54 = vmul.f32 %v7628_v31, %v1505_v9 }
 0x147   : > { %v1478_v19 = vmul.f32 %v1446_v13, %v1274_v51  ;;  %v1281_v21 = vpop.f32.mrb[9].mxu0  ;;  %v1447_v36 = vmin.f32 %v1415_v20, 6.0  ;;  %v7635_v37 = vadd.f32 %v6806_v18, %v7598_v25  ;;  %v2080_v51 = vmul.f32 %v7631_v32, %v1507_v6 }
 0x148   : > { %v1476_v22 = vmul.f32 %v1444_v17, %v1266_v56  ;;  %v6807_v24 = vpop.f32.mrb[10].mxu0  ;;  %v1445_v40 = vmin.f32 %v1413_v23, 6.0  ;;  %v7640_v44 = vadd.f32 %v7598_v25, %v1281_v21 }
 0x149   : > { %v7625_v29 = vmul.f32 0.16666667, %v1478_v19  ;;  %v1284_v30 = vpop.f32.mrb[11].mxu0  ;;  %v1479_v55 = vmul.f32 %v1447_v36, %v1277_v61  ;;  %v7654_v56 = vadd.f32 3.0, %v7635_v37  ;;  %v7659_v1 = vadd.f32 %v6807_v24, %v7598_v25 }
 0x14a   : > { %v1508_v34 = vmul.f32 0.16666667, %v1476_v22  ;;  %v1959_v47 = vld [vmem:[#allocation3 + $0x24] sm:$0xff]  ;;  %v1477_v63 = vmul.f32 %v1445_v40, %v1269_v4  ;;  %v1384_v5 = vadd.f32 3.0, %v7640_v44  ;;  %v7665_v61 = vadd.f32 %v7598_v25, %v1284_v30 }
 0x14b   : > { %v1801_v35 = vld [vmem:[#allocation3 + $0x12] sm:$0xff]  ;;  %1624 = vst [vmem:[#allocation3 + $0x49] sm:$0xff] %v7625_v29  ;;  %v2021_v4 = vmul.f32 %v7646_v46, %v1959_v47 }
 0x14c   : > { %v1863_v38 = vmul.f32 %v7622_v26, %v1801_v35  ;;  %1620 = vst [vmem:[#allocation3 + $0x37] sm:$0xff] %v1508_v34  ;;  %v1688_v3 = vld [vmem:[#allocation3 + $0x28] sm:$0xff] }
 0x14d   : > { %v1687_v52 = vld [vmem:[#allocation3 + $0x20] sm:$0xff]  ;;  %v1957_v62 = vld [vmem:[#allocation3 + $0x14] sm:$0xff]  ;;  %v1746_v7 = vld [vmem:[#allocation3 + $0x29] sm:$0xff]  ;;  %v1710_v15 = vmul.f32 %v7605_v39, %v1688_v3 }
 0x14e   : > { %v1881_v48 = vadd.f32 %v1863_v38, %v1839_v33  ;;  %v7649_v50 = vpop.f32.mrb[12].mxu0  ;;  %v1802_v53 = vld [vmem:[#allocation3 + $0x1a] sm:$0xff]  ;;  %v1803_v60 = vld [vmem:[#allocation3 + $0x22] sm:$0xff]  ;;  %v1804_v8 = vld [vmem:[#allocation3 + $0x2a] sm:$0xff]  ;;  %v1979_v10 = vmul.f32 %v7643_v45, %v1957_v62  ;;  %v1709_v11 = vmul.f32 %v7605_v39, %v1687_v52  ;;  %v1768_v20 = vmul.f32 %v7608_v42, %v1746_v7 }
 0x14f   : > { %v7656_v57 = vpop.f32.mrb[13].mxu0  ;;  %v1745_v59 = vld [vmem:[#allocation3 + $0x21] sm:$0xff]  ;;  %v1864_v9 = vmul.f32 %v7622_v26, %v1802_v53  ;;  %v1960_v16 = vld [vmem:[#allocation3 + $0x2c] sm:$0xff]  ;;  %v7680_v21 = vmul.f32 %v7616_v0, %v1804_v8  ;;  %v7695_v52 = vld [vmem:[%s7348_s21] ss:$0 sm:$0xff]  ;;  %v1825_v53 = vmul.f32 %v7616_v0, %v1803_v60  ;;  %v1418_v60 = vmax.f32 %v7654_v56, 0.0 }
 0x150   : > { %v1939_v58 = vadd.f32 %v1921_v49, %v1881_v48  ;;  %v7661_v2 = vpop.f32.mrb[14].mxu0  ;;  %v1767_v12 = vmul.f32 %v7608_v42, %v1745_v59  ;;  %v1958_v13 = vld [vmem:[#allocation3 + $0x1c] sm:$0xff]  ;;  %v2115_v17 = vld [vmem:[#allocation3 + $0x26] sm:$0xff]  ;;  %v2116_v22 = vld [vmem:[#allocation3 + $0x2e] sm:$0xff]  ;;  %v2022_v34 = vmul.f32 %v7646_v46, %v1960_v16  ;;  %v1511_v8 = vmul.f32 0.16666667, %v1479_v55 }
 0x151   : > { %v7667_v6 = vpop.f32.mrb[15].mxu0  ;;  %v1882_v18 = vadd.f32 %v1864_v9, %v1840_v43  ;;  %v1980_v24 = vmul.f32 %v7643_v45, %v1958_v13  ;;  %v2137_v35 = vmul.f32 %v7675_v14, %v2115_v17  ;;  %v2138_v43 = vmul.f32 %v7675_v14, %v2116_v22 }
 0x152   : > { %v1997_v19 = vadd.f32 %v1979_v10, %v1939_v58  ;;  %v1785_v36 = vadd.f32 %v1767_v12, %v1709_v11  ;;  %v1509_v10 = vmul.f32 0.16666667, %v1477_v63  ;;  %1625 = vst [vmem:[#allocation3 + $0x51] sm:$0xff] %v1511_v8  ;;  %v1416_v13 = vmax.f32 %v1384_v5, 0.0 }
 0x153   : > { %v1940_v23 = vadd.f32 %v1922_v54, %v1882_v18  ;;  %v1689_v28 = vld [vmem:[#allocation3 + $0x30] sm:$0xff]  ;;  %v1692_v18 = vld [vmem:[#allocation3 + $0x48] sm:$0xff]  ;;  %v1450_v22 = vmin.f32 %v1418_v60, 6.0  ;;  %v1786_v55 = vadd.f32 %v1768_v20, %v1710_v15  ;;  %v1387_v5 = vadd.f32 3.0, %v7659_v1 }
 0x154   : > { %v2039_v27 = vadd.f32 %v2021_v4, %v1997_v19  ;;  %v7683_v30 = vld [vmem:[#allocation3 + $0x34] sm:$0xff]  ;;  %v1711_v54 = vmul.f32 %v7605_v39, %v1689_v28  ;;  %v1843_v9 = vadd.f32 %v1825_v53, %v1785_v36  ;;  %1621 = vst [vmem:[#allocation3 + $0x3f] sm:$0xff] %v1509_v10  ;;  %v1448_v63 = vmin.f32 %v1416_v13, 6.0 }
 0x155   : > { %v1805_v38 = vld [vmem:[#allocation3 + $0x32] sm:$0xff]  ;;  %v1998_v47 = vadd.f32 %v1980_v24, %v1940_v23  ;;  %v1482_v56 = vmul.f32 %v1450_v22, %v7635_v37  ;;  %v7724_v37 = vadd.f32 3.0, %v7665_v61  ;;  %v7757_v22 = vadd.f32 %v7661_v2, %v7598_v25 }
 0x156   : > { %v7685_v33 = vpop.f32.mrb[16].mxu0  ;;  %v2097_v48 = vadd.f32 %v2079_v41, %v2039_v27  ;;  %v1747_v58 = vld [vmem:[#allocation3 + $0x31] sm:$0xff]  ;;  %v1867_v7 = vmul.f32 %v7622_v26, %v1805_v38  ;;  %v1480_v36 = vmul.f32 %v1448_v63, %v7640_v44  ;;  %v1772_v44 = vmul.f32 %v7608_v42, %v7625_v29 }
 0x157   : > { %v7689_v40 = vpop.f32.mrb[17].mxu0  ;;  %v2040_v62 = vadd.f32 %v2022_v34, %v1998_v47  ;;  %v1769_v11 = vmul.f32 %v7608_v42, %v1747_v58  ;;  %v1903_v12 = vld [vmem:[#allocation3 + $0x33] sm:$0xff]  ;;  %v1714_v34 = vmul.f32 %v7605_v39, %v1692_v18  ;;  %v7719_v47 = vmul.f32 0.16666667, %v1482_v56 }
 0x158   : > { %v7692_v49 = vpop.f32.mrb[18].mxu0  ;;  %v2155_v3 = vadd.f32 %v2137_v35, %v2097_v48  ;;  %v1885_v19 = vadd.f32 %v1867_v7, %v1843_v9  ;;  %v1925_v27 = vmul.f32 %v7628_v31, %v1903_v12  ;;  %v7721_v53 = vmul.f32 0.16666667, %v1480_v36 }
 0x159   : > { %v7699_v59 = vpop.f32.mrb[19].mxu0  ;;  %v2098_v4 = vadd.f32 %v2080_v51, %v2040_v62  ;;  %v1787_v35 = vadd.f32 %v1769_v11, %v1711_v54  ;;  %v1693_v48 = vld [vmem:[#allocation3 + $0x50] sm:$0xff]  ;;  %v7728_v58 = vadd.f32 %v7649_v50, %v7598_v25  ;;  %v1827_v54 = vmul.f32 %v7616_v0, %v1805_v38  ;;  %1632 = vst [vmem:[#allocation3 + $0x6d] sm:$0xff] %v7719_v47 }
 0x15a   : > { %v2179_v41 = vadd.f32 %v7695_v52, %v2155_v3  ;;  %v1419_v62 = vmax.f32 %v1387_v5, 0.0  ;;  %v7736_v3 = vadd.f32 %v7598_v25, %v7656_v57  ;;  %v1844_v7 = vadd.f32 %v7680_v21, %v1786_v55  ;;  %1628 = vst [vmem:[#allocation3 + $0x5b] sm:$0xff] %v7721_v53  ;;  %v1964_v57 = vld [vmem:[#allocation3 + $0x4c] sm:$0xff] }
 0x15b   : > { %v2156_v16 = vadd.f32 %v2138_v43, %v2098_v4  ;;  %v1943_v43 = vadd.f32 %v1925_v27, %v1885_v19  ;;  %v1983_v9 = vmul.f32 %v7643_v45, %v7683_v30  ;;  %v1790_v50 = vadd.f32 %v1772_v44, %v1714_v34  ;;  %v1808_v4 = vld [vmem:[#allocation3 + $0x4a] sm:$0xff]  ;;  %v1806_v12 = vld [vmem:[#allocation3 + $0x3a] sm:$0xff]  ;;  %v1807_v13 = vld [vmem:[#allocation3 + $0x42] sm:$0xff] }
 0x15c   : > { %v2197_v17 = vmax.f32 %v2179_v41, 0.0  ;;  %v1845_v10 = vadd.f32 %v1827_v54, %v1787_v35  ;;  %v1715_v29 = vmul.f32 %v7605_v39, %v1693_v48  ;;  %v1773_v38 = vmul.f32 %v7608_v42, %v1511_v8  ;;  %v1809_v41 = vld [vmem:[#allocation3 + $0x52] sm:$0xff]  ;;  %v1962_v18 = vld [vmem:[#allocation3 + $0x3c] sm:$0xff]  ;;  %v1963_v35 = vld [vmem:[#allocation3 + $0x44] sm:$0xff] }
 0x15d   : > { %v2180_v24 = vadd.f32 %v7695_v52, %v2156_v16  ;;  %v2001_v60 = vadd.f32 %v1983_v9, %v1943_v43  ;;  %v7748_v30 = vadd.f32 3.0, %v7728_v58  ;;  %v1451_v19 = vmin.f32 %v1419_v62, 6.0  ;;  %v1905_v34 = vld [vmem:[#allocation3 + $0x43] sm:$0xff] }
 0x15e   : > { %v7705_v23 = vpop.f32.mrb[20].mxu0  ;;  %2215 = vst [vmem:[#allocation4] sm:$0xff] %v2197_v17  ;;  %v1904_v17 = vld [vmem:[#allocation3 + $0x3b] sm:$0xff]  ;;  %v7753_v8 = vadd.f32 3.0, %v7736_v3  ;;  %v7761_v55 = vadd.f32 %v7598_v25, %v7667_v6  ;;  %v7767_v27 = vmul.f32 %v7616_v0, %v1809_v41  ;;  %v1868_v56 = vmul.f32 %v7622_v26, %v1806_v12  ;;  %v2061_v44 = vld [vmem:[#allocation3 + $0x45] sm:$0xff]  ;;  %v2062_v12 = vld [vmem:[#allocation3 + $0x4d] sm:$0xff] }
 0x15f   : > { %v7707_v51 = vpop.f32.mrb[21].mxu0  ;;  %v2198_v20 = vmax.f32 %v2180_v24, 0.0  ;;  %v1830_v24 = vmul.f32 %v7616_v0, %v1808_v4  ;;  %v1869_v5 = vmul.f32 %v7622_v26, %v1807_v13  ;;  %v7773_v2 = vadd.f32 %v1773_v38, %v1715_v29  ;;  %v2119_v41 = vld [vmem:[#allocation3 + $0x46] sm:$0xff] }
 0x160   : > { %v7713_v28 = vpop.f32.mrb[22].mxu0  ;;  %v2026_v6 = vmul.f32 %v7646_v46, %v1964_v57  ;;  %v1926_v48 = vmul.f32 %v7628_v31, %v1904_v17  ;;  %v1927_v54 = vmul.f32 %v7628_v31, %v1905_v34  ;;  %v2025_v62 = vmul.f32 %v7646_v46, %v1963_v35 }
 0x161   : > { %v7717_v15 = vpop.f32.mrb[23].mxu0  ;;  %2216 = vst [vmem:[#allocation4 + $0x8] sm:$0xff] %v2198_v20  ;;  %v1886_v20 = vadd.f32 %v1868_v56, %v1844_v7  ;;  %v1887_v43 = vadd.f32 %v1869_v5, %v1845_v10  ;;  %v1984_v4 = vmul.f32 %v7643_v45, %v1962_v18  ;;  %v2083_v29 = vmul.f32 %v7631_v32, %v2061_v44  ;;  %v2120_v7 = vld [vmem:[#allocation3 + $0x4e] sm:$0xff]  ;;  %v1810_v57 = vld [vmem:[#allocation3 + $0x5a] sm:$0xff] }
 0x162   : > { %v2043_v21 = vadd.f32 %v2025_v62, %v2001_v60  ;;  %v1848_v56 = vadd.f32 %v1830_v24, %v1790_v50  ;;  %v1985_v5 = vmul.f32 %v7643_v45, %v1963_v35  ;;  %v2142_v44 = vmul.f32 %v7675_v14, %v2120_v7 }
 0x163   : > { %v1944_v9 = vadd.f32 %v1926_v48, %v1886_v20  ;;  %v1945_v13 = vadd.f32 %v1927_v54, %v1887_v43  ;;  %v2141_v20 = vmul.f32 %v7675_v14, %v2119_v41  ;;  %v2084_v43 = vmul.f32 %v7631_v32, %v2062_v12  ;;  %v1965_v48 = vld [vmem:[#allocation3 + $0x54] sm:$0xff] }
 0x164   : > { %v2101_v34 = vadd.f32 %v2083_v29, %v2043_v21  ;;  %v1930_v21 = vmul.f32 %v7628_v31, %v7721_v53  ;;  %v2027_v35 = vmul.f32 %v7646_v46, %v1965_v48  ;;  %v2121_v12 = vld [vmem:[#allocation3 + $0x56] sm:$0xff] }
 0x165   : > { %v2002_v10 = vadd.f32 %v1984_v4, %v1944_v9  ;;  %v2003_v54 = vadd.f32 %v1985_v5, %v1945_v13  ;;  %v1872_v9 = vmul.f32 %v7622_v26, %v1810_v57  ;;  %v1483_v5 = vmul.f32 %v1451_v19, %v7659_v1 }
 0x166   : > { %v7744_v11 = vpop.f32.mrb[24].mxu0  ;;  %v2159_v62 = vadd.f32 %v2141_v20, %v2101_v34  ;;  %v2143_v20 = vmul.f32 %v7675_v14, %v2121_v12 }
 0x167   : > { %v7750_v16 = vpop.f32.mrb[25].mxu0  ;;  %v2044_v60 = vadd.f32 %v2026_v6, %v2002_v10  ;;  %v1890_v24 = vadd.f32 %v1872_v9, %v1848_v56  ;;  %v2045_v13 = vadd.f32 %v2027_v35, %v2003_v54  ;;  %v8949_v56 = vmax.f32 %v7724_v37, 0.0 }
 0x168   : > { %v7763_v63 = vpop.f32.mrb[26].mxu0  ;;  %v2183_v50 = vadd.f32 %v7695_v52, %v2159_v62 }
 0x169   : > { %v7771_v36 = vpop.f32.mrb[27].mxu0  ;;  %v2102_v4 = vadd.f32 %v2084_v43, %v2044_v60  ;;  %v7798_v7 = vadd.f32 %v1930_v21, %v1890_v24  ;;  %v1449_v34 = vmin.f32 %v8949_v56, 6.0  ;;  %v1422_v43 = vmax.f32 %v7748_v30, 0.0 }
 0x16a   : > { %v2201_v29 = vmax.f32 %v2183_v50, 0.0  ;;  %v1420_v60 = vmax.f32 %v7753_v8, 0.0  ;;  %v7838_v56 = vadd.f32 %v7598_v25, %v7699_v59 }
 0x16b   : > { %v2160_v41 = vadd.f32 %v2142_v44, %v2102_v4  ;;  %v1515_v44 = vmul.f32 0.16666667, %v1483_v5  ;;  %v1481_v54 = vmul.f32 %v1449_v34, %v7665_v61  ;;  %v1454_v9 = vmin.f32 %v1422_v43, 6.0 }
 0x16c   : > { %2219 = vst [vmem:[#allocation4 + $0x20] sm:$0xff] %v2201_v29  ;;  %v1452_v1 = vmin.f32 %v1420_v60, 6.0  ;;  %v1389_v4 = vadd.f32 3.0, %v7761_v55  ;;  %v7816_v61 = vadd.f32 %v7685_v33, %v7598_v25  ;;  %v7820_v29 = vadd.f32 %v7598_v25, %v7689_v40 }
 0x16d   : > { %v2184_v57 = vadd.f32 %v7695_v52, %v2160_v41  ;;  %1633 = vst [vmem:[#allocation3 + $0x75] sm:$0xff] %v1515_v44  ;;  %v1513_v37 = vmul.f32 0.16666667, %v1481_v54  ;;  %v1486_v30 = vmul.f32 %v1454_v9, %v7728_v58  ;;  %v7845_v34 = vadd.f32 %v7705_v23, %v7598_v25 }
 0x16e   : > { %v7781_v38 = vpop.f32.mrb[28].mxu0  ;;  %v1484_v8 = vmul.f32 %v1452_v1, %v7736_v3  ;;  %v1421_v21 = vmax.f32 %v1389_v4, 0.0  ;;  %v1394_v58 = vadd.f32 3.0, %v7816_v61  ;;  %v1849_v3 = vadd.f32 %v7767_v27, %v7773_v2 }
 0x16f   : > { %v7783_v17 = vpop.f32.mrb[29].mxu0  ;;  %v2202_v48 = vmax.f32 %v2184_v57, 0.0  ;;  %1629 = vst [vmem:[#allocation3 + $0x63] sm:$0xff] %v1513_v37  ;;  %v1518_v41 = vmul.f32 0.16666667, %v1486_v30  ;;  %v7829_v5 = vadd.f32 3.0, %v7820_v29  ;;  %v2088_v2 = vmul.f32 %v7631_v32, %v7719_v47 }
 0x170   : > { %8948 = vst [vmem:[#allocation33_spill] sm:$0xff] %v7783_v17  ;;  %v7787_v18 = vpop.f32.mrb[30].mxu0  ;;  %v2063_v17 = vld [vmem:[#allocation3 + $0x55] sm:$0xff]  ;;  %v1516_v12 = vmul.f32 0.16666667, %v1484_v8  ;;  %v1453_v57 = vmin.f32 %v1421_v21, 6.0 }
 0x171   : > { %v7796_v6 = vpop.f32.mrb[31].mxu0  ;;  %v2085_v10 = vmul.f32 %v7631_v32, %v2063_v17  ;;  %v1391_v17 = vadd.f32 3.0, %v7757_v22  ;;  %2220 = vst [vmem:[#allocation4 + $0x28] sm:$0xff] %v2202_v48  ;;  %1640 = vst [vmem:[#allocation3 + $0x91] sm:$0xff] %v1518_v41  ;;  %v1426_v40 = vmax.f32 %v1394_v58, 0.0  ;;  %v1424_v9 = vmax.f32 %v7829_v5, 0.0 }
 0x172   : > { %1636 = vst [vmem:[#allocation3 + $0x7f] sm:$0xff] %v1516_v12  ;;  %v1485_v47 = vmul.f32 %v1453_v57, %v7761_v55  ;;  %v7858_v1 = vadd.f32 3.0, %v7838_v56  ;;  %v7862_v4 = vadd.f32 3.0, %v7845_v34 }
 0x173   : > { %v2103_v53 = vadd.f32 %v2085_v10, %v2045_v13  ;;  %v1423_v19 = vmax.f32 %v1391_v17, 0.0  ;;  %v1968_v13 = vld [vmem:[#allocation3 + $0x6c] sm:$0xff]  ;;  %v1458_v23 = vmin.f32 %v1426_v40, 6.0 }
 0x174   : > { %v2030_v27 = vmul.f32 %v7646_v46, %v1968_v13  ;;  %v2124_v43 = vld [vmem:[#allocation3 + $0x6e] sm:$0xff]  ;;  %v2125_v58 = vld [vmem:[#allocation3 + $0x76] sm:$0xff] }
 0x175   : > { %v2161_v62 = vadd.f32 %v2143_v20, %v2103_v53  ;;  %v1455_v24 = vmin.f32 %v1423_v19, 6.0  ;;  %v1969_v53 = vld [vmem:[#allocation3 + $0x74] sm:$0xff]  ;;  %v2089_v20 = vmul.f32 %v7631_v32, %v1515_v44 }
 0x176   : > { %v1811_v60 = vld [vmem:[#allocation3 + $0x62] sm:$0xff]  ;;  %v1812_v48 = vld [vmem:[#allocation3 + $0x6a] sm:$0xff] }
 0x177   : > { %v2185_v50 = vadd.f32 %v7695_v52, %v2161_v62  ;;  %v1487_v10 = vmul.f32 %v1455_v24, %v7757_v22  ;;  %v7834_v22 = vadd.f32 %v7692_v49, %v7598_v25  ;;  %v1931_v49 = vmul.f32 %v7628_v31, %v1513_v37  ;;  %v1966_v54 = vld [vmem:[#allocation3 + $0x5c] sm:$0xff]  ;;  %v1967_v17 = vld [vmem:[#allocation3 + $0x64] sm:$0xff]  ;;  %v1755_v12 = vld [vmem:[#allocation3 + $0x71] sm:$0xff] }
 0x178   : > { %v1873_v59 = vmul.f32 %v7622_v26, %v1811_v60  ;;  %v2305_v62 = vmul.f32 %v7608_v42, %v1518_v41  ;;  %v1988_v25 = vmul.f32 %v7643_v45, %v1966_v54  ;;  %v2031_v37 = vmul.f32 %v7646_v46, %v1969_v53  ;;  %v1696_v55 = vld [vmem:[#allocation3 + $0x68] sm:$0xff] }
 0x179   : > { %v2203_v35 = vmax.f32 %v2185_v50, 0.0  ;;  %v7826_v33 = vmul.f32 0.16666667, %v1487_v10  ;;  %v7855_v44 = vadd.f32 3.0, %v7834_v22  ;;  %v2146_v50 = vmul.f32 %v7675_v14, %v2124_v43  ;;  %v1754_v8 = vld [vmem:[#allocation3 + $0x69] sm:$0xff]  ;;  %v1814_v43 = vld [vmem:[#allocation3 + $0x7a] sm:$0xff] }
 0x17a   : > { %v1891_v19 = vadd.f32 %v1873_v59, %v1849_v3  ;;  %v2006_v30 = vadd.f32 %v1988_v25, %v7798_v7  ;;  %v1989_v21 = vmul.f32 %v7643_v45, %v1967_v17  ;;  %v1718_v13 = vmul.f32 %v7605_v39, %v1696_v55  ;;  %v1970_v59 = vld [vmem:[#allocation3 + $0x7c] sm:$0xff] }
 0x17b   : > { %2221 = vst [vmem:[#allocation4 + $0x30] sm:$0xff] %v2203_v35  ;;  %1641 = vst [vmem:[#allocation3 + $0x99] sm:$0xff] %v7826_v33  ;;  %v1697_v35 = vld [vmem:[#allocation3 + $0x70] sm:$0xff]  ;;  %v1776_v3 = vmul.f32 %v7608_v42, %v1754_v8  ;;  %v1777_v53 = vmul.f32 %v7608_v42, %v1755_v12  ;;  %v2147_v60 = vmul.f32 %v7675_v14, %v2125_v58  ;;  %v1756_v8 = vld [vmem:[#allocation3 + $0x79] sm:$0xff] }
 0x17c   : > { %v1949_v24 = vadd.f32 %v1931_v49, %v1891_v19  ;;  %v2048_v41 = vadd.f32 %v2030_v27, %v2006_v30  ;;  %v1719_v5 = vmul.f32 %v7605_v39, %v1697_v35  ;;  %v1813_v27 = vld [vmem:[#allocation3 + $0x72] sm:$0xff]  ;;  %v1834_v25 = vmul.f32 %v7616_v0, %v1812_v48  ;;  %v7883_v58 = vld [vmem:[%s7338_s13] ss:$0 sm:$0xff] }
 0x17d   : > { %v1794_v54 = vadd.f32 %v1776_v3, %v1718_v13  ;;  %v2233_v30 = vld [vmem:[#allocation3 + $0x90] sm:$0xff]  ;;  %v1778_v12 = vmul.f32 %v7608_v42, %v1756_v8  ;;  %v7887_v3 = vadd.f32 %v7883_v58, %v7707_v51  ;;  %v1456_v42 = vmin.f32 %v1424_v9, 6.0 }
 0x17e   : > { %v2007_v10 = vadd.f32 %v1989_v21, %v1949_v24  ;;  %v2106_v57 = vadd.f32 %v2088_v2, %v2048_v41  ;;  %v1876_v2 = vmul.f32 %v7622_v26, %v1814_v43  ;;  %v1835_v24 = vmul.f32 %v7616_v0, %v1813_v27  ;;  %v1912_v26 = vld [vmem:[#allocation3 + $0x7b] sm:$0xff] }
 0x17f   : > { %v1852_v21 = vadd.f32 %v1834_v25, %v1794_v54  ;;  %v2251_v41 = vmul.f32 %v7605_v39, %v2233_v30  ;;  %v1425_v27 = vmax.f32 %v7858_v1, 0.0  ;;  %v1836_v51 = vmul.f32 %v7616_v0, %v1814_v43  ;;  %v7104_v43 = vld [vmem:[%s7353_s25] sm:$0xff]  }
 0x180   : > { %v2049_v40 = vadd.f32 %v2031_v37, %v2007_v10  ;;  %v2164_v7 = vadd.f32 %v2146_v50, %v2106_v57  ;;  %v1698_v37 = vld [vmem:[#allocation3 + $0x78] sm:$0xff]  ;;  %v1795_v50 = vadd.f32 %v1777_v53, %v1719_v5  ;;  %v1934_v57 = vmul.f32 %v7628_v31, %v1912_v26  ;;  %6829 = vmatpush3.bf16.msra.mxu1 %v7104_v43 }
 0x181   : > { %v1720_v48 = vmul.f32 %v7605_v39, %v1698_v37  ;;  %v1894_v13 = vadd.f32 %v1876_v2, %v1852_v21  ;;  %v1517_v5 = vmul.f32 0.16666667, %v1485_v47  ;;  %v1490_v39 = vmul.f32 %v1458_v23, %v7816_v61  ;;  %v7105_v37 = vld [vmem:[%s7353_s25 + $0x8] sm:$0xff]   ;;  %v7107_v43 = vld [vmem:[%s7353_s25 + $0x18] sm:$0xff]  }
 0x182   : > { %v2107_v49 = vadd.f32 %v2089_v20, %v2049_v40  ;;  %v2188_v17 = vadd.f32 %v7695_v52, %v2164_v7  ;;  %v7880_v10 = vadd.f32 %v1835_v24, %v1795_v50  ;;  %v7890_v40 = vadd.f32 %v2305_v62, %v2251_v41  ;;  %v1858_v54 = vld [vmem:[#allocation3 + $0x9a] sm:$0xff] }
 0x183   : > { %v1796_v53 = vadd.f32 %v1778_v12, %v1720_v48  ;;  %v1952_v7 = vadd.f32 %v1934_v57, %v1894_v13  ;;  %1637 = vst [vmem:[#allocation3 + $0x87] sm:$0xff] %v1517_v5  ;;  %v1488_v31 = vmul.f32 %v1456_v42, %v7820_v29  ;;  %v1430_v62 = vmax.f32 %v7862_v4, 0.0  ;;  %v2234_v47 = vld [vmem:[#allocation3 + $0x98] sm:$0xff]  ;;  %v7933_v48 = vld [vmem:[%s7343_s17 + $0x2] ss:$0 sm:$0xff] }
 0x184   : > { %v2165_v19 = vadd.f32 %v2147_v60, %v2107_v49  ;;  %v2206_v55 = vmax.f32 %v2188_v17, 0.0  ;;  %v1857_v60 = vld [vmem:[#allocation3 + $0x92] sm:$0xff]  ;;  %v1427_v49 = vmax.f32 %v7855_v44, 0.0  ;;  %v7896_v17 = vmul.f32 0.16666667, %v1490_v39 }
 0x185   : > { %v1992_v61 = vmul.f32 %v7643_v45, %v1970_v59  ;;  %v1457_v23 = vmin.f32 %v1425_v27, 6.0  ;;  %v1854_v25 = vadd.f32 %v1836_v51, %v1796_v53  ;;  %v1973_v44 = vld [vmem:[#allocation3 + $0x94] sm:$0xff]  ;;  %v7902_v1 = vmul.f32 0.16666667, %v1488_v31  ;;  %v7908_v59 = vld [vmem:[%s7343_s17] ss:$0 sm:$0xff] }
 0x186   : > { %v2189_v20 = vadd.f32 %v7695_v52, %v2165_v19  ;;  %2224 = vst [vmem:[#allocation4 + $0x48] sm:$0xff] %v2206_v55  ;;  %v1459_v9 = vmin.f32 %v1427_v49, 6.0  ;;  %1648 = vst [vmem:[#allocation3 + $0xb5] sm:$0xff] %v7896_v17  ;;  %v1462_v0 = vmin.f32 %v1430_v62, 6.0  ;;  %v2071_v2 = vld [vmem:[#allocation3 + $0x95] sm:$0xff]  ;;  %v2252_v55 = vmul.f32 %v7908_v59, %v2234_v47 }
 0x187   : > { %v2010_v19 = vadd.f32 %v1992_v61, %v1952_v7  ;;  %v1489_v4 = vmul.f32 %v1457_v23, %v7838_v56  ;;  %v2129_v45 = vld [vmem:[#allocation3 + $0x96] sm:$0xff]  ;;  %1644 = vst [vmem:[#allocation3 + $0xa3] sm:$0xff] %v7902_v1  ;;  %v2035_v56 = vmul.f32 %v7646_v46, %v1973_v44  ;;  %v2093_v24 = vmul.f32 %v7631_v32, %v2071_v2  ;;  %v7944_v13 = vld [vmem:[%s7343_s17 + $0x3] ss:$0 sm:$0xff]  ;;  %v7952_v49 = vld [vmem:[%s7343_s17 + $0x4] ss:$0 sm:$0xff] }
 0x188   : > { %v2207_v35 = vmax.f32 %v2189_v20, 0.0  ;;  %v1491_v29 = vmul.f32 %v1459_v9, %v7834_v22  ;;  %v1494_v30 = vmul.f32 %v1462_v0, %v7845_v34  ;;  %v7918_v22 = vld [vmem:[#allocation3] sm:$0xff]  ;;  %v2151_v41 = vmul.f32 %v7675_v14, %v2129_v45 }
 0x189   : > { %v7916_v50 = vmul.f32 0.16666667, %v1489_v4  ;;  %6830 = vmatprep.subr.bf16.mxu1 %v7918_v22  ;;  %v7924_v20 = vld [vmem:[%s7343_s17 + $0x1] ss:$0 sm:$0xff]  ;;  %v2359_v12 = vmul.f32 %v7933_v48, %v1857_v60  ;;  %v7937_v26 = vmul.f32 %v7933_v48, %v1858_v54  ;;  %v7957_v62 = vld [vmem:[%s7343_s17 + $0x5] ss:$0 sm:$0xff]  ;;  %6844 = vmatprep.mubr.msk.bf16.mxu1 %vm7318_vm0, %v7918_v22 }
 0x18a   : > { %2225 = vst [vmem:[#allocation4 + $0x50] sm:$0xff] %v2207_v35  ;;  %v7914_v8 = vmul.f32 0.16666667, %v1491_v29  ;;  %v2306_v34 = vmul.f32 %v7924_v20, %v7826_v33  ;;  %v7928_v21 = vmul.f32 0.16666667, %v1494_v30  ;;  %v7106_v35 = vld [vmem:[%s7353_s25 + $0x10] sm:$0xff]   ;;  %6831 = vmatpush3.bf16.msra.mxu1 %v7105_v37 }
 0x18b   : > { %v1815_v46 = vld [vmem:[#allocation3 + $0x82] sm:$0xff]  ;;  %v1816_v32 = vld [vmem:[#allocation3 + $0x8a] sm:$0xff]  ;;  %1645 = vst [vmem:[#allocation3 + $0xab] sm:$0xff] %v7916_v50  ;;  %6832 = vmatprep.subr.bf16.mxu1 %v7918_v22 }
 0x18c   : > { %1649 = vst [vmem:[#allocation3 + $0xbd] sm:$0xff] %v7914_v8  ;;  %v7941_v33 = vadd.f32 %v2306_v34, %v2252_v55  ;;  %v1877_v57 = vmul.f32 %v7944_v13, %v1815_v46  ;;  %v1913_v5 = vld [vmem:[#allocation3 + $0x83] sm:$0xff]  ;;  %v1914_v53 = vld [vmem:[#allocation3 + $0x8b] sm:$0xff]  ;;  %1656 = vst [vmem:[#allocation3 + $0xd9] sm:$0xff] %v7928_v21  ;;  %v1878_v42 = vmul.f32 %v7944_v13, %v1816_v32  ;;  %v1396_v55 = vadd.f32 3.0, %v7887_v3 }
 0x18d   : > { %v1971_v39 = vld [vmem:[#allocation3 + $0x84] sm:$0xff]  ;;  %v1972_v7 = vld [vmem:[#allocation3 + $0x8c] sm:$0xff]  ;;  %v1935_v27 = vmul.f32 %v7952_v49, %v1913_v5  ;;  %v1936_v51 = vmul.f32 %v7952_v49, %v1914_v53 }
 0x18e   : > { %v1895_v60 = vadd.f32 %v1877_v57, %v7880_v10  ;;  %v2070_v54 = vld [vmem:[#allocation3 + $0x8d] sm:$0xff]  ;;  %v1896_v31 = vadd.f32 %v1878_v42, %v1854_v25  ;;  %v1993_v61 = vmul.f32 %v7957_v62, %v1971_v39  ;;  %v7961_v47 = vld [vmem:[%s7343_s17 + $0x6] ss:$0 sm:$0xff]  ;;  %v1994_v44 = vmul.f32 %v7957_v62, %v1972_v7  ;;  %v7966_v10 = vld [vmem:[%s7343_s17 + $0x7] ss:$0 sm:$0xff]  ;;  %6833 = vmatpush3.bf16.msra.mxu1 %v7106_v35 }
 0x18f   : > { %v2034_v9 = vmul.f32 %v7961_v47, %v1972_v7  ;;  %v2128_v0 = vld [vmem:[#allocation3 + $0x8e] sm:$0xff]  ;;  %v2092_v25 = vmul.f32 %v7966_v10, %v2070_v54  ;;  %6834 = vmatprep.subr.bf16.mxu1 %v7918_v22  ;;  %v1974_v45 = vld [vmem:[#allocation3 + $0x9c] sm:$0xff]  ;;  %v7975_v35 = vadd.f32 %v7883_v58, %v7713_v28  ;;  %v2377_v57 = vadd.f32 %v2359_v12, %v7890_v40 }
 0x190   : > { %v1953_v23 = vadd.f32 %v1935_v27, %v1895_v60  ;;  %v1954_v2 = vadd.f32 %v1936_v51, %v1896_v31  ;;  %v2150_v34 = vmul.f32 %v7675_v14, %v2128_v0  ;;  %v2072_v32 = vld [vmem:[#allocation3 + $0x9d] sm:$0xff]  ;;  %v2036_v53 = vmul.f32 %v7961_v47, %v1974_v45  ;;  %v7109_v54 = vld [vmem:[%s7353_s25 + $0x28] sm:$0xff]  }
 0x191   : > { %v2052_v29 = vadd.f32 %v2034_v9, %v2010_v19  ;;  %v7108_v19 = vld [vmem:[%s7353_s25 + $0x20] sm:$0xff]   ;;  %v7983_v7 = vadd.f32 %v7883_v58, %v7717_v15  ;;  %v2094_v40 = vmul.f32 %v7966_v10, %v2072_v32  ;;  %v1399_v51 = vadd.f32 3.0, %v7975_v35 }
 0x192   : > { %v2011_v4 = vadd.f32 %v1993_v61, %v1953_v23  ;;  %v2012_v30 = vadd.f32 %v1994_v44, %v1954_v2  ;;  %6835 = vmatpush3.bf16.msra.mxu1 %v7107_v43  ;;  %v2343_v39 = vld [vmem:[#allocation3 + $0xa2] sm:$0xff]  ;;  %v2378_v44 = vadd.f32 %v7937_v26, %v7941_v33  ;;  %v2597_v0 = vmul.f32 %v7966_v10, %v7896_v17  ;;  %v2344_v32 = vld [vmem:[#allocation3 + $0xaa] sm:$0xff] }
 0x193   : > { %v2110_v37 = vadd.f32 %v2092_v25, %v2052_v29  ;;  %6836 = vmatprep.subr.bf16.mxu1 %v7918_v22  ;;  %v2130_v14 = vld [vmem:[#allocation3 + $0x9e] sm:$0xff]  ;;  %v2397_v27 = vmul.f32 %v7944_v13, %v2343_v39  ;;  %v7991_v61 = vld [vmem:[%s7343_s17 + $0x8] ss:$0 sm:$0xff]  ;;  %v2016_v25 = vld [vmem:[#allocation3 + $0xac] sm:$0xff]  ;;  %v8004_v45 = vadd.f32 %v7883_v58, %v7744_v11  ;;  %v1397_v17 = vadd.f32 3.0, %v7983_v7 }
 0x194   : > { %v2053_v46 = vadd.f32 %v2035_v56, %v2011_v4  ;;  %v1428_v56 = vmax.f32 %v1396_v55, 0.0  ;;  %v2054_v60 = vadd.f32 %v2036_v53, %v2012_v30  ;;  %v2152_v15 = vmul.f32 %v7991_v61, %v2130_v14  ;;  %v8008_v55 = vld [vmem:[%s7348_s21] ss:$0 sm:$0xff]  ;;  %v2015_v33 = vld [vmem:[#allocation3 + $0xa4] sm:$0xff] }
 0x195   : > { %v2168_v5 = vadd.f32 %v2150_v34, %v2110_v37  ;;  %v2415_v23 = vadd.f32 %v2397_v27, %v2377_v57  ;;  %v1431_v30 = vmax.f32 %v1399_v51, 0.0  ;;  %v2598_v37 = vmul.f32 %v7966_v10, %v7914_v8  ;;  %v7111_v57 = vld [vmem:[%s7353_s25 + $0x38] sm:$0xff]  }
 0x196   : > { %v2111_v42 = vadd.f32 %v2093_v24, %v2053_v46  ;;  %6837 = vmatpush3.bf16.msra.mxu1 %v7108_v19  ;;  %v2112_v24 = vadd.f32 %v2094_v40, %v2054_v60  ;;  %v1460_v4 = vmin.f32 %v1428_v56, 6.0  ;;  %v8017_v11 = vadd.f32 %v7883_v58, %v7750_v16  ;;  %v2292_v53 = vld [vmem:[#allocation3 + $0xb9] sm:$0xff] }
 0x197   : > { %v2192_v28 = vadd.f32 %v7695_v52, %v2168_v5  ;;  %6838 = vmatprep.subr.bf16.mxu1 %v7918_v22  ;;  %v8021_v34 = vadd.f32 %v7883_v58, %v7763_v63  ;;  %v2238_v5 = vld [vmem:[#allocation3 + $0xb8] sm:$0xff]  ;;  %v2398_v8 = vmul.f32 %v7944_v13, %v2344_v32  ;;  %v2452_v63 = vmul.f32 %v7952_v49, %v7916_v50 }
 0x198   : > { %v2169_v12 = vadd.f32 %v2151_v41, %v2111_v42  ;;  %v2451_v41 = vmul.f32 %v7952_v49, %v7902_v1  ;;  %v2170_v43 = vadd.f32 %v2152_v15, %v2112_v24  ;;  %v2489_v1 = vld [vmem:[#allocation3 + $0xb4] sm:$0xff]  ;;  %v2490_v16 = vld [vmem:[#allocation3 + $0xbc] sm:$0xff]  ;;  %v2505_v14 = vmul.f32 %v7957_v62, %v2015_v33 }
 0x199   : > { %v2210_v31 = vmax.f32 %v2192_v28, 0.0  ;;  %v2543_v19 = vmul.f32 %v7961_v47, %v2489_v1  ;;  %v2346_v39 = vld [vmem:[#allocation3 + $0xba] sm:$0xff]  ;;  %v2416_v42 = vadd.f32 %v2398_v8, %v2378_v44  ;;  %v2256_v56 = vmul.f32 %v7908_v59, %v2238_v5  ;;  %v2345_v60 = vld [vmem:[#allocation3 + $0xb2] sm:$0xff] }
 0x19a   : > { %v2193_v9 = vadd.f32 %v7695_v52, %v2169_v12  ;;  %v2469_v29 = vadd.f32 %v2451_v41, %v2415_v23  ;;  %6839 = vmatpush3.bf16.msra.mxu1 %v7109_v54  ;;  %v7110_v52 = vld [vmem:[%s7353_s25 + $0x30] sm:$0xff]   ;;  %v2194_v26 = vadd.f32 %v8008_v55, %v2170_v43  ;;  %v2310_v28 = vmul.f32 %v7924_v20, %v2292_v53  ;;  %v2242_v33 = vld [vmem:[#allocation3 + $0xd8] sm:$0xff] }
 0x19b   : > { %2228 = vst [vmem:[#allocation4 + $0x68] sm:$0xff] %v2210_v31  ;;  %6840 = vmatprep.subr.bf16.mxu1 %v7918_v22  ;;  %v2470_v40 = vadd.f32 %v2452_v63, %v2416_v42  ;;  %v2506_v12 = vmul.f32 %v7957_v62, %v2016_v25  ;;  %v2544_v51 = vmul.f32 %v7961_v47, %v2490_v16  ;;  %v2237_v54 = vld [vmem:[#allocation3 + $0xb0] sm:$0xff]  ;;  %v1402_v1 = vadd.f32 3.0, %v8004_v45 }
 0x19c   : > { %v2211_v2 = vmax.f32 %v2193_v9, 0.0  ;;  %v2212_v46 = vmax.f32 %v2194_v26, 0.0  ;;  %v2523_v27 = vadd.f32 %v2505_v14, %v2469_v29  ;;  %v2291_v50 = vld [vmem:[#allocation3 + $0xb1] sm:$0xff]  ;;  %v1492_v15 = vmul.f32 %v1460_v4, %v7887_v3 }
 0x19d   : > { %v2524_v31 = vadd.f32 %v2506_v12, %v2470_v40  ;;  %v1463_v9 = vmin.f32 %v1431_v30, 6.0  ;;  %v2255_v44 = vmul.f32 %v7908_v59, %v2237_v54  ;;  %v2309_v25 = vmul.f32 %v7924_v20, %v2291_v50  ;;  %v2633_v4 = vld [vmem:[#allocation3 + $0xb6] sm:$0xff] }
 0x19e   : > { %2229 = vst [vmem:[#allocation4 + $0x70] sm:$0xff] %v2211_v2  ;;  %6841 = vmatpush3.bf16.msra.mxu1 %v7110_v52  ;;  %2230 = vst [vmem:[#allocation4 + $0x78] sm:$0xff] %v2212_v46  ;;  %v2561_v24 = vadd.f32 %v2543_v19, %v2523_v27  ;;  %v1524_v43 = vmul.f32 0.16666667, %v1492_v15  ;;  %v1429_v52 = vmax.f32 %v1397_v17, 0.0  ;;  %v2328_v26 = vadd.f32 %v2310_v28, %v2256_v56  ;;  %v2634_v19 = vld [vmem:[#allocation3 + $0xbe] sm:$0xff] }
 0x19f   : > { %6842 = vmatprep.subr.bf16.mxu1 %v7918_v22  ;;  %v2562_v23 = vadd.f32 %v2544_v51, %v2524_v31  ;;  %v1495_v2 = vmul.f32 %v1463_v9, %v7975_v35  ;;  %v1400_v3 = vadd.f32 3.0, %v8017_v11  ;;  %v1434_v30 = vmax.f32 %v1402_v1, 0.0 }
 0x1a0   : > { %v2615_v41 = vadd.f32 %v2597_v0, %v2561_v24  ;;  %1652 = vst [vmem:[#allocation3 + $0xc7] sm:$0xff] %v1524_v43  ;;  %v1461_v32 = vmin.f32 %v1429_v52, 6.0  ;;  %v2364_v0 = vmul.f32 %v7933_v48, %v2346_v39  ;;  %v1403_v17 = vadd.f32 3.0, %v8021_v34 }
 0x1a1   : > { %v2616_v29 = vadd.f32 %v2598_v37, %v2562_v23  ;;  %v1527_v46 = vmul.f32 0.16666667, %v1495_v2  ;;  %v2327_v37 = vadd.f32 %v2309_v25, %v2255_v44  ;;  %v1466_v5 = vmin.f32 %v1434_v30, 6.0  ;;  %v8950_v2 = vld [vmem:[#allocation33_spill] sm:$0xff] }
 0x1a2   : > { %6843 = vmatpush3.bf16.msra.mxu1 %v7111_v57  ;;  %v1493_v35 = vmul.f32 %v1461_v32, %v7983_v7  ;;  %v2260_v57 = vmul.f32 %v7908_v59, %v2242_v33  ;;  %v2382_v53 = vadd.f32 %v2364_v0, %v2328_v26  ;;  %v2651_v8 = vmul.f32 %v7991_v61, %v2633_v4 }
 0x1a3   : > { %6848 = vmatprep.subr.bf16.mxu1 %v7918_v22  ;;  %1657 = vst [vmem:[#allocation3 + $0xe1] sm:$0xff] %v1527_v46  ;;  %v1432_v42 = vmax.f32 %v1400_v3, 0.0  ;;  %v2363_v63 = vmul.f32 %v7933_v48, %v2345_v60  ;;  %v2314_v39 = vmul.f32 %v7924_v20, %v7928_v21  ;;  %v1498_v14 = vmul.f32 %v1466_v5, %v8004_v45 }
 0x1a4   : > { %v1525_v16 = vmul.f32 0.16666667, %v1493_v35  ;;  %v2652_v7 = vmul.f32 %v7991_v61, %v2634_v19  ;;  %v2669_v56 = vadd.f32 %v2651_v8, %v2615_v41  ;;  %v1435_v28 = vmax.f32 %v1403_v17, 0.0 }
 0x1a5   : > { %v8053_v40 = vadd.f32 %v7883_v58, %v7771_v36  ;;  %v2381_v12 = vadd.f32 %v2363_v63, %v2327_v37  ;;  %v2332_v27 = vadd.f32 %v2314_v39, %v2260_v57  ;;  %v8055_v60 = vmul.f32 0.16666667, %v1498_v14 }
 0x1a6   : > { %1653 = vst [vmem:[#allocation3 + $0xcf] sm:$0xff] %v1525_v16  ;;  %v2670_v24 = vadd.f32 %v2652_v7, %v2616_v29  ;;  %v1464_v50 = vmin.f32 %v1432_v42, 6.0  ;;  %v8060_v15 = vadd.f32 %v7883_v58, %v7781_v38  ;;  %v8066_v23 = vadd.f32 %v8008_v55, %v2669_v56 }
 0x1a7   : > { %v2239_v51 = vld [vmem:[#allocation3 + $0xc0] sm:$0xff]  ;;  %1664 = vst [vmem:[#allocation3 + $0xfd] sm:$0xff] %v8055_v60  ;;  %v1467_v44 = vmin.f32 %v1435_v28, 6.0  ;;  %v1401_v43 = vadd.f32 3.0, %v8053_v40  ;;  %v8071_v52 = vadd.f32 %v7883_v58, %v8950_v2  ;;  %v2315_v29 = vmul.f32 %v7924_v20, %v1527_v46 }
 0x1a8   : > { %v2293_v54 = vld [vmem:[#allocation3 + $0xc1] sm:$0xff]  ;;  %v2257_v9 = vmul.f32 %v7908_v59, %v2239_v51  ;;  %v8075_v1 = vadd.f32 %v8008_v55, %v2670_v24  ;;  %v1496_v26 = vmul.f32 %v1464_v50, %v8017_v11  ;;  %v1406_v33 = vadd.f32 3.0, %v8060_v15 }
 0x1a9   : > { %v2347_v31 = vld [vmem:[#allocation3 + $0xc2] sm:$0xff]  ;;  %v2311_v36 = vmul.f32 %v7924_v20, %v2293_v54  ;;  %v8081_v32 = vadd.f32 %v7883_v58, %v7787_v18  ;;  %v1499_v46 = vmul.f32 %v1467_v44, %v8021_v34  ;;  %v1433_v19 = vmax.f32 %v1401_v43, 0.0 }
 0x1aa   : > { %v2401_v21 = vmul.f32 %v7944_v13, %v2347_v31  ;;  %v2491_v45 = vld [vmem:[#allocation3 + $0xc4] sm:$0xff]  ;;  %v2350_v4 = vld [vmem:[#allocation3 + $0xda] sm:$0xff]  ;;  %v8087_v37 = vadd.f32 3.0, %v8071_v52  ;;  %v2365_v11 = vmul.f32 %v7933_v48, %v2347_v31  ;;  %v8092_v18 = vadd.f32 %v7883_v58, %v7796_v6 }
 0x1ab   : > { %v2437_v41 = vld [vmem:[#allocation3 + $0xc3] sm:$0xff]  ;;  %v2329_v3 = vadd.f32 %v2311_v36, %v2257_v9  ;;  %v2509_v5 = vmul.f32 %v7957_v62, %v2491_v45  ;;  %v2368_v8 = vmul.f32 %v7933_v48, %v2350_v4  ;;  %v1438_v63 = vmax.f32 %v1406_v33, 0.0 }
 0x1ac   : > { %v2419_v25 = vadd.f32 %v2401_v21, %v2381_v12  ;;  %v2243_v38 = vld [vmem:[#allocation3 + $0xe0] sm:$0xff]  ;;  %v2455_v0 = vmul.f32 %v7952_v49, %v2437_v41  ;;  %v1465_v4 = vmin.f32 %v1433_v19, 6.0  ;;  %v1436_v19 = vmax.f32 %v8087_v37, 0.0 }
 0x1ad   : > { %v2351_v30 = vld [vmem:[#allocation3 + $0xe2] sm:$0xff]  ;;  %v2261_v35 = vmul.f32 %v7908_v59, %v2243_v38  ;;  %v2348_v17 = vld [vmem:[#allocation3 + $0xca] sm:$0xff]  ;;  %v2383_v34 = vadd.f32 %v2365_v11, %v2329_v3  ;;  %v2493_v56 = vld [vmem:[#allocation3 + $0xd4] sm:$0xff]  ;;  %v8099_v58 = vadd.f32 %v2368_v8, %v2332_v27  ;;  %v1528_v38 = vmul.f32 0.16666667, %v1496_v26 }
 0x1ae   : > { %v2473_v57 = vadd.f32 %v2455_v0, %v2419_v25  ;;  %v2369_v16 = vmul.f32 %v7933_v48, %v2351_v30  ;;  %v2438_v42 = vld [vmem:[#allocation3 + $0xcb] sm:$0xff]  ;;  %v2402_v39 = vmul.f32 %v7944_v13, %v2348_v17  ;;  %v2494_v12 = vld [vmem:[#allocation3 + $0xdc] sm:$0xff]  ;;  %v2547_v21 = vmul.f32 %v7961_v47, %v2493_v56  ;;  %v2439_v44 = vld [vmem:[#allocation3 + $0xd3] sm:$0xff] }
 0x1af   : > { %v2492_v14 = vld [vmem:[#allocation3 + $0xcc] sm:$0xff]  ;;  %v2333_v7 = vadd.f32 %v2315_v29, %v2261_v35  ;;  %v2456_v6 = vmul.f32 %v7952_v49, %v2438_v42  ;;  %v2583_v31 = vld [vmem:[#allocation3 + $0xd5] sm:$0xff]  ;;  %v2548_v45 = vmul.f32 %v7961_v47, %v2494_v12  ;;  %v2584_v43 = vld [vmem:[#allocation3 + $0xdd] sm:$0xff]  ;;  %v1531_v29 = vmul.f32 0.16666667, %v1499_v46  ;;  %1660 = vst [vmem:[#allocation3 + $0xeb] sm:$0xff] %v1528_v38 }
 0x1b0   : > { %v2527_v28 = vadd.f32 %v2509_v5, %v2473_v57  ;;  %v2420_v51 = vadd.f32 %v2402_v39, %v2382_v53  ;;  %v2349_v54 = vld [vmem:[#allocation3 + $0xd2] sm:$0xff]  ;;  %v2510_v48 = vmul.f32 %v7957_v62, %v2492_v14  ;;  %v2601_v53 = vmul.f32 %v7966_v10, %v2583_v31  ;;  %v2638_v5 = vld [vmem:[#allocation3 + $0xde] sm:$0xff] }
 0x1b1   : > { %v2637_v50 = vld [vmem:[#allocation3 + $0xd6] sm:$0xff]  ;;  %v2403_v9 = vmul.f32 %v7944_v13, %v2349_v54  ;;  %v2457_v33 = vmul.f32 %v7952_v49, %v2439_v44  ;;  %v2602_v30 = vmul.f32 %v7966_v10, %v2584_v43  ;;  %1665 = vst [vmem:[#allocation3 + $0x105] sm:$0xff] %v1531_v29  ;;  %v1470_v35 = vmin.f32 %v1438_v63, 6.0 }
 0x1b2   : > { %v2474_v24 = vadd.f32 %v2456_v6, %v2420_v51  ;;  %v2565_v41 = vadd.f32 %v2547_v21, %v2527_v28  ;;  %v2655_v25 = vmul.f32 %v7991_v61, %v2637_v50  ;;  %v1497_v57 = vmul.f32 %v1465_v4, %v8053_v40 }
 0x1b3   : > { %v2421_v27 = vadd.f32 %v2403_v9, %v2383_v34  ;;  %v2511_v8 = vmul.f32 %v7957_v62, %v2493_v56  ;;  %v1502_v26 = vmul.f32 %v1470_v35, %v8060_v15  ;;  %v2498_v34 = vld [vmem:[#allocation3 + $0xfc] sm:$0xff]  ;;  %v2387_v14 = vadd.f32 %v2369_v16, %v2333_v7 }
 0x1b4   : > { %v2528_v36 = vadd.f32 %v2510_v48, %v2474_v24  ;;  %v2619_v2 = vadd.f32 %v2601_v53, %v2565_v41  ;;  %v1529_v39 = vmul.f32 0.16666667, %v1497_v57  ;;  %v1407_v63 = vadd.f32 3.0, %v8081_v32 }
 0x1b5   : > { %v2475_v17 = vadd.f32 %v2457_v33, %v2421_v27  ;;  %v1534_v28 = vmul.f32 0.16666667, %v1502_v26  ;;  %v2656_v12 = vmul.f32 %v7991_v61, %v2638_v5  ;;  %v1405_v40 = vadd.f32 3.0, %v8092_v18 }
 0x1b6   : > { %v2566_v3 = vadd.f32 %v2548_v45, %v2528_v36  ;;  %v2673_v0 = vadd.f32 %v2655_v25, %v2619_v2  ;;  %1661 = vst [vmem:[#allocation3 + $0xf3] sm:$0xff] %v1529_v39  ;;  %v2552_v56 = vmul.f32 %v7961_v47, %v2498_v34  ;;  %v2352_v6 = vld [vmem:[#allocation3 + $0xea] sm:$0xff]  ;;  %v1468_v54 = vmin.f32 %v1436_v19, 6.0 }
 0x1b7   : > { %v2529_v51 = vadd.f32 %v2511_v8, %v2475_v17  ;;  %1672 = vst [vmem:[#allocation3 + $0x121] sm:$0xff] %v1534_v28  ;;  %v2705_v37 = vmax.f32 %v8066_v23, 0.0  ;;  %v2706_v16 = vmax.f32 %v8075_v1, 0.0  ;;  %v2406_v7 = vmul.f32 %v7944_v13, %v2352_v6  ;;  %v2495_v31 = vld [vmem:[#allocation3 + $0xe4] sm:$0xff] }
 0x1b8   : > { %v2691_v11 = vadd.f32 %v8008_v55, %v2673_v0  ;;  %v2620_v46 = vadd.f32 %v2602_v30, %v2566_v3  ;;  %v2585_v24 = vld [vmem:[#allocation3 + $0xe5] sm:$0xff]  ;;  %v1439_v48 = vmax.f32 %v1407_v63, 0.0  ;;  %v2606_v21 = vmul.f32 %v7966_v10, %v8055_v60 }
 0x1b9   : > { %v2549_v45 = vmul.f32 %v7961_v47, %v2495_v31  ;;  %v1437_v50 = vmax.f32 %v1405_v40, 0.0  ;;  %2723 = vst [vmem:[#allocation4 + $0x90] sm:$0xff] %v2705_v37  ;;  %2724 = vst [vmem:[#allocation4 + $0x98] sm:$0xff] %v2706_v16  ;;  %v2424_v9 = vadd.f32 %v2406_v7, %v8099_v58  ;;  %v2460_v22 = vmul.f32 %v7952_v49, %v1528_v38  ;;  %v2639_v23 = vld [vmem:[#allocation3 + $0xe6] sm:$0xff]  ;;  %v2642_v0 = vld [vmem:[#allocation3 + $0xfe] sm:$0xff] }
 0x1ba   : > { %v2709_v42 = vmax.f32 %v2691_v11, 0.0  ;;  %v2674_v15 = vadd.f32 %v2656_v12, %v2620_v46  ;;  %v2607_v1 = vmul.f32 %v7966_v10, %v1531_v29  ;;  %v2603_v41 = vmul.f32 %v7966_v10, %v2585_v24  ;;  %v2247_v53 = vld [vmem:[#allocation3 + $0x100] sm:$0xff] }
 0x1bb   : > { %v2567_v36 = vadd.f32 %v2549_v45, %v2529_v51  ;;  %v2301_v44 = vld [vmem:[#allocation3 + $0x101] sm:$0xff]  ;;  %v2461_v43 = vmul.f32 %v7952_v49, %v1529_v39  ;;  %v1500_v60 = vmul.f32 %v1468_v54, %v8071_v52  ;;  %v2478_v27 = vadd.f32 %v2460_v22, %v2424_v9 }
 0x1bc   : > { %2727 = vst [vmem:[#allocation4 + $0xb0] sm:$0xff] %v2709_v42  ;;  %v2355_v2 = vld [vmem:[#allocation3 + $0x102] sm:$0xff]  ;;  %v1471_v25 = vmin.f32 %v1439_v48, 6.0  ;;  %v2692_v33 = vadd.f32 %v8008_v55, %v2674_v15  ;;  %v2657_v38 = vmul.f32 %v7991_v61, %v2639_v23  ;;  %v1469_v4 = vmin.f32 %v1437_v50, 6.0 }
 0x1bd   : > { %v2621_v58 = vadd.f32 %v2603_v41, %v2567_v36  ;;  %v2499_v3 = vld [vmem:[#allocation3 + $0x104] sm:$0xff]  ;;  %v2353_v29 = vld [vmem:[#allocation3 + $0xf2] sm:$0xff]  ;;  %v2265_v10 = vmul.f32 %v7908_v59, %v2247_v53  ;;  %v2319_v30 = vmul.f32 %v7924_v20, %v2301_v44  ;;  %v2354_v57 = vld [vmem:[#allocation3 + $0xfa] sm:$0xff]  ;;  %v2660_v42 = vmul.f32 %v7991_v61, %v2642_v0 }
 0x1be   : > { %v2643_v35 = vld [vmem:[#allocation3 + $0x106] sm:$0xff]  ;;  %v2246_v49 = vld [vmem:[#allocation3 + $0xf8] sm:$0xff]  ;;  %v2553_v11 = vmul.f32 %v7961_v47, %v2499_v3  ;;  %v2407_v5 = vmul.f32 %v7944_v13, %v2353_v29  ;;  %v1532_v6 = vmul.f32 0.16666667, %v1500_v60  ;;  %v1503_v16 = vmul.f32 %v1471_v25, %v8081_v32  ;;  %v7265_v41 = vld [vmem:[%s7343_s17] ss:$0 sm:$0xff] }
 0x1bf   : > { %v2496_v17 = vld [vmem:[#allocation3 + $0xec] sm:$0xff]  ;;  %v2675_v52 = vadd.f32 %v2657_v38, %v2621_v58  ;;  %v2497_v8 = vld [vmem:[#allocation3 + $0xf4] sm:$0xff]  ;;  %v2661_v34 = vmul.f32 %v7991_v61, %v2643_v35  ;;  %v2264_v39 = vmul.f32 %v7908_v59, %v2246_v49  ;;  %v1501_v61 = vmul.f32 %v1469_v4, %v8092_v18  ;;  %v7266_v44 = vld [vmem:[%s7343_s17 + $0x1] ss:$0 sm:$0xff] }
 0x1c0   : > { %v2514_v26 = vmul.f32 %v7957_v62, %v2496_v17  ;;  %v2425_v19 = vadd.f32 %v2407_v5, %v2387_v14  ;;  %v2515_v47 = vmul.f32 %v7957_v62, %v2497_v8  ;;  %v2300_v13 = vld [vmem:[#allocation3 + $0xf9] sm:$0xff]  ;;  %1668 = vst [vmem:[#allocation3 + $0x10f] sm:$0xff] %v1532_v6  ;;  %v2710_v14 = vmax.f32 %v2692_v33, 0.0  ;;  %v7267_v60 = vld [vmem:[%s7343_s17 + $0x3] ss:$0 sm:$0xff] }
 0x1c1   : > { %v2693_v46 = vadd.f32 %v8008_v55, %v2675_v52  ;;  %v2318_v59 = vmul.f32 %v7924_v20, %v2300_v13  ;;  %v1535_v31 = vmul.f32 0.16666667, %v1503_v16  ;;  %v1533_v62 = vmul.f32 0.16666667, %v1501_v61  ;;  %v7268_v38 = vld [vmem:[%s7343_s17 + $0x4] ss:$0 sm:$0xff] }
 0x1c2   : > { %v2532_v28 = vadd.f32 %v2514_v26, %v2478_v27  ;;  %v2479_v12 = vadd.f32 %v2461_v43, %v2425_v19  ;;  %2728 = vst [vmem:[#allocation4 + $0xb8] sm:$0xff] %v2710_v14  ;;  %v2337_v18 = vadd.f32 %v2319_v30, %v2265_v10  ;;  %v7269_v29 = vld [vmem:[%s7343_s17 + $0x5] ss:$0 sm:$0xff]  ;;  %v7270_v10 = vld [vmem:[%s7343_s17 + $0x7] ss:$0 sm:$0xff] }
 0x1c3   : > { %v2711_v63 = vmax.f32 %v2693_v46, 0.0  ;;  %1673 = vst [vmem:[#allocation3 + $0x129] sm:$0xff] %v1535_v31  ;;  %1669 = vst [vmem:[#allocation3 + $0x117] sm:$0xff] %v1533_v62  ;;  %v2336_v32 = vadd.f32 %v2318_v59, %v2264_v39  ;;  %v7271_v52 = vld [vmem:[%s7343_s17 + $0x6] ss:$0 sm:$0xff] }
 0x1c4   : > { %v2570_v51 = vadd.f32 %v2552_v56, %v2532_v28  ;;  %v2533_v40 = vadd.f32 %v2515_v47, %v2479_v12 }
 0x1c5   : > { %2729 = vst [vmem:[#allocation4 + $0xc0] sm:$0xff] %v2711_v63 }
 0x1c6   : > { %v2624_v15 = vadd.f32 %v2606_v21, %v2570_v51  ;;  %v2571_v54 = vadd.f32 %v2553_v11, %v2533_v40  ;;  %v7264_v21 = vld [vmem:[%s7343_s17 + $0x2] ss:$0 sm:$0xff] }
 0x1c7   : > { %v2372_v45 = vmul.f32 %v7264_v21, %v2354_v57  ;;  %v2373_v50 = vmul.f32 %v7264_v21, %v2355_v2  ;;  %v2248_v9 = vld [vmem:[#allocation3 + $0x108] sm:$0xff] }
 0x1c8   : > { %v2678_v37 = vadd.f32 %v2660_v42, %v2624_v15  ;;  %v2625_v7 = vadd.f32 %v2607_v1, %v2571_v54  ;;  %v2302_v22 = vld [vmem:[#allocation3 + $0x109] sm:$0xff]  ;;  %v2266_v53 = vmul.f32 %v7265_v41, %v2248_v9  ;;  %v7273_v41 = vld [vmem:[%s7348_s21] ss:$0 sm:$0xff] }
 0x1c9   : > { %v2356_v23 = vld [vmem:[#allocation3 + $0x10a] sm:$0xff]  ;;  %v2390_v36 = vadd.f32 %v2372_v45, %v2336_v32  ;;  %v2320_v43 = vmul.f32 %v7266_v44, %v2302_v22  ;;  %v2391_v33 = vadd.f32 %v2373_v50, %v2337_v18 }
 0x1ca   : > { %v2696_v56 = vadd.f32 %v8008_v55, %v2678_v37  ;;  %v2679_v24 = vadd.f32 %v2661_v34, %v2625_v7  ;;  %v2410_v27 = vmul.f32 %v7267_v60, %v2356_v23  ;;  %v2446_v25 = vld [vmem:[#allocation3 + $0x10b] sm:$0xff]  ;;  %v2374_v0 = vmul.f32 %v7264_v21, %v2356_v23  ;;  %v2358_v26 = vld [vmem:[#allocation3 + $0x11a] sm:$0xff] }
 0x1cb   : > { %v2338_v2 = vadd.f32 %v2320_v43, %v2266_v53  ;;  %v2464_v3 = vmul.f32 %v7268_v38, %v2446_v25  ;;  %v2503_v30 = vld [vmem:[#allocation3 + $0x124] sm:$0xff]  ;;  %v2504_v35 = vld [vmem:[#allocation3 + $0x12c] sm:$0xff]  ;;  %v2448_v42 = vld [vmem:[#allocation3 + $0x11b] sm:$0xff]  ;;  %v2412_v28 = vmul.f32 %v7267_v60, %v2358_v26 }
 0x1cc   : > { %v2714_v48 = vmax.f32 %v2696_v56, 0.0  ;;  %v2697_v20 = vadd.f32 %v8008_v55, %v2679_v24  ;;  %v2500_v55 = vld [vmem:[#allocation3 + $0x10c] sm:$0xff]  ;;  %v2428_v58 = vadd.f32 %v2410_v27, %v2390_v36  ;;  %v2557_v11 = vmul.f32 %v7271_v52, %v2503_v30  ;;  %v2501_v34 = vld [vmem:[#allocation3 + $0x114] sm:$0xff]  ;;  %v2502_v39 = vld [vmem:[#allocation3 + $0x11c] sm:$0xff] }
 0x1cd   : > { %v2518_v4 = vmul.f32 %v7269_v29, %v2500_v55  ;;  %v2392_v17 = vadd.f32 %v2374_v0, %v2338_v2  ;;  %v2558_v57 = vmul.f32 %v7271_v52, %v2504_v35  ;;  %v2357_v5 = vld [vmem:[#allocation3 + $0x112] sm:$0xff]  ;;  %v2466_v12 = vmul.f32 %v7268_v38, %v2448_v42  ;;  %v2592_v51 = vld [vmem:[#allocation3 + $0x11d] sm:$0xff]  ;;  %v2593_v59 = vld [vmem:[#allocation3 + $0x125] sm:$0xff] }
 0x1ce   : > { %2732 = vst [vmem:[#allocation4 + $0xd8] sm:$0xff] %v2714_v48  ;;  %v2715_v1 = vmax.f32 %v2697_v20, 0.0  ;;  %v2482_v49 = vadd.f32 %v2464_v3, %v2428_v58  ;;  %v2447_v46 = vld [vmem:[#allocation3 + $0x113] sm:$0xff]  ;;  %v2411_v19 = vmul.f32 %v7267_v60, %v2357_v5  ;;  %v2519_v47 = vmul.f32 %v7269_v29, %v2501_v34  ;;  %v2646_v54 = vld [vmem:[#allocation3 + $0x11e] sm:$0xff]  ;;  %v7272_v56 = vld [vmem:[%s7343_s17 + $0x8] ss:$0 sm:$0xff] }
 0x1cf   : > { %v2465_v63 = vmul.f32 %v7268_v38, %v2447_v46  ;;  %v2430_v40 = vadd.f32 %v2412_v28, %v2392_v17  ;;  %v2520_v15 = vmul.f32 %v7269_v29, %v2502_v39  ;;  %v2556_v6 = vmul.f32 %v7271_v52, %v2502_v39  ;;  %v2594_v14 = vld [vmem:[#allocation3 + $0x12d] sm:$0xff]  ;;  %v8173_v30 = vld [vmem:[#allocation4 + $0xb4] ss:$2 sm:$0xff] }
 0x1d0   : > { %2733 = vst [vmem:[#allocation4 + $0xe0] sm:$0xff] %v2715_v1  ;;  %v2536_v8 = vadd.f32 %v2518_v4, %v2482_v49  ;;  %v2429_v13 = vadd.f32 %v2411_v19, %v2391_v33  ;;  %v2610_v61 = vmul.f32 %v7270_v10, %v2592_v51  ;;  %v2664_v24 = vmul.f32 %v7272_v56, %v2646_v54  ;;  %v2647_v48 = vld [vmem:[#allocation3 + $0x126] sm:$0xff]  ;;  %v2648_v32 = vld [vmem:[#allocation3 + $0x12e] sm:$0xff]  ;;  %v7115_v51 = vld [vmem:[%s7363_s3 + $0x18] sm:$0xff]  }
 0x1d1   : > { %v2484_v16 = vadd.f32 %v2466_v12, %v2430_v40  ;;  %v2611_v20 = vmul.f32 %v7270_v10, %v2593_v59  ;;  %v2612_v21 = vmul.f32 %v7270_v10, %v2594_v14  ;;  %v2665_v22 = vmul.f32 %v7272_v56, %v2647_v48  ;;  %v8159_v44 = vld [vmem:[#allocation4 + $0x24] ss:$2 sm:$0xff]  ;;  %v7112_v19 = vld [vmem:[%s7363_s3] sm:$0xff]  }
 0x1d2   : > { %v2483_v37 = vadd.f32 %v2465_v63, %v2429_v13  ;;  %v2574_v7 = vadd.f32 %v2556_v6, %v2536_v8  ;;  %v2666_v23 = vmul.f32 %v7272_v56, %v2648_v32  ;;  %v8161_v25 = vld [vmem:[#allocation4] ss:$2 sm:$0xff]  ;;  %v8170_v4 = vld [vmem:[#allocation4 + $0x90] ss:$2 sm:$0xff] }
 0x1d3   : > { %v2538_v62 = vadd.f32 %v2520_v15, %v2484_v16  ;;  %v8163_v55 = vld [vmem:[#allocation4 + $0x48] ss:$2 sm:$0xff]  ;;  %v2772_v58 = vadd.f32 %v8159_v44, %v8161_v25  ;;  %v7113_v63 = vld [vmem:[%s7363_s3 + $0x8] sm:$0xff]   ;;  %v8185_v12 = vld [vmem:[#allocation3] sm:$0xff] }
 0x1d4   : > { %v2537_v31 = vadd.f32 %v2519_v47, %v2483_v37  ;;  %v2628_v18 = vadd.f32 %v2610_v61, %v2574_v7  ;;  %v8167_v38 = vld [vmem:[#allocation4 + $0x6c] ss:$2 sm:$0xff]  ;;  %v7117_v40 = vld [vmem:[%s7363_s3 + $0x28] sm:$0xff]  }
 0x1d5   : > { %v2576_v50 = vadd.f32 %v2558_v57, %v2538_v62  ;;  %v2773_v29 = vadd.f32 %v2772_v58, %v8163_v55  ;;  %v7114_v47 = vld [vmem:[%s7363_s3 + $0x10] sm:$0xff]   ;;  %v7116_v13 = vld [vmem:[%s7363_s3 + $0x20] sm:$0xff]   ;;  %v7119_v6 = vld [vmem:[%s7363_s3 + $0x38] sm:$0xff]  }
 0x1d6   : > { %v2575_v45 = vadd.f32 %v2557_v11, %v2537_v31  ;;  %v2682_v9 = vadd.f32 %v2664_v24, %v2628_v18  ;;  %v7118_v15 = vld [vmem:[%s7363_s3 + $0x30] sm:$0xff]   ;;  %v7120_v54 = vld [vmem:[%s7373_s14] sm:$0xff]   ;;  %v7121_v37 = vld [vmem:[%s7373_s14 + $0x8] sm:$0xff]  }
 0x1d7   : > { %v2630_v36 = vadd.f32 %v2612_v21, %v2576_v50  ;;  %v2774_v10 = vadd.f32 %v2773_v29, %v8167_v38  ;;  %v8176_v49 = vld [vmem:[#allocation4 + $0xd8] ss:$2 sm:$0xff]  ;;  %6868 = vmatprep.subr.bf16.mxu0 %v7120_v54  ;;  %v7122_v16 = vld [vmem:[%s7373_s14 + $0x10] sm:$0xff]   ;;  %v7123_v61 = vld [vmem:[%s7373_s14 + $0x18] sm:$0xff]  }
 0x1d8   : > { %v2629_v1 = vadd.f32 %v2611_v20, %v2575_v45  ;;  %v2700_v53 = vadd.f32 %v7273_v41, %v2682_v9  ;;  %6869 = vmatpush3.bf16.msra.mxu0 %v7120_v54  ;;  %v7124_v59 = vld [vmem:[%s7373_s14 + $0x20] sm:$0xff]   ;;  %v7125_v14 = vld [vmem:[%s7373_s14 + $0x28] sm:$0xff]   ;;  %v7126_v20 = vld [vmem:[%s7373_s14 + $0x30] sm:$0xff]  }
 0x1d9   : > { %v2684_v60 = vadd.f32 %v2666_v23, %v2630_v36  ;;  %v2775_v35 = vadd.f32 %v2774_v10, %v8170_v4  ;;  %6870 = vmatprep.subr.bf16.mxu0 %v7121_v37  ;;  %v2803_v7 = vld [vmem:[%s7358_s29] sm:$0x1]  ;;  %v7127_v21 = vld [vmem:[%s7373_s14 + $0x38] sm:$0xff]   ;;  %v7129_v50 = vld [vmem:[%s7383_s24 + $0x8] sm:$0xff]  }
 0x1da   : > { %v2683_v43 = vadd.f32 %v2665_v22, %v2629_v1  ;;  %v2718_v27 = vmax.f32 %v2700_v53, 0.0  ;;  %v7128_v45 = vld [vmem:[%s7383_s24] sm:$0xff]   ;;  %v7130_v9 = vld [vmem:[%s7383_s24 + $0x10] sm:$0xff]   ;;  %v7131_v22 = vld [vmem:[%s7383_s24 + $0x18] sm:$0xff]  }
 0x1db   : > { %v2702_v2 = vadd.f32 %v7273_v41, %v2684_v60  ;;  %v2776_v17 = vadd.f32 %v2775_v35, %v8173_v30  ;;  %v7132_v23 = vld [vmem:[%s7383_s24 + $0x20] sm:$0xff]   ;;  %v7133_v1 = vld [vmem:[%s7383_s24 + $0x28] sm:$0xff]  }
 0x1dc   : > { %v2701_v33 = vadd.f32 %v7273_v41, %v2683_v43  ;;  %2736 = vst [vmem:[#allocation4 + $0xf8] sm:$0xff] %v2718_v27  ;;  %6871 = vmatpush3.bf16.msra.mxu0 %v7121_v37  ;;  %v2910_v36 = vld [vmem:[%s7368_s8] sm:$0x1]  ;;  %v3003_v41 = vlaneseq }
 0x1dd   : > { %v2720_v0 = vmax.f32 %v2702_v2, 0.0  ;;  %v2777_v52 = vadd.f32 %v2776_v17, %v8176_v49  ;;  %6872 = vmatprep.subr.bf16.mxu0 %v7122_v16 }
 0x1de   : > { %v2719_v3 = vmax.f32 %v2701_v33, 0.0  ;;  %v8219_v2 = vshrl.u32 %v3003_v41, 7 }
 0x1df   : > { %2738 = vst [vmem:[#allocation4 + $0x108] sm:$0xff] %v2720_v0 }
 0x1e0   : > { %2737 = vst [vmem:[#allocation4 + $0x100] sm:$0xff] %v2719_v3  ;;  %6873 = vmatpush3.bf16.msra.mxu0 %v7122_v16  ;;  %v8222_v29 = vsub.s32 0, %v8219_v2 }
 0x1e1   : > { %6874 = vmatprep.subr.bf16.mxu0 %v7123_v61 }
 0x1e4   : > { %6875 = vmatpush3.bf16.msra.mxu0 %v7123_v61 }
 0x1e5   : > { %6876 = vmatprep.subr.bf16.mxu0 %v7124_v59 }
 0x1e7   : > { %v8180_v11 = vld [vmem:[#allocation4 + $0xfc] ss:$2 sm:$0xff] }
 0x1e8   : > { %v2778_v57 = vadd.f32 %v2777_v52, %v8180_v11  ;;  %6877 = vmatpush3.bf16.msra.mxu0 %v7124_v59 }
 0x1e9   : > { %6878 = vmatprep.subr.bf16.mxu0 %v7125_v14 }
 0x1ea   : > { %v2779_v5 = vrot.slane %v2778_v57, 4 }
 0x1ec   : > { %v2780_v8 = vadd.f32 %v2779_v5, %v2778_v57  ;;  %6879 = vmatpush3.bf16.msra.mxu0 %v7125_v14 }
 0x1ed   : > { %6880 = vmatprep.subr.bf16.mxu0 %v7126_v20 }
 0x1ee   : > { %v2781_v26 = vrot.slane %v2780_v8, 2 }
 0x1f0   : > { %v2782_v46 = vadd.f32 %v2781_v26, %v2780_v8  ;;  %6881 = vmatpush3.bf16.msra.mxu0 %v7126_v20  ;;  %v7142_v20 = vld [vmem:[%s7403_s20 + $0x30] sm:$0xff]  }
 0x1f1   : > { %6882 = vmatprep.subr.bf16.mxu0 %v7127_v21 }
 0x1f2   : > { %v2783_v42 = vrot.slane %v2782_v46, 1 }
 0x1f4   : > { %v2784_v34 = vadd.f32 %v2783_v42, %v2782_v46  ;;  %6883 = vmatpush3.bf16.msra.mxu0 %v7127_v21  ;;  %v7143_v21 = vld [vmem:[%s7403_s20 + $0x38] sm:$0xff]  }
 0x1f5   : > { %6916 = vmatprep.subr.bf16.mxu0 %v8185_v12 }
 0x1f6   : > { %v2785_v39 = vmul.f32 0.015625, %v2784_v34 }
 0x1f8   : > { %v2786_v28 = vpack.c.bf16 %v2785_v39, %v2785_v39 }
 0x1fa   : > { %6845 = vmatmul.mubr.bf16.vlgmr.msra.gmra.mrb[0].mxu1 %v2786_v28 }
 0x1fb   : > { %6849 = vmatpush3.bf16.msra.mxu1 %v7112_v19  ;;  %6864 = vmatprep.mubr.msk.bf16.mxu1 %vm7318_vm0, %v8185_v12 }
 0x1fc   : > { %6850 = vmatprep.subr.bf16.mxu1 %v8185_v12 }
 0x1ff   : > { %6851 = vmatpush3.bf16.msra.mxu1 %v7113_v63 }
 0x200   : > { %6852 = vmatprep.subr.bf16.mxu1 %v8185_v12 }
 0x203   : > { %6853 = vmatpush3.bf16.msra.mxu1 %v7114_v47 }
 0x204   : > { %6854 = vmatprep.subr.bf16.mxu1 %v8185_v12 }
 0x207   : > { %6855 = vmatpush3.bf16.msra.mxu1 %v7115_v51 }
 0x208   : > { %6856 = vmatprep.subr.bf16.mxu1 %v8185_v12 }
 0x20b   : > { %6857 = vmatpush3.bf16.msra.mxu1 %v7116_v13 }
 0x20c   : > { %6858 = vmatprep.subr.bf16.mxu1 %v8185_v12 }
 0x20f   : > { %6859 = vmatpush3.bf16.msra.mxu1 %v7117_v40 }
 0x210   : > { %6860 = vmatprep.subr.bf16.mxu1 %v8185_v12 }
 0x213   : > { %6861 = vmatpush3.bf16.msra.mxu1 %v7118_v15 }
 0x214   : > { %6862 = vmatprep.subr.bf16.mxu1 %v8185_v12 }
 0x217   : > { %6863 = vmatpush3.bf16.msra.mxu1 %v7119_v6 }
 0x218   : > { %6892 = vmatprep.subr.bf16.mxu1 %v7128_v45 }
 0x2cd   : > { %v2886_v31 = vpop.f32.mrb[0].mxu1 }
 0x2ce   : > { %v2887_v62 = vadd.f32 %v2886_v31, %v2803_v7  ;;  %v6846_v56 = vpop.f32.mrb[1].mxu1 }
 0x2cf   : > { %v2889_v24 = vpop.f32.mrb[2].mxu1  ;;  %v7137_v56 = vld [vmem:[%s7403_s20 + $0x8] sm:$0xff]  }
 0x2d0   : > { %v2892_v48 = vmax.f32 %v2887_v62, 0.0  ;;  %v6847_v32 = vpop.f32.mrb[3].mxu1  ;;  %v7136_v62 = vld [vmem:[%s7403_s20] sm:$0xff]   ;;  %v7138_v24 = vld [vmem:[%s7403_s20 + $0x10] sm:$0xff]  }
 0x2d1   : > { %v7140_v32 = vld [vmem:[%s7403_s20 + $0x20] sm:$0xff]  }
 0x2d2   : > { %v2893_v18 = vpack.c.bf16 %v2892_v48, %v2892_v48  ;;  %v7139_v48 = vld [vmem:[%s7403_s20 + $0x18] sm:$0xff]  }
 0x2d4   : > { %6865 = vmatmul.mubr.bf16.vlgmr.msra.gmra.mrb[4].mxu1 %v2893_v18  ;;  %v7141_v18 = vld [vmem:[%s7403_s20 + $0x28] sm:$0xff]  }
 0x2d5   : > { %6893 = vmatpush3.bf16.msra.mxu1 %v7128_v45  ;;  %v7144_v45 = vld [vmem:[%s7413_s4] sm:$0xff]  }
 0x2d6   : > { %6894 = vmatprep.subr.bf16.mxu1 %v7129_v50 }
 0x2d9   : > { %6895 = vmatpush3.bf16.msra.mxu1 %v7129_v50  ;;  %v7145_v50 = vld [vmem:[%s7413_s4 + $0x8] sm:$0xff]  }
 0x2da   : > { %6896 = vmatprep.subr.bf16.mxu1 %v7130_v9 }
 0x2dd   : > { %6897 = vmatpush3.bf16.msra.mxu1 %v7130_v9  ;;  %v7146_v9 = vld [vmem:[%s7413_s4 + $0x10] sm:$0xff]  }
 0x2de   : > { %6898 = vmatprep.subr.bf16.mxu1 %v7131_v22 }
 0x2e1   : > { %6899 = vmatpush3.bf16.msra.mxu1 %v7131_v22  ;;  %v7147_v22 = vld [vmem:[%s7413_s4 + $0x18] sm:$0xff]  }
 0x2e2   : > { %6900 = vmatprep.subr.bf16.mxu1 %v7132_v23 }
 0x2e5   : > { %6901 = vmatpush3.bf16.msra.mxu1 %v7132_v23  ;;  %v7148_v23 = vld [vmem:[%s7413_s4 + $0x20] sm:$0xff]  }
 0x2e6   : > { %6902 = vmatprep.subr.bf16.mxu1 %v7133_v1 }
 0x2e9   : > { %6903 = vmatpush3.bf16.msra.mxu1 %v7133_v1  ;;  %v7149_v1 = vld [vmem:[%s7413_s4 + $0x28] sm:$0xff]  }
 0x3a7   : > { %v2993_v53 = vpop.f32.mrb[4].mxu1 }
 0x3a8   : > { %v2994_v43 = vadd.f32 %v2993_v53, %v2910_v36  ;;  %v6866_v60 = vpop.f32.mrb[5].mxu1  ;;  %v8270_v36 = vld [vmem:[%s8951_s16] ss:$0 sm:$0xff]  ;;  %s8962_s16 = sld [smem:[#allocation30_spill]] }
 0x3a9   : > { %v2996_v27 = vpop.f32.mrb[6].mxu1 }
 0x3aa   : > { %v2999_v33 = vadd.f32 3.0, %v2994_v43  ;;  %v6867_v58 = vpop.f32.mrb[7].mxu1  ;;  %v8274_v43 = vld [vmem:[%s8952_s18] ss:$0 sm:$0xff]  ;;  %v3416_v27 = vld [vmem:[#allocation8 + $0x1] sm:$0xff] }
 0x3ac   : > { %v3000_v3 = vmax.f32 %v2999_v33, 0.0 }
 0x3ae   : > { %v3001_v0 = vmin.f32 %v3000_v3, 6.0 }
 0x3b0   : > { %v3002_v10 = vmul.f32 0.16666667, %v3001_v0  ;;  %v8278_v0 = vld [vmem:[%s8952_s18 + $0x1] ss:$0 sm:$0xff] }
 0x3b2   : > { %v3006_v35 = vrot.slane %v3002_v10, %v8222_v29 }
 0x3b4   : > { %v3007_v17 = vmul.f32 %v3006_v35, %v8161_v25  ;;  %v3008_v52 = vmul.f32 %v3006_v35, %v8159_v44  ;;  %v3009_v57 = vmul.f32 %v3006_v35, %v8163_v55  ;;  %v3010_v5 = vmul.f32 %v3006_v35, %v8167_v38  ;;  %v7134_v55 = vld [vmem:[%s7383_s24 + $0x30] sm:$0xff]   ;;  %v7135_v38 = vld [vmem:[%s7383_s24 + $0x38] sm:$0xff]  }
 0x3b5   : > { %v3011_v8 = vmul.f32 %v3006_v35, %v8170_v4  ;;  %v3012_v26 = vmul.f32 %v3006_v35, %v8173_v30  ;;  %v3013_v25 = vmul.f32 %v3006_v35, %v8176_v49  ;;  %v3014_v44 = vmul.f32 %v3006_v35, %v8180_v11  ;;  %6904 = vmatprep.subr.bf16.mxu1 %v7134_v55  ;;  %v6336_v30 = vld [vmem:[%s7378_s19] ss:$0 sm:$0xff] }
 0x3b6   : > { %v3031_v46 = vpack.c.bf16 %v3008_v52, %v3007_v17  ;;  %v3032_v42 = vpack.c.bf16 %v3010_v5, %v3009_v57  ;;  %6905 = vmatpush3.bf16.msra.mxu1 %v7134_v55  ;;  %v3396_v52 = vmul.f32 %v8185_v12, %v8274_v43  ;;  %v3430_v57 = vmul.f32 %v8278_v0, %v3416_v27 }
 0x3b7   : > { %v3033_v34 = vpack.c.bf16 %v3012_v26, %v3011_v8  ;;  %v3034_v39 = vpack.c.bf16 %v3014_v44, %v3013_v25  ;;  %6906 = vmatprep.subr.bf16.mxu1 %v7135_v38  ;;  %v8286_v8 = vld [vmem:[%s8952_s18 + $0x2] ss:$0 sm:$0xff]  ;;  %v3450_v26 = vld [vmem:[#allocation8 + $0x2] sm:$0xff] }
 0x3b8   : > { %6884 = vmatprep.mubr.bf16.mxu0 %v3031_v46  ;;  %v3464_v25 = vmul.f32 %v8286_v8, %v3450_v26 }
 0x3b9   : > { %6885 = vmatmul.mubr.bf16.vlgmr.msra.gmra.mrb[32].mxu0 %v3032_v42 }
 0x3ba   : > { %6888 = vmatprep.mubr.bf16.mxu0 %v3033_v34  ;;  %6907 = vmatpush3.bf16.msra.mxu1 %v7135_v38  ;;  %v3440_v34 = vadd.f32 %v3430_v57, %v3396_v52 }
 0x3bb   : > { %6936 = vmatprep.subr.bf16.mxu1 %v8185_v12  ;;  %6917 = vmatpush3.bf16.msra.mxu0 %v7136_v62 }
 0x3bc   : > { %6918 = vmatprep.subr.bf16.mxu0 %v8185_v12 }
 0x3bf   : > { %6919 = vmatpush3.bf16.msra.mxu0 %v7137_v56 }
 0x3c0   : > { %6920 = vmatprep.subr.bf16.mxu0 %v8185_v12 }
 0x3c1   : > { %6889 = vmatmul.mubr.bf16.gmra.mrb[36].mxu0 %v3034_v39 }
 0x3c2   : > { %6932 = vmatprep.mubr.msk.bf16.mxu0 %vm7318_vm0, %v8185_v12 }
 0x3c3   : > { %6921 = vmatpush3.bf16.msra.mxu0 %v7138_v24 }
 0x3c4   : > { %6922 = vmatprep.subr.bf16.mxu0 %v8185_v12 }
 0x3c7   : > { %6923 = vmatpush3.bf16.msra.mxu0 %v7139_v48 }
 0x3c8   : > { %6924 = vmatprep.subr.bf16.mxu0 %v8185_v12 }
 0x3cb   : > { %6925 = vmatpush3.bf16.msra.mxu0 %v7140_v32 }
 0x3cc   : > { %6926 = vmatprep.subr.bf16.mxu0 %v8185_v12 }
 0x3cf   : > { %6927 = vmatpush3.bf16.msra.mxu0 %v7141_v18 }
 0x3d0   : > { %6928 = vmatprep.subr.bf16.mxu0 %v8185_v12 }
 0x3d3   : > { %6929 = vmatpush3.bf16.msra.mxu0 %v7142_v20 }
 0x3d4   : > { %6930 = vmatprep.subr.bf16.mxu0 %v8185_v12 }
 0x3d7   : > { %6931 = vmatpush3.bf16.msra.mxu0 %v7143_v21 }
 0x3d8   : > { %6956 = vmatprep.subr.bf16.mxu0 %v8185_v12 }
 0x48c   : > { %v6886_v4 = vpop.f32.mrb[32].mxu0 }
 0x48d   : > { %v3140_v19 = vpop.f32.mrb[33].mxu0  ;;  %v3149_v49 = vadd.f32 %v6886_v4, %v6336_v30 }
 0x48e   : > { %v6887_v28 = vpop.f32.mrb[34].mxu0  ;;  %v3141_v47 = vadd.f32 %v6336_v30, %v3140_v19 }
 0x48f   : > { %v3152_v63 = vadd.f32 %v6887_v28, %v6336_v30  ;;  %v3143_v11 = vpop.f32.mrb[35].mxu0 }
 0x490   : > { %v3144_v51 = vadd.f32 %v6336_v30, %v3143_v11  ;;  %v3474_v11 = vadd.f32 %v3464_v25, %v3440_v34 }
 0x491   : > { %v3188_v13 = vpack.c.bf16 %v3152_v63, %v3149_v49  ;;  %v8300_v63 = vld [vmem:[%s8952_s18 + $0x4] ss:$0 sm:$0xff] }
 0x492   : > { %v3187_v40 = vpack.c.bf16 %v3144_v51, %v3141_v47 }
 0x494   : > { %v6890_v15 = vpop.f32.mrb[36].mxu0  ;;  %6908 = vmatprep.mubr.bf16.mxu1 %v3187_v40 }
 0x495   : > { %v3156_v6 = vpop.f32.mrb[37].mxu0  ;;  %6909 = vmatmul.mubr.bf16.vlgmr.msra.gmra.mrb[8].mxu1 %v3188_v13  ;;  %v3165_v37 = vadd.f32 %v6890_v15, %v6336_v30 }
 0x496   : > { %v6891_v54 = vpop.f32.mrb[38].mxu0  ;;  %v3157_v59 = vadd.f32 %v6336_v30, %v3156_v6  ;;  %6937 = vmatpush3.bf16.msra.mxu1 %v7144_v45  ;;  %v8307_v6 = vld [vmem:[%s8952_s18 + $0x7] ss:$0 sm:$0xff] }
 0x497   : > { %v3168_v16 = vadd.f32 %v6891_v54, %v6336_v30  ;;  %v3159_v61 = vpop.f32.mrb[39].mxu0  ;;  %6938 = vmatprep.subr.bf16.mxu1 %v8185_v12  ;;  %v8310_v54 = vld [vmem:[%s8952_s18 + $0x5] ss:$0 sm:$0xff] }
 0x498   : > { %v3160_v14 = vadd.f32 %v6336_v30, %v3159_v61  ;;  %v8294_v30 = vld [vmem:[%s8952_s18 + $0x3] ss:$0 sm:$0xff] }
 0x499   : > { %v3190_v7 = vpack.c.bf16 %v3168_v16, %v3165_v37 }
 0x49a   : > { %v3189_v31 = vpack.c.bf16 %v3160_v14, %v3157_v59  ;;  %6939 = vmatpush3.bf16.msra.mxu1 %v7145_v50 }
 0x49b   : > { %6940 = vmatprep.subr.bf16.mxu1 %v8185_v12 }
 0x49c   : > { %6912 = vmatprep.mubr.bf16.mxu1 %v3189_v31 }
 0x49d   : > { %6913 = vmatmul.mubr.bf16.gmra.mrb[12].mxu1 %v3190_v7 }
 0x49e   : > { %6952 = vmatprep.mubr.msk.bf16.mxu1 %vm7318_vm0, %v8185_v12  ;;  %6941 = vmatpush3.bf16.msra.mxu1 %v7146_v9 }
 0x49f   : > { %6942 = vmatprep.subr.bf16.mxu1 %v8185_v12 }
 0x4a2   : > { %6943 = vmatpush3.bf16.msra.mxu1 %v7147_v22 }
 0x4a3   : > { %6944 = vmatprep.subr.bf16.mxu1 %v8185_v12 }
 0x4a6   : > { %6945 = vmatpush3.bf16.msra.mxu1 %v7148_v23 }
 0x4a7   : > { %6946 = vmatprep.subr.bf16.mxu1 %v8185_v12 }
 0x4aa   : > { %6947 = vmatpush3.bf16.msra.mxu1 %v7149_v1 }
 0x4ab   : > { %6948 = vmatprep.subr.bf16.mxu1 %v8185_v12 }
 0x568   : > { %v6910_v41 = vpop.f32.mrb[8].mxu1 }
 0x569   : > { %v3305_v53 = vadd.f32 %v6910_v41, %v8270_v36  ;;  %v3296_v60 = vpop.f32.mrb[9].mxu1 }
 0x56a   : > { %v3297_v33 = vadd.f32 %v8270_v36, %v3296_v60  ;;  %v6911_v58 = vpop.f32.mrb[10].mxu1  ;;  %v8323_v60 = vld [vmem:[%s8952_s18 + $0x6] ss:$0 sm:$0xff] }
 0x56b   : > { %v3329_v3 = vmax.f32 %v3305_v53, 0.0  ;;  %v3308_v10 = vadd.f32 %v6911_v58, %v8270_v36  ;;  %v3299_v35 = vpop.f32.mrb[11].mxu1 }
 0x56c   : > { %v3327_v17 = vmax.f32 %v3297_v33, 0.0  ;;  %v3300_v5 = vadd.f32 %v8270_v36, %v3299_v35 }
 0x56d   : > { %3362 = vst [vmem:[#allocation8 + $0x1f] sm:$0xff] %v3329_v3  ;;  %v3330_v46 = vmax.f32 %v3308_v10, 0.0 }
 0x56e   : > { %3358 = vst [vmem:[#allocation8 + $0xb] sm:$0xff] %v3327_v17  ;;  %v3328_v42 = vmax.f32 %v3300_v5, 0.0  ;;  %v3523_v16 = vmul.f32 %v8300_v63, %v3327_v17 }
 0x56f   : > { %3364 = vst [vmem:[#allocation8 + $0x29] sm:$0xff] %v3330_v46  ;;  %v3435_v32 = vmul.f32 %v8278_v0, %v3330_v46 }
 0x570   : > { %3360 = vst [vmem:[#allocation8 + $0x15] sm:$0xff] %v3328_v42  ;;  %v6914_v44 = vpop.f32.mrb[12].mxu1  ;;  %v3616_v20 = vmul.f32 %v8307_v6, %v3328_v42 }
 0x571   : > { %v3321_v39 = vadd.f32 %v6914_v44, %v8270_v36  ;;  %v3312_v55 = vpop.f32.mrb[13].mxu1 }
 0x572   : > { %v8291_v38 = vadd.f32 %v8270_v36, %v3312_v55  ;;  %v6915_v4 = vpop.f32.mrb[14].mxu1 }
 0x573   : > { %v3333_v19 = vmax.f32 %v3321_v39, 0.0  ;;  %v3324_v28 = vadd.f32 %v6915_v4, %v8270_v36  ;;  %v8297_v49 = vpop.f32.mrb[15].mxu1 }
 0x574   : > { %v3331_v47 = vmax.f32 %v8291_v38, 0.0 }
 0x575   : > { %v3451_v51 = vld [vmem:[#allocation8 + $0xa] sm:$0xff]  ;;  %3370 = vst [vmem:[#allocation8 + $0x47] sm:$0xff] %v3333_v19  ;;  %v3334_v13 = vmax.f32 %v3324_v28, 0.0  ;;  %v8333_v19 = vld [vmem:[%s8952_s18 + $0x8] ss:$0 sm:$0xff] }
 0x576   : > { %v3489_v40 = vmul.f32 %v8294_v30, %v3451_v51  ;;  %3366 = vst [vmem:[#allocation8 + $0x33] sm:$0xff] %v3331_v47  ;;  %v3387_v15 = vld [vmem:[#allocation8 + $0x28] sm:$0xff] }
 0x577   : > { %3372 = vst [vmem:[#allocation8 + $0x51] sm:$0xff] %v3334_v13  ;;  %v3543_v61 = vld [vmem:[#allocation8 + $0xc] sm:$0xff]  ;;  %v3454_v59 = vld [vmem:[#allocation8 + $0x22] sm:$0xff]  ;;  %v3401_v62 = vmul.f32 %v8274_v43, %v3387_v15  ;;  %v3385_v56 = vld [vmem:[#allocation8 + $0x18] sm:$0xff] }
 0x578   : > { %v3499_v37 = vadd.f32 %v3489_v40, %v3474_v11  ;;  %v3455_v14 = vld [vmem:[#allocation8 + $0x2a] sm:$0xff]  ;;  %v3419_v48 = vld [vmem:[#allocation8 + $0x19] sm:$0xff]  ;;  %v3557_v21 = vmul.f32 %v8310_v54, %v3543_v61  ;;  %v3399_v23 = vmul.f32 %v8274_v43, %v3385_v56  ;;  %v3492_v52 = vmul.f32 %v8294_v30, %v3454_v59 }
 0x579   : > { %v3384_v7 = vld [vmem:[#allocation8 + $0x10] sm:$0xff]  ;;  %v3453_v50 = vld [vmem:[#allocation8 + $0x1a] sm:$0xff]  ;;  %v3469_v9 = vmul.f32 %v8286_v8, %v3455_v14  ;;  %v3512_v22 = vld [vmem:[#allocation8 + $0x23] sm:$0xff]  ;;  %v3433_v41 = vmul.f32 %v8278_v0, %v3419_v48  ;;  %v3445_v27 = vadd.f32 %v3435_v32, %v3401_v62  ;;  %v3528_v56 = vmul.f32 %v8300_v63, %v3331_v47 }
 0x57a   : > { %v3533_v31 = vadd.f32 %v3523_v16, %v3499_v37  ;;  %v3418_v24 = vld [vmem:[#allocation8 + $0x11] sm:$0xff]  ;;  %v3398_v45 = vmul.f32 %v8274_v43, %v3384_v7  ;;  %v3546_v58 = vld [vmem:[#allocation8 + $0x24] sm:$0xff]  ;;  %v3467_v17 = vmul.f32 %v8286_v8, %v3453_v50  ;;  %v3526_v57 = vmul.f32 %v8300_v63, %v3512_v22  ;;  %v3511_v5 = vld [vmem:[#allocation8 + $0x1b] sm:$0xff] }
 0x57b   : > { %v3452_v18 = vld [vmem:[#allocation8 + $0x12] sm:$0xff]  ;;  %v3432_v1 = vmul.f32 %v8278_v0, %v3418_v24  ;;  %v3443_v10 = vadd.f32 %v3433_v41, %v3399_v23  ;;  %v3491_v42 = vmul.f32 %v8294_v30, %v3453_v50  ;;  %v3545_v34 = vld [vmem:[#allocation8 + $0x1c] sm:$0xff]  ;;  %v3479_v39 = vadd.f32 %v3469_v9, %v3445_v27 }
 0x57c   : > { %v3567_v53 = vadd.f32 %v3557_v21, %v3533_v31  ;;  %v3544_v33 = vld [vmem:[#allocation8 + $0x14] sm:$0xff]  ;;  %v3466_v35 = vmul.f32 %v8286_v8, %v3452_v18  ;;  %v3560_v55 = vmul.f32 %v8310_v54, %v3546_v58  ;;  %v3525_v51 = vmul.f32 %v8300_v63, %v3511_v5  ;;  %v3604_v31 = vld [vmem:[#allocation8 + $0x25] sm:$0xff] }
 0x57d   : > { %v3442_v3 = vadd.f32 %v3432_v1, %v3398_v45  ;;  %v3477_v46 = vadd.f32 %v3467_v17, %v3443_v10  ;;  %v3582_v25 = vmul.f32 %v8323_v60, %v3544_v33  ;;  %v3636_v44 = vld [vmem:[#allocation8 + $0x16] sm:$0xff]  ;;  %v3559_v40 = vmul.f32 %v8310_v54, %v3545_v34  ;;  %v3547_v14 = vld [vmem:[#allocation8 + $0x2c] sm:$0xff] }
 0x57e   : > { %v3456_v4 = vld [vmem:[#allocation8 + $0x32] sm:$0xff]  ;;  %v3650_v15 = vmul.f32 %v8333_v19, %v3636_v44  ;;  %v3584_v7 = vmul.f32 %v8323_v60, %v3546_v58  ;;  %v3638_v45 = vld [vmem:[#allocation8 + $0x26] sm:$0xff]  ;;  %v3618_v50 = vmul.f32 %v8307_v6, %v3604_v31 }
 0x57f   : > { %v3476_v26 = vadd.f32 %v3466_v35, %v3442_v3  ;;  %v3502_v11 = vadd.f32 %v3492_v52, %v3477_v46  ;;  %v3592_v13 = vadd.f32 %v3582_v25, %v3567_v53  ;;  %v3494_v61 = vmul.f32 %v8294_v30, %v3456_v4  ;;  %v8341_v62 = vld [vmem:[%s8953_s22] ss:$0 sm:$0xff]  ;;  %v3605_v21 = vld [vmem:[#allocation8 + $0x2d] sm:$0xff]  ;;  %s8963_s22 = sld [smem:[#allocation27_spill]] }
 0x580   : > { %v3639_v1 = vld [vmem:[#allocation8 + $0x2e] sm:$0xff]  ;;  %v3619_v38 = vmul.f32 %v8307_v6, %v3605_v21  ;;  %v3652_v47 = vmul.f32 %v8333_v19, %v3638_v45  ;;  %v3316_v52 = vadd.f32 %v8270_v36, %v8297_v49 }
 0x581   : > { %v3501_v28 = vadd.f32 %v3491_v42, %v3476_v26  ;;  %v3626_v16 = vadd.f32 %v3616_v20, %v3592_v13  ;;  %v3536_v59 = vadd.f32 %v3526_v57, %v3502_v11  ;;  %v3504_v32 = vadd.f32 %v3494_v61, %v3479_v39  ;;  %v3459_v53 = vld [vmem:[#allocation8 + $0x4a] sm:$0xff]  ;;  %v3552_v26 = vld [vmem:[#allocation8 + $0x54] sm:$0xff] }
 0x582   : > { %v3585_v20 = vmul.f32 %v8323_v60, %v3547_v14  ;;  %v3653_v3 = vmul.f32 %v8333_v19, %v3639_v1  ;;  %v3332_v42 = vmax.f32 %v3316_v52, 0.0  ;;  %v3548_v25 = vld [vmem:[#allocation8 + $0x34] sm:$0xff]  ;;  %v3517_v39 = vld [vmem:[#allocation8 + $0x4b] sm:$0xff] }
 0x583   : > { %v3535_v37 = vadd.f32 %v3525_v51, %v3501_v28  ;;  %v3660_v48 = vadd.f32 %v3650_v15, %v3626_v16  ;;  %v3570_v18 = vadd.f32 %v3560_v55, %v3536_v59  ;;  %v3538_v23 = vadd.f32 %v3528_v56, %v3504_v32 }
 0x584   : > { %3368 = vst [vmem:[#allocation8 + $0x3d] sm:$0xff] %v3332_v42  ;;  %v3562_v44 = vmul.f32 %v8310_v54, %v3548_v25  ;;  %v3497_v16 = vmul.f32 %v8294_v30, %v3459_v53  ;;  %v3531_v14 = vmul.f32 %v8300_v63, %v3517_v39 }
 0x585   : > { %v3569_v24 = vadd.f32 %v3559_v40, %v3535_v37  ;;  %v3676_v22 = vadd.f32 %v8341_v62, %v3660_v48  ;;  %v3595_v41 = vadd.f32 %v3585_v20, %v3570_v18 }
 0x586   : > { %v3572_v36 = vadd.f32 %v3562_v44, %v3538_v23 }
 0x587   : > { %v3594_v9 = vadd.f32 %v3584_v7, %v3569_v24  ;;  %v3686_v33 = vmax.f32 %v3676_v22, 0.0  ;;  %v3629_v58 = vadd.f32 %v3619_v38, %v3595_v41 }
 0x589   : > { %v3628_v27 = vadd.f32 %v3618_v50, %v3594_v9  ;;  %3696 = vst [vmem:[#allocation9] sm:$0xff] %v3686_v33  ;;  %v3663_v35 = vadd.f32 %v3653_v3, %v3629_v58  ;;  %v3551_v9 = vld [vmem:[#allocation8 + $0x4c] sm:$0xff] }
 0x58a   : > { %v3565_v53 = vmul.f32 %v8310_v54, %v3551_v9  ;;  %v3589_v33 = vmul.f32 %v8323_v60, %v3551_v9  ;;  %v8419_v9 = vld [vmem:[%s8958_s2] ss:$0 sm:$0xff] }
 0x58b   : > { %v3662_v10 = vadd.f32 %v3652_v47, %v3628_v27  ;;  %v3679_v57 = vadd.f32 %v8341_v62, %v3663_v35  ;;  %v3389_v4 = vld [vmem:[#allocation8 + $0x38] sm:$0xff]  ;;  %v3390_v28 = vld [vmem:[#allocation8 + $0x40] sm:$0xff]  ;;  %v3609_v47 = vld [vmem:[#allocation8 + $0x4d] sm:$0xff] }
 0x58c   : > { %v3423_v11 = vld [vmem:[#allocation8 + $0x39] sm:$0xff]  ;;  %v3403_v49 = vmul.f32 %v8274_v43, %v3389_v4  ;;  %v3404_v51 = vmul.f32 %v8274_v43, %v3390_v28  ;;  %v3424_v13 = vld [vmem:[#allocation8 + $0x41] sm:$0xff]  ;;  %v3643_v35 = vld [vmem:[#allocation8 + $0x4e] sm:$0xff]  ;;  %v3623_v52 = vmul.f32 %v8307_v6, %v3609_v47 }
 0x58d   : > { %v3678_v17 = vadd.f32 %v8341_v62, %v3662_v10  ;;  %v3689_v46 = vmax.f32 %v3679_v57, 0.0  ;;  %v3437_v40 = vmul.f32 %v8278_v0, %v3423_v11  ;;  %v3457_v15 = vld [vmem:[#allocation8 + $0x3a] sm:$0xff]  ;;  %v3458_v37 = vld [vmem:[#allocation8 + $0x42] sm:$0xff]  ;;  %v3438_v61 = vmul.f32 %v8278_v0, %v3424_v13 }
 0x58e   : > { %v3549_v59 = vld [vmem:[#allocation8 + $0x3c] sm:$0xff]  ;;  %v3471_v31 = vmul.f32 %v8286_v8, %v3457_v15  ;;  %v3472_v48 = vmul.f32 %v8286_v8, %v3458_v37  ;;  %v3496_v43 = vmul.f32 %v8294_v30, %v3458_v37  ;;  %v3550_v18 = vld [vmem:[#allocation8 + $0x44] sm:$0xff]  ;;  %v3621_v0 = vmul.f32 %v8307_v6, %v3332_v42  ;;  %v6364_v15 = vld [vmem:[%s8954_s23] ss:$0 sm:$0xff]  ;;  %s8964_s23 = sld [smem:[#allocation29_spill]] }
 0x58f   : > { %v3688_v5 = vmax.f32 %v3678_v17, 0.0  ;;  %3699 = vst [vmem:[#allocation9 + $0x18] sm:$0xff] %v3689_v46  ;;  %v3447_v7 = vadd.f32 %v3437_v40, %v3403_v49  ;;  %v3516_v56 = vld [vmem:[#allocation8 + $0x43] sm:$0xff]  ;;  %v3448_v24 = vadd.f32 %v3438_v61, %v3404_v51  ;;  %v3587_v21 = vmul.f32 %v8323_v60, %v3549_v59  ;;  %v3644_v57 = vld [vmem:[#allocation8 + $0x56] sm:$0xff] }
 0x590   : > { %v3706_v34 = vld [vmem:[#allocation9] ss:$2 sm:$0xf]  ;;  %v3530_v20 = vmul.f32 %v8300_v63, %v3516_v56  ;;  %v3641_v50 = vld [vmem:[#allocation8 + $0x3e] sm:$0xff]  ;;  %v3564_v41 = vmul.f32 %v8310_v54, %v3550_v18  ;;  %v3610_v63 = vld [vmem:[#allocation8 + $0x55] sm:$0xff]  ;;  %v3590_v10 = vmul.f32 %v8323_v60, %v3552_v26  ;;  %v3658_v39 = vmul.f32 %v8333_v19, %v3644_v57 }
 0x591   : > { %3698 = vst [vmem:[#allocation9 + $0x10] sm:$0xff] %v3688_v5  ;;  %3707 = vst [vmem:[#allocation10] sm:$0xf] %v3706_v34  ;;  %v3481_v32 = vadd.f32 %v3471_v31, %v3447_v7  ;;  %v3482_v45 = vadd.f32 %v3472_v48, %v3448_v24  ;;  %v3597_v23 = vadd.f32 %v3587_v21, %v3572_v36  ;;  %v7150_v40 = vld [vmem:[%s7413_s4 + $0x30] sm:$0xff]   ;;  %v8394_v56 = vld [vmem:[#allocation3] sm:$0xff] }
 0x592   : > { %v3655_v30 = vmul.f32 %v8333_v19, %v3641_v50  ;;  %v3624_v42 = vmul.f32 %v8307_v6, %v3610_v63  ;;  %v3657_v34 = vmul.f32 %v8333_v19, %v3643_v35  ;;  %6949 = vmatpush3.bf16.msra.mxu1 %v7150_v40  ;;  %v7153_v24 = vld [vmem:[%s8955_s26 + $0x8] sm:$0xff]   ;;  %v7154_v48 = vld [vmem:[%s8955_s26 + $0x10] sm:$0xff]   ;;  %v6373_v50 = vld [vmem:[%s8957_s1] ss:$0 sm:$0xff]  ;;  %s8965_s1 = sld [smem:[#allocation32_spill]] }
 0x593   : > { %v3506_v22 = vadd.f32 %v3496_v43, %v3481_v32  ;;  %v3507_v1 = vadd.f32 %v3497_v16, %v3482_v45  ;;  %v3631_v8 = vadd.f32 %v3621_v0, %v3597_v23  ;;  %6950 = vmatprep.subr.bf16.mxu1 %v8185_v12  ;;  %v7155_v43 = vld [vmem:[%s8955_s26 + $0x18] sm:$0xff]   ;;  %v7156_v32 = vld [vmem:[%s8955_s26 + $0x20] sm:$0xff]   ;;  %v7157_v18 = vld [vmem:[%s8955_s26 + $0x28] sm:$0xff]  }
 0x594   : > { %v7158_v21 = vld [vmem:[%s8955_s26 + $0x30] sm:$0xff]   ;;  %v7159_v45 = vld [vmem:[%s8955_s26 + $0x38] sm:$0xff]   ;;  %v7161_v0 = vld [vmem:[%s8956_s28 + $0x8] sm:$0xff]  }
 0x595   : > { %v3540_v38 = vadd.f32 %v3530_v20, %v3506_v22  ;;  %v3541_v27 = vadd.f32 %v3531_v14, %v3507_v1  ;;  %v3665_v3 = vadd.f32 %v3655_v30, %v3631_v8  ;;  %v7160_v20 = vld [vmem:[%s8956_s28] sm:$0xff]   ;;  %v4012_v30 = vmul.f32 %v8394_v56, %v8419_v9 }
 0x596   : > { %v8422_v22 = vld [vmem:[%s8958_s2 + $0x1] ss:$0 sm:$0xff]  ;;  %v4036_v63 = vld [vmem:[#allocation13 + $0x2] sm:$0xff] }
 0x597   : > { %v3574_v58 = vadd.f32 %v3564_v41, %v3540_v38  ;;  %v3575_v17 = vadd.f32 %v3565_v53, %v3541_v27  ;;  %v3681_v46 = vadd.f32 %v8341_v62, %v3665_v3  ;;  %v4020_v23 = vld [vmem:[#allocation13 + $0x1] sm:$0xff]  ;;  %v7162_v41 = vld [vmem:[%s8956_s28 + $0x10] sm:$0xff]  }
 0x598   : > { %v3709_v55 = vld [vmem:[#allocation9 + $0x14] ss:$2 sm:$0xf]  ;;  %v4028_v53 = vmul.f32 %v8422_v22, %v4020_v23 }
 0x599   : > { %3710 = vst [vmem:[#allocation10 + $0x4] sm:$0xf] %v3709_v55  ;;  %v3599_v5 = vadd.f32 %v3589_v33, %v3574_v58  ;;  %v3600_v54 = vadd.f32 %v3590_v10, %v3575_v17  ;;  %v3691_v44 = vmax.f32 %v3681_v46, 0.0  ;;  %v8430_v33 = vld [vmem:[%s8958_s2 + $0x2] ss:$0 sm:$0xff]  ;;  %v7163_v10 = vld [vmem:[%s8956_s28 + $0x18] sm:$0xff]  }
 0x59a   : > { %v4044_v57 = vmul.f32 %v8430_v33, %v4036_v63  ;;  %v8436_v46 = vld [vmem:[%s8958_s2 + $0x3] ss:$0 sm:$0xff]  ;;  %v8472_v63 = vld [vmem:[%s8958_s2 + $0x9] ss:$0 sm:$0xff] }
 0x59b   : > { %v3633_v25 = vadd.f32 %v3623_v52, %v3599_v5  ;;  %v3634_v55 = vadd.f32 %v3624_v42, %v3600_v54  ;;  %3701 = vst [vmem:[#allocation9 + $0x28] sm:$0xff] %v3691_v44  ;;  %v4032_v52 = vadd.f32 %v4028_v53, %v4012_v30  ;;  %v4052_v42 = vld [vmem:[#allocation13 + $0x3] sm:$0xff] }
 0x59d   : > { %v3667_v4 = vadd.f32 %v3657_v34, %v3633_v25  ;;  %v3668_v60 = vadd.f32 %v3658_v39, %v3634_v55  ;;  %v7164_v34 = vld [vmem:[%s8956_s28 + $0x20] sm:$0xff]   ;;  %v4048_v39 = vadd.f32 %v4044_v57, %v4032_v52  ;;  %v4060_v55 = vmul.f32 %v8436_v46, %v4052_v42  ;;  %v8478_v57 = vld [vmem:[%s8958_s2 + $0xa] ss:$0 sm:$0xff] }
 0x59f   : > { %v3683_v26 = vadd.f32 %v8341_v62, %v3667_v4  ;;  %v3684_v28 = vadd.f32 %v8341_v62, %v3668_v60  ;;  %v7151_v62 = vld [vmem:[%s7413_s4 + $0x38] sm:$0xff]   ;;  %v8442_v60 = vld [vmem:[%s8958_s2 + $0x4] ss:$0 sm:$0xff] }
 0x5a0   : > { %v3717_v19 = vld [vmem:[#allocation10] sm:$0xff]  ;;  %6951 = vmatpush3.bf16.msra.mxu1 %v7151_v62 }
 0x5a1   : > { %v3693_v11 = vmax.f32 %v3683_v26, 0.0  ;;  %v3694_v36 = vmax.f32 %v3684_v28, 0.0  ;;  %6976 = vmatprep.subr.bf16.mxu1 %v8185_v12  ;;  %v4068_v26 = vld [vmem:[#allocation13 + $0x4] sm:$0xff] }
 0x5a2   : > { %v3712_v6 = vld [vmem:[#allocation9 + $0x28] ss:$2 sm:$0xf]  ;;  %v8454_v62 = vld [vmem:[%s8958_s2 + $0x6] ss:$0 sm:$0xff] }
 0x5a3   : > { %3703 = vst [vmem:[#allocation9 + $0x38] sm:$0xff] %v3693_v11  ;;  %3704 = vst [vmem:[#allocation9 + $0x40] sm:$0xff] %v3694_v36  ;;  %v7165_v11 = vld [vmem:[%s8956_s28 + $0x28] sm:$0xff]  }
 0x5a4   : > { %3713 = vst [vmem:[#allocation10 + $0x8] sm:$0xf] %v3712_v6  ;;  %v4064_v6 = vadd.f32 %v4060_v55, %v4048_v39 }
 0x5aa   : > { %v3715_v49 = vld [vmem:[#allocation9 + $0x3c] ss:$2 sm:$0xf] }
 0x5ab   : > { %3716 = vst [vmem:[#allocation10 + $0xc] sm:$0xf] %v3715_v49  ;;  %v4076_v49 = vmul.f32 %v8442_v60, %v4068_v26 }
 0x5b2   : > { %v3718_v51 = vld [vmem:[#allocation10 + $0x8] sm:$0xff] }
 0x5b3   : > { %v3719_v13 = vpack.c.bf16 %v3718_v51, %v3717_v19  ;;  %v8448_v19 = vld [vmem:[%s8958_s2 + $0x5] ss:$0 sm:$0xff]  ;;  %v4021_v51 = vld [vmem:[#allocation13 + $0x9] sm:$0xff] }
 0x5b4   : > { %v4089_v40 = vmul.f32 %v8394_v56, %v8448_v19 }
 0x5b5   : > { %6933 = vmatmul.mubr.bf16.vlgmr.msra.gmra.mrb[40].mxu0 %v3719_v13  ;;  %v4080_v13 = vadd.f32 %v4076_v49, %v4064_v6 }
 0x5b6   : > { %6972 = vmatprep.mubr.msk.bf16.mxu0 %vm7318_vm0, %v8185_v12  ;;  %v7152_v12 = vld [vmem:[%s8955_s26] sm:$0xff]  }
 0x5b7   : > { %6957 = vmatpush3.bf16.msra.mxu0 %v7152_v12 }
 0x5b8   : > { %6958 = vmatprep.subr.bf16.mxu0 %v8394_v56 }
 0x5bb   : > { %6959 = vmatpush3.bf16.msra.mxu0 %v7153_v24 }
 0x5bc   : > { %6960 = vmatprep.subr.bf16.mxu0 %v8394_v56 }
 0x5bf   : > { %6961 = vmatpush3.bf16.msra.mxu0 %v7154_v48  ;;  %v8459_v48 = vld [vmem:[%s8958_s2 + $0x7] ss:$0 sm:$0xff] }
 0x5c0   : > { %6962 = vmatprep.subr.bf16.mxu0 %v8394_v56 }
 0x5c3   : > { %6963 = vmatpush3.bf16.msra.mxu0 %v7155_v43 }
 0x5c4   : > { %6964 = vmatprep.subr.bf16.mxu0 %v8394_v56 }
 0x5c7   : > { %6965 = vmatpush3.bf16.msra.mxu0 %v7156_v32 }
 0x5c8   : > { %6966 = vmatprep.subr.bf16.mxu0 %v8394_v56 }
 0x5cb   : > { %6967 = vmatpush3.bf16.msra.mxu0 %v7157_v18 }
 0x5cc   : > { %6968 = vmatprep.subr.bf16.mxu0 %v8394_v56 }
 0x5cf   : > { %6969 = vmatpush3.bf16.msra.mxu0 %v7158_v21 }
 0x5d0   : > { %6970 = vmatprep.subr.bf16.mxu0 %v8394_v56 }
 0x5d3   : > { %6971 = vmatpush3.bf16.msra.mxu0 %v7159_v45 }
 0x5d4   : > { %6996 = vmatprep.subr.bf16.mxu0 %v8394_v56 }
 0x688   : > { %v3825_v37 = vpop.f32.mrb[40].mxu0 }
 0x689   : > { %v6934_v16 = vpop.f32.mrb[41].mxu0  ;;  %v8388_v59 = vadd.f32 %v6364_v15, %v3825_v37 }
 0x68a   : > { %v3828_v61 = vpop.f32.mrb[42].mxu0  ;;  %v4029_v16 = vmul.f32 %v8422_v22, %v4021_v51 }
 0x68b   : > { %v8390_v14 = vadd.f32 %v6364_v15, %v3828_v61  ;;  %v6935_v7 = vpop.f32.mrb[43].mxu0  ;;  %v4037_v61 = vld [vmem:[#allocation13 + $0xa] sm:$0xff] }
 0x68c   : > { %v4093_v7 = vadd.f32 %v4089_v40, %v4080_v13  ;;  %v4033_v43 = vadd.f32 %v4029_v16, %v4012_v30  ;;  %v4045_v32 = vmul.f32 %v8430_v33, %v4037_v61  ;;  %v4115_v21 = vmul.f32 %v8459_v48, %v4037_v61 }
 0x68d   : > { %v3836_v31 = vpack.c.bf16 %v8390_v14, %v8388_v59 }
 0x68f   : > { %6953 = vmatmul.mubr.bf16.vlgmr.msra.gmra.mrb[16].mxu1 %v3836_v31  ;;  %v4102_v31 = vmul.f32 %v8454_v62, %v4021_v51 }
 0x690   : > { %6992 = vmatprep.mubr.msk.bf16.mxu1 %vm7318_vm0, %v8394_v56  ;;  %6977 = vmatpush3.bf16.msra.mxu1 %v7160_v20 }
 0x691   : > { %6978 = vmatprep.subr.bf16.mxu1 %v8394_v56  ;;  %v4106_v18 = vadd.f32 %v4102_v31, %v4093_v7  ;;  %v8507_v7 = vld [vmem:[%s8958_s2 + $0xd] ss:$0 sm:$0xff] }
 0x694   : > { %6979 = vmatpush3.bf16.msra.mxu1 %v7161_v0  ;;  %v4049_v0 = vadd.f32 %v4045_v32, %v4033_v43 }
 0x695   : > { %6980 = vmatprep.subr.bf16.mxu1 %v8394_v56 }
 0x698   : > { %6981 = vmatpush3.bf16.msra.mxu1 %v7162_v41 }
 0x699   : > { %6982 = vmatprep.subr.bf16.mxu1 %v8394_v56 }
 0x69c   : > { %6983 = vmatpush3.bf16.msra.mxu1 %v7163_v10 }
 0x69d   : > { %6984 = vmatprep.subr.bf16.mxu1 %v8394_v56 }
 0x6a0   : > { %6985 = vmatpush3.bf16.msra.mxu1 %v7164_v34 }
 0x6a1   : > { %6986 = vmatprep.subr.bf16.mxu1 %v8394_v56 }
 0x6a4   : > { %6987 = vmatpush3.bf16.msra.mxu1 %v7165_v11 }
 0x6a5   : > { %6988 = vmatprep.subr.bf16.mxu1 %v8394_v56 }
 0x762   : > { %v3942_v1 = vpop.f32.mrb[16].mxu1 }
 0x763   : > { %v3943_v38 = vadd.f32 %v6373_v50, %v3942_v1  ;;  %v6954_v8 = vpop.f32.mrb[17].mxu1 }
 0x764   : > { %v3945_v47 = vpop.f32.mrb[18].mxu1 }
 0x765   : > { %v3949_v27 = vadd.f32 3.0, %v3943_v38  ;;  %v3946_v58 = vadd.f32 %v6373_v50, %v3945_v47  ;;  %v6955_v3 = vpop.f32.mrb[19].mxu1  ;;  %v8464_v50 = vld [vmem:[%s8958_s2 + $0x8] ss:$0 sm:$0xff] }
 0x767   : > { %v3951_v35 = vmax.f32 %v3949_v27, 0.0  ;;  %v3950_v17 = vadd.f32 3.0, %v3946_v58  ;;  %v4119_v27 = vadd.f32 %v4115_v21, %v4106_v18 }
 0x769   : > { %v3953_v5 = vmin.f32 %v3951_v35, 6.0  ;;  %v3952_v54 = vmax.f32 %v3950_v17, 0.0 }
 0x76b   : > { %v3955_v25 = vmul.f32 %v3953_v5, %v3943_v38  ;;  %v3954_v44 = vmin.f32 %v3952_v54, 6.0 }
 0x76d   : > { %v3957_v4 = vmul.f32 0.16666667, %v3955_v25  ;;  %v3956_v28 = vmul.f32 %v3954_v44, %v3946_v58  ;;  %v8486_v25 = vld [vmem:[%s8958_s2 + $0xb] ss:$0 sm:$0xff] }
 0x76f   : > { %3959 = vst [vmem:[#allocation12] sm:$0xff] %v3957_v4  ;;  %v3958_v36 = vmul.f32 0.16666667, %v3956_v28 }
 0x771   : > { %3960 = vst [vmem:[#allocation12 + $0x8] sm:$0xff] %v3958_v36  ;;  %v8495_v36 = vld [vmem:[%s8958_s2 + $0xc] ss:$0 sm:$0xff] }
 0x776   : > { %v3971_v15 = vld [vmem:[#allocation12] sm:$0xf]  ;;  %v3973_v37 = vld [vmem:[#allocation12 + $0x4] sm:$0xf] }
 0x777   : > { %3972 = vst [vmem:[#allocation13 + $0x12] sm:$0xf] %v3971_v15  ;;  %3974 = vst [vmem:[#allocation13 + $0x1a] sm:$0xf] %v3973_v37 }
 0x778   : > { %v3975_v12 = vld [vmem:[#allocation12 + $0x8] sm:$0xf]  ;;  %v3977_v24 = vld [vmem:[#allocation12 + $0xc] sm:$0xf] }
 0x779   : > { %3976 = vst [vmem:[#allocation13 + $0x22] sm:$0xf] %v3975_v12  ;;  %3978 = vst [vmem:[#allocation13 + $0x2a] sm:$0xf] %v3977_v24 }
 0x77e   : > { %v4006_v45 = vld [vmem:[#allocation13 + $0x10] sm:$0xff]  ;;  %v8468_v8 = vld [vmem:[#allocation13 + $0x18] sm:$0xff] }
 0x77f   : > { %v4022_v20 = vld [vmem:[#allocation13 + $0x11] sm:$0xff]  ;;  %v4014_v23 = vmul.f32 %v8419_v9, %v4006_v45  ;;  %v4015_v5 = vmul.f32 %v8419_v9, %v8468_v8  ;;  %v8483_v34 = vld [vmem:[#allocation13 + $0x19] sm:$0xff]  ;;  %v4090_v39 = vmul.f32 %v8448_v19, %v4006_v45  ;;  %v4154_v51 = vmul.f32 %v8478_v57, %v4006_v45 }
 0x780   : > { %v4030_v1 = vmul.f32 %v8422_v22, %v4022_v20  ;;  %v4038_v41 = vld [vmem:[#allocation13 + $0x12] sm:$0xff]  ;;  %v4103_v11 = vmul.f32 %v8454_v62, %v4022_v20  ;;  %v8492_v9 = vld [vmem:[#allocation13 + $0x1a] sm:$0xff]  ;;  %v4031_v13 = vmul.f32 %v8422_v22, %v8483_v34  ;;  %v4091_v15 = vmul.f32 %v8448_v19, %v8468_v8 }
 0x781   : > { %v4053_v38 = vld [vmem:[#allocation13 + $0xb] sm:$0xff]  ;;  %v4054_v30 = vld [vmem:[#allocation13 + $0x13] sm:$0xff]  ;;  %v4046_v3 = vmul.f32 %v8430_v33, %v4038_v41  ;;  %v4116_v37 = vmul.f32 %v8459_v48, %v4038_v41  ;;  %v4167_v16 = vmul.f32 %v8486_v25, %v4022_v20  ;;  %v8504_v61 = vld [vmem:[#allocation13 + $0x1b] sm:$0xff]  ;;  %v4047_v43 = vmul.f32 %v8430_v33, %v8492_v9 }
 0x782   : > { %v4061_v53 = vmul.f32 %v8436_v46, %v4053_v38  ;;  %v4069_v47 = vld [vmem:[#allocation13 + $0xc] sm:$0xff]  ;;  %v4034_v58 = vadd.f32 %v4030_v1, %v4014_v23  ;;  %v4070_v35 = vld [vmem:[#allocation13 + $0x14] sm:$0xff]  ;;  %v4128_v52 = vmul.f32 %v8464_v50, %v4053_v38  ;;  %v4062_v54 = vmul.f32 %v8436_v46, %v4054_v30  ;;  %v8513_v21 = vld [vmem:[#allocation13 + $0x1c] sm:$0xff] }
 0x783   : > { %v4077_v17 = vmul.f32 %v8442_v60, %v4069_v47  ;;  %v4141_v4 = vmul.f32 %v8472_v63, %v4069_v47  ;;  %v4078_v28 = vmul.f32 %v8442_v60, %v4070_v35  ;;  %v4035_v24 = vadd.f32 %v4031_v13, %v4015_v5  ;;  %v8518_v20 = vld [vmem:[%s8958_s2 + $0xe] ss:$0 sm:$0xff]  ;;  %v8524_v47 = vld [vmem:[#allocation13 + $0x20] sm:$0xff] }
 0x784   : > { %v4065_v10 = vadd.f32 %v4061_v53, %v4049_v0  ;;  %v4050_v42 = vadd.f32 %v4046_v3, %v4034_v58  ;;  %v4132_v55 = vadd.f32 %v4128_v52, %v4119_v27  ;;  %v4129_v32 = vmul.f32 %v8464_v50, %v4054_v30  ;;  %v8529_v58 = vld [vmem:[%s8958_s2 + $0xf] ss:$0 sm:$0xff]  ;;  %v8533_v5 = vld [vmem:[#allocation13 + $0x21] sm:$0xff] }
 0x785   : > { %v4180_v18 = vmul.f32 %v8495_v36, %v4038_v41  ;;  %v4104_v45 = vmul.f32 %v8454_v62, %v8483_v34  ;;  %v4051_v1 = vadd.f32 %v4047_v43, %v4035_v24  ;;  %v4063_v38 = vmul.f32 %v8436_v46, %v8504_v61  ;;  %v8550_v13 = vld [vmem:[#allocation13 + $0x23] sm:$0xff] }
 0x786   : > { %v4081_v44 = vadd.f32 %v4077_v17, %v4065_v10  ;;  %v4066_v26 = vadd.f32 %v4062_v54, %v4050_v42  ;;  %v4145_v49 = vadd.f32 %v4141_v4, %v4132_v55  ;;  %v4142_v33 = vmul.f32 %v8472_v63, %v4070_v35  ;;  %v8567_v24 = vld [vmem:[#allocation13 + $0x24] sm:$0xff] }
 0x787   : > { %v4193_v53 = vmul.f32 %v8507_v7, %v4054_v30  ;;  %v4117_v27 = vmul.f32 %v8459_v48, %v8492_v9  ;;  %v4067_v17 = vadd.f32 %v4063_v38, %v4051_v1  ;;  %v4079_v52 = vmul.f32 %v8442_v60, %v8513_v21  ;;  %v8582_v1 = vld [vmem:[#allocation13 + $0x28] sm:$0xff] }
 0x788   : > { %v4094_v6 = vadd.f32 %v4090_v39, %v4081_v44  ;;  %v4082_v40 = vadd.f32 %v4078_v28, %v4066_v26  ;;  %v4158_v12 = vadd.f32 %v4154_v51, %v4145_v49  ;;  %v4155_v46 = vmul.f32 %v8478_v57, %v8468_v8  ;;  %v8542_v26 = vld [vmem:[#allocation13 + $0x22] sm:$0xff] }
 0x789   : > { %v4206_v30 = vmul.f32 %v8518_v20, %v4070_v35  ;;  %v4130_v54 = vmul.f32 %v8464_v50, %v8504_v61  ;;  %v4083_v55 = vadd.f32 %v4079_v52, %v4067_v17  ;;  %v4092_v4 = vmul.f32 %v8448_v19, %v8524_v47  ;;  %v8597_v52 = vld [vmem:[#allocation13 + $0x29] sm:$0xff] }
 0x78a   : > { %v4107_v31 = vadd.f32 %v4103_v11, %v4094_v6  ;;  %v4095_v22 = vadd.f32 %v4091_v15, %v4082_v40  ;;  %v4171_v23 = vadd.f32 %v4167_v16, %v4158_v12  ;;  %v4219_v60 = vmul.f32 %v8529_v58, %v8468_v8  ;;  %v8554_v40 = vld [vmem:[#allocation13 + $0x31] sm:$0xff]  ;;  %v8557_v15 = vld [vmem:[%s8958_s2 + $0x10] ss:$0 sm:$0xff] }
 0x78b   : > { %v4105_v28 = vmul.f32 %v8454_v62, %v8533_v5  ;;  %v4143_v11 = vmul.f32 %v8472_v63, %v8513_v21  ;;  %v4096_v51 = vadd.f32 %v4092_v4, %v4083_v55  ;;  %v4168_v19 = vmul.f32 %v8486_v25, %v8483_v34  ;;  %v8610_v4 = vld [vmem:[#allocation13 + $0x2a] sm:$0xff] }
 0x78c   : > { %v4120_v0 = vadd.f32 %v4116_v37, %v4107_v31  ;;  %v4108_v41 = vadd.f32 %v4104_v45, %v4095_v22  ;;  %v4184_v10 = vadd.f32 %v4180_v18, %v4171_v23  ;;  %v4118_v62 = vmul.f32 %v8459_v48, %v8542_v26 }
 0x78d   : > { %v4156_v37 = vmul.f32 %v8478_v57, %v8524_v47  ;;  %v8565_v16 = vmul.f32 %v8394_v56, %v8529_v58  ;;  %v4109_v12 = vadd.f32 %v4105_v28, %v4096_v51  ;;  %v4181_v22 = vmul.f32 %v8495_v36, %v8492_v9 }
 0x78e   : > { %v4133_v3 = vadd.f32 %v4129_v32, %v4120_v0  ;;  %v4121_v42 = vadd.f32 %v4117_v27, %v4108_v41  ;;  %v4197_v39 = vadd.f32 %v4193_v53, %v4184_v10  ;;  %v8572_v32 = vld [vmem:[%s8958_s2 + $0x11] ss:$0 sm:$0xff]  ;;  %v4131_v48 = vmul.f32 %v8464_v50, %v8550_v13  ;;  %v8589_v50 = vld [vmem:[%s8958_s2 + $0x12] ss:$0 sm:$0xff] }
 0x78f   : > { %v4169_v45 = vmul.f32 %v8486_v25, %v8533_v5  ;;  %v8580_v0 = vmul.f32 %v8557_v15, %v8554_v40  ;;  %v4122_v23 = vadd.f32 %v4118_v62, %v4109_v12  ;;  %v4232_v53 = vmul.f32 %v8557_v15, %v8483_v34 }
 0x790   : > { %v4146_v44 = vadd.f32 %v4142_v33, %v4133_v3  ;;  %v4134_v35 = vadd.f32 %v4130_v54, %v4121_v42  ;;  %v4210_v49 = vadd.f32 %v4206_v30, %v4197_v39  ;;  %v4194_v33 = vmul.f32 %v8507_v7, %v8504_v61  ;;  %v8602_v42 = vld [vmem:[%s8958_s2 + $0x13] ss:$0 sm:$0xff] }
 0x791   : > { %v4144_v41 = vmul.f32 %v8472_v63, %v8567_v24  ;;  %v4182_v3 = vmul.f32 %v8495_v36, %v8542_v26  ;;  %v4207_v10 = vmul.f32 %v8518_v20, %v8513_v21  ;;  %v4135_v17 = vadd.f32 %v4131_v48, %v4122_v23  ;;  %v4201_v48 = vld [vmem:[#allocation13 + $0x2c] sm:$0xff] }
 0x792   : > { %v4159_v6 = vadd.f32 %v4155_v46, %v4146_v44  ;;  %v4147_v8 = vadd.f32 %v4143_v11, %v4134_v35  ;;  %v4223_v31 = vadd.f32 %v4219_v60, %v4210_v49  ;;  %v4245_v34 = vmul.f32 %v8572_v32, %v8492_v9  ;;  %v6402_v35 = vld [vmem:[%s8958_s2 + $0x14] ss:$0 sm:$0xff] }
 0x793   : > { %v4157_v63 = vmul.f32 %v8478_v57, %v8582_v1  ;;  %v4195_v44 = vmul.f32 %v8507_v7, %v8550_v13  ;;  %v4220_v39 = vmul.f32 %v8529_v58, %v8524_v47  ;;  %v4148_v55 = vadd.f32 %v4144_v41, %v4135_v17  ;;  %v4240_v41 = vld [vmem:[#allocation13 + $0x32] sm:$0xff] }
 0x794   : > { %v4172_v43 = vadd.f32 %v4168_v19, %v4159_v6  ;;  %v4160_v18 = vadd.f32 %v4156_v37, %v4147_v8  ;;  %v4236_v30 = vadd.f32 %v4232_v53, %v4223_v31  ;;  %v4258_v9 = vmul.f32 %v8589_v50, %v8504_v61  ;;  %v8621_v19 = vld [vmem:[#allocation13 + $0x2b] sm:$0xff]  ;;  %v8626_v37 = vld [vmem:[%s8958_s2 + $0x15] ss:$0 sm:$0xff] }
 0x795   : > { %v4170_v57 = vmul.f32 %v8486_v25, %v8597_v52  ;;  %v4208_v6 = vmul.f32 %v8518_v20, %v8567_v24  ;;  %v4233_v49 = vmul.f32 %v8557_v15, %v8533_v5  ;;  %v4161_v51 = vadd.f32 %v4157_v63, %v4148_v55 }
 0x796   : > { %v4185_v38 = vadd.f32 %v4181_v22, %v4172_v43  ;;  %v4173_v27 = vadd.f32 %v4169_v45, %v4160_v18  ;;  %v4249_v28 = vadd.f32 %v4245_v34, %v4236_v30  ;;  %v4271_v61 = vmul.f32 %v8602_v42, %v8513_v21  ;;  %v8636_v21 = vld [vmem:[%s8958_s2 + $0x16] ss:$0 sm:$0xff] }
 0x797   : > { %v4183_v25 = vmul.f32 %v8495_v36, %v8610_v4  ;;  %v4221_v12 = vmul.f32 %v8529_v58, %v8582_v1  ;;  %v4246_v43 = vmul.f32 %v8572_v32, %v8542_v26  ;;  %v4174_v22 = vadd.f32 %v4170_v57, %v4161_v51 }
 0x798   : > { %v4198_v46 = vadd.f32 %v4194_v33, %v4185_v38  ;;  %v4186_v54 = vadd.f32 %v4182_v3, %v4173_v27  ;;  %v4262_v8 = vadd.f32 %v4258_v9, %v4249_v28  ;;  %v4284_v23 = vmul.f32 %v6402_v35, %v8524_v47  ;;  %v4253_v28 = vld [vmem:[#allocation13 + $0x33] sm:$0xff] }
 0x799   : > { %v4196_v38 = vmul.f32 %v8507_v7, %v8621_v19  ;;  %v4234_v33 = vmul.f32 %v8557_v15, %v8597_v52  ;;  %v4259_v58 = vmul.f32 %v8589_v50, %v8550_v13  ;;  %v4187_v53 = vadd.f32 %v4183_v25, %v4174_v22  ;;  %v6407_v25 = vld [vmem:[%s8959_s0] ss:$0 sm:$0xff]  ;;  %s8966_s0 = sld [smem:[#allocation31_spill]] }
 0x79a   : > { %v4211_v60 = vadd.f32 %v4207_v10, %v4198_v46  ;;  %v4199_v11 = vadd.f32 %v4195_v44, %v4186_v54  ;;  %v4275_v45 = vadd.f32 %v4271_v61, %v4262_v8  ;;  %v4297_v47 = vmul.f32 %v8626_v37, %v8533_v5  ;;  %v8647_v10 = vld [vmem:[%s8958_s2 + $0x17] ss:$0 sm:$0xff]  ;;  %v6406_v44 = vld [vmem:[%s8958_s2 + $0x18] ss:$0 sm:$0xff] }
 0x79b   : > { %v4209_v17 = vmul.f32 %v8518_v20, %v4201_v48  ;;  %v4247_v46 = vmul.f32 %v8572_v32, %v8610_v4  ;;  %v4272_v15 = vmul.f32 %v8602_v42, %v8567_v24  ;;  %v4200_v30 = vadd.f32 %v4196_v38, %v4187_v53 }
 0x79c   : > { %v4224_v62 = vadd.f32 %v4220_v39, %v4211_v60  ;;  %v4212_v31 = vadd.f32 %v4208_v6, %v4199_v11  ;;  %v4288_v3 = vadd.f32 %v4284_v23, %v4275_v45  ;;  %v4310_v54 = vmul.f32 %v8636_v21, %v8542_v26 }
 0x79d   : > { %v4248_v5 = vmul.f32 %v8572_v32, %v4240_v41  ;;  %v4260_v20 = vmul.f32 %v8589_v50, %v8621_v19  ;;  %v4285_v55 = vmul.f32 %v6402_v35, %v8582_v1  ;;  %v4213_v60 = vadd.f32 %v4209_v17, %v4200_v30  ;;  %v4318_v17 = vld [vmem:[#allocation13 + $0x3b] sm:$0xff] }
 0x79e   : > { %v4237_v18 = vadd.f32 %v4233_v49, %v4224_v62  ;;  %v4225_v36 = vadd.f32 %v4221_v12, %v4212_v31  ;;  %v4301_v63 = vadd.f32 %v4297_v47, %v4288_v3  ;;  %v4323_v11 = vmul.f32 %v8647_v10, %v8550_v13  ;;  %v4266_v62 = vld [vmem:[#allocation13 + $0x34] sm:$0xff]  ;;  %v4334_v30 = vld [vmem:[#allocation13 + $0x3c] sm:$0xff] }
 0x79f   : > { %v4273_v26 = vmul.f32 %v8602_v42, %v4201_v48  ;;  %v4286_v49 = vmul.f32 %v8394_v56, %v6402_v35  ;;  %v4298_v32 = vmul.f32 %v8626_v37, %v8597_v52  ;;  %v4226_v51 = vadd.f32 %v8565_v16, %v4213_v60 }
 0x7a0   : > { %v4250_v27 = vadd.f32 %v4246_v43, %v4237_v18  ;;  %v4238_v7 = vadd.f32 %v4234_v33, %v4225_v36  ;;  %v4314_v57 = vadd.f32 %v4310_v54, %v4301_v63  ;;  %v4339_v61 = vmul.f32 %v6406_v44, %v8567_v24  ;;  %v4292_v36 = vld [vmem:[#allocation13 + $0x39] sm:$0xff] }
 0x7a1   : > { %v4261_v31 = vmul.f32 %v8589_v50, %v4253_v28  ;;  %v4299_v13 = vmul.f32 %v8626_v37, %v8554_v40  ;;  %v4239_v43 = vadd.f32 %v8580_v0, %v4226_v51  ;;  %v4311_v52 = vmul.f32 %v8636_v21, %v8610_v4  ;;  %v4305_v4 = vld [vmem:[#allocation13 + $0x3a] sm:$0xff] }
 0x7a2   : > { %v4263_v34 = vadd.f32 %v4259_v58, %v4250_v27  ;;  %v4251_v39 = vadd.f32 %v4247_v46, %v4238_v7  ;;  %v4327_v1 = vadd.f32 %v4323_v11, %v4314_v57  ;;  %v4274_v16 = vmul.f32 %v8602_v42, %v4266_v62 }
 0x7a3   : > { %v4312_v45 = vmul.f32 %v8636_v21, %v4240_v41  ;;  %v4252_v24 = vadd.f32 %v4248_v5, %v4239_v43  ;;  %v4324_v50 = vmul.f32 %v8647_v10, %v8621_v19  ;;  %v4325_v0 = vmul.f32 %v8647_v10, %v4253_v28 }
 0x7a4   : > { %v4276_v9 = vadd.f32 %v4272_v15, %v4263_v34  ;;  %v4264_v6 = vadd.f32 %v4260_v20, %v4251_v39  ;;  %v4343_v22 = vadd.f32 %v4339_v61, %v4327_v1  ;;  %v4340_v53 = vmul.f32 %v6406_v44, %v4201_v48  ;;  %v7166_v1 = vld [vmem:[%s8956_s28 + $0x30] sm:$0xff]   ;;  %v7167_v61 = vld [vmem:[%s8956_s28 + $0x38] sm:$0xff]  }
 0x7a5   : > { %v4265_v33 = vadd.f32 %v4261_v31, %v4252_v24  ;;  %v4341_v42 = vmul.f32 %v6406_v44, %v4266_v62  ;;  %v4300_v41 = vmul.f32 %v8626_v37, %v4292_v36  ;;  %v4313_v19 = vmul.f32 %v8636_v21, %v4305_v4  ;;  %6989 = vmatpush3.bf16.msra.mxu1 %v7166_v1  ;;  %v7171_v24 = vld [vmem:[%s8961_s15 + $0x18] sm:$0xff]   ;;  %v7178_v36 = vld [vmem:[%s8962_s16 + $0x10] sm:$0xff]   ;;  %v7181_v4 = vld [vmem:[%s8962_s16 + $0x28] sm:$0xff]  }
 0x7a6   : > { %v4289_v8 = vadd.f32 %v4285_v55, %v4276_v9  ;;  %v4277_v12 = vadd.f32 %v4273_v26, %v4264_v6  ;;  %v4353_v38 = vadd.f32 %v6407_v25, %v4343_v22  ;;  %v4326_v54 = vmul.f32 %v8647_v10, %v4318_v17  ;;  %6990 = vmatprep.subr.bf16.mxu1 %v8394_v56 }
 0x7a7   : > { %v4278_v3 = vadd.f32 %v4274_v16, %v4265_v33  ;;  %v4342_v20 = vmul.f32 %v6406_v44, %v4334_v30  ;;  %v7168_v16 = vld [vmem:[%s8961_s15] sm:$0xff]   ;;  %v7174_v33 = vld [vmem:[%s8961_s15 + $0x30] sm:$0xff]  }
 0x7a8   : > { %v4302_v35 = vadd.f32 %v4298_v32, %v4289_v8  ;;  %v4290_v18 = vadd.f32 %v4286_v49, %v4277_v12  ;;  %4357 = vst [vmem:[#allocation14] sm:$0xff] %v4353_v38  ;;  %v7172_v38 = vld [vmem:[%s8961_s15 + $0x20] sm:$0xff]  }
 0x7a9   : > { %v4291_v46 = vadd.f32 %v4286_v49, %v4278_v3  ;;  %6991 = vmatpush3.bf16.msra.mxu1 %v7167_v61  ;;  %v4869_v61 = vld [vmem:[%s8965_s1] sm:$0xff] }
 0x7aa   : > { %v4315_v23 = vadd.f32 %v4311_v52, %v4302_v35  ;;  %v4303_v40 = vadd.f32 %v4299_v13, %v4290_v18  ;;  %7016 = vmatprep.subr.bf16.mxu1 %v8394_v56  ;;  %v7169_v18 = vld [vmem:[%s8961_s15 + $0x8] sm:$0xff]  }
 0x7ab   : > { %v4304_v63 = vadd.f32 %v4300_v41, %v4291_v46 }
 0x7ac   : > { %v4328_v58 = vadd.f32 %v4324_v50, %v4315_v23  ;;  %v4316_v27 = vadd.f32 %v4312_v45, %v4303_v40  ;;  %v7170_v45 = vld [vmem:[%s8961_s15 + $0x10] sm:$0xff]   ;;  %v7176_v23 = vld [vmem:[%s8962_s16] sm:$0xff]   ;;  %v7177_v50 = vld [vmem:[%s8962_s16 + $0x8] sm:$0xff]  }
 0x7ad   : > { %v4317_v39 = vadd.f32 %v4313_v19, %v4304_v63  ;;  %v7173_v40 = vld [vmem:[%s8961_s15 + $0x28] sm:$0xff]  }
 0x7ae   : > { %v4344_v47 = vadd.f32 %v4340_v53, %v4328_v58  ;;  %v4329_v7 = vadd.f32 %v4325_v0, %v4316_v27  ;;  %v7179_v0 = vld [vmem:[%s8962_s16 + $0x18] sm:$0xff]   ;;  %v7180_v58 = vld [vmem:[%s8962_s16 + $0x20] sm:$0xff]  }
 0x7af   : > { %v4361_v5 = vld [vmem:[#allocation14] sm:$0xf]  ;;  %v4330_v37 = vadd.f32 %v4326_v54, %v4317_v39  ;;  %v7175_v53 = vld [vmem:[%s8961_s15 + $0x38] sm:$0xff]   ;;  %v4503_v27 = vld [vmem:[%s8963_s22] sm:$0x1] }
 0x7b0   : > { %v4354_v15 = vadd.f32 %v6407_v25, %v4344_v47  ;;  %v4345_v34 = vadd.f32 %v4341_v42, %v4329_v7  ;;  %4362 = vst [vmem:[#allocation15] sm:$0xf] %v4361_v5 }
 0x7b1   : > { %v4346_v55 = vadd.f32 %v4342_v20, %v4330_v37 }
 0x7b2   : > { %4358 = vst [vmem:[#allocation14 + $0x8] sm:$0xff] %v4354_v15  ;;  %v4355_v48 = vadd.f32 %v6407_v25, %v4345_v34 }
 0x7b3   : > { %v4356_v28 = vadd.f32 %v6407_v25, %v4346_v55  ;;  %v4396_v25 = vld [vmem:[%s8960_s11] sm:$0x1]  ;;  %s6284_s11 = sshll.u32 %s8970_s10, 3 }
 0x7b4   : > { %4359 = vst [vmem:[#allocation14 + $0x10] sm:$0xff] %v4355_v48  ;;  %s1014_s22 = scalar_lea.vmem %s7493_s30, %s6284_s11 }
 0x7b5   : > { %4360 = vst [vmem:[#allocation14 + $0x18] sm:$0xff] %v4356_v28 }
 0x7b9   : > { %v4363_v60 = vld [vmem:[#allocation14 + $0x8] sm:$0xf] }
 0x7ba   : > { %4364 = vst [vmem:[#allocation15 + $0x4] sm:$0xf] %v4363_v60 }
 0x7bb   : > { %v4365_v21 = vld [vmem:[#allocation14 + $0x10] sm:$0xf] }
 0x7bc   : > { %4366 = vst [vmem:[#allocation15 + $0x8] sm:$0xf] %v4365_v21  ;;  %v4367_v9 = vld [vmem:[#allocation14 + $0x18] sm:$0xf] }
 0x7bd   : > { %4368 = vst [vmem:[#allocation15 + $0xc] sm:$0xf] %v4367_v9 }
 0x7c1   : > { %v8684_v10 = vld [vmem:[#allocation15] sm:$0xff] }
 0x7c4   : > { %v8686_v57 = vld [vmem:[#allocation15 + $0x8] sm:$0xff] }
 0x7c5   : > { %v4371_v44 = vadd.f32 %v8686_v57, %v8684_v10 }
 0x7c7   : > { %v4372_v11 = vrot.slane %v4371_v44, 4 }
 0x7c9   : > { %v4373_v6 = vadd.f32 %v4372_v11, %v4371_v44  ;;  %v6424_v44 = vld [vmem:[%s8964_s23] ss:$0 sm:$0xff] }
 0x7cb   : > { %v4374_v26 = vrot.slane %v4373_v6, 2 }
 0x7cd   : > { %v4375_v49 = vadd.f32 %v4374_v26, %v4373_v6 }
 0x7cf   : > { %v4376_v32 = vrot.slane %v4375_v49, 1 }
 0x7d1   : > { %v4377_v51 = vadd.f32 %v4376_v32, %v4375_v49 }
 0x7d3   : > { %v4378_v62 = vmul.f32 0.0625, %v4377_v51 }
 0x7d5   : > { %v4379_v8 = vpack.c.bf16 %v4378_v62, %v4378_v62 }
 0x7d7   : > { %6973 = vmatmul.mubr.bf16.vlgmr.msra.gmra.mrb[44].mxu0 %v4379_v8 }
 0x7d8   : > { %7012 = vmatprep.mubr.msk.bf16.mxu0 %vm7318_vm0, %v8394_v56  ;;  %6997 = vmatpush3.bf16.msra.mxu0 %v7168_v16 }
 0x7d9   : > { %6998 = vmatprep.subr.bf16.mxu0 %v8394_v56 }
 0x7dc   : > { %6999 = vmatpush3.bf16.msra.mxu0 %v7169_v18  ;;  %v4882_v18 = vld [vmem:[%s8965_s1 + $0x68] sm:$0xff] }
 0x7dd   : > { %7000 = vmatprep.subr.bf16.mxu0 %v8394_v56 }
 0x7e0   : > { %7001 = vmatpush3.bf16.msra.mxu0 %v7170_v45  ;;  %v4885_v45 = vld [vmem:[%s8965_s1 + $0x80] sm:$0xff] }
 0x7e1   : > { %7002 = vmatprep.subr.bf16.mxu0 %v8394_v56 }
 0x7e4   : > { %7003 = vmatpush3.bf16.msra.mxu0 %v7171_v24  ;;  %v4889_v24 = vld [vmem:[%s8965_s1 + $0xa0] sm:$0xff] }
 0x7e5   : > { %7004 = vmatprep.subr.bf16.mxu0 %v8394_v56 }
 0x7e8   : > { %7005 = vmatpush3.bf16.msra.mxu0 %v7172_v38 }
 0x7e9   : > { %7006 = vmatprep.subr.bf16.mxu0 %v8394_v56 }
 0x7ec   : > { %7007 = vmatpush3.bf16.msra.mxu0 %v7173_v40  ;;  %v4886_v40 = vld [vmem:[%s8965_s1 + $0x88] sm:$0xff] }
 0x7ed   : > { %7008 = vmatprep.subr.bf16.mxu0 %v8394_v56 }
 0x7f0   : > { %7009 = vmatpush3.bf16.msra.mxu0 %v7174_v33  ;;  %v4893_v33 = vld [vmem:[%s8965_s1 + $0xc0] sm:$0xff] }
 0x7f1   : > { %7010 = vmatprep.subr.bf16.mxu0 %v8394_v56 }
 0x7f4   : > { %7011 = vmatpush3.bf16.msra.mxu0 %v7175_v53  ;;  %v4897_v53 = vld [vmem:[%s8965_s1 + $0xe0] sm:$0xff] }
 0x8aa   : > { %v4479_v31 = vpop.f32.mrb[44].mxu0 }
 0x8ab   : > { %v4480_v12 = vadd.f32 %v4479_v31, %v4396_v25  ;;  %v6974_v13 = vpop.f32.mrb[45].mxu0  ;;  %v4870_v25 = vld [vmem:[%s8965_s1 + $0x8] sm:$0xff] }
 0x8ac   : > { %v4482_v43 = vpop.f32.mrb[46].mxu0  ;;  %v4874_v13 = vld [vmem:[%s8965_s1 + $0x28] sm:$0xff] }
 0x8ad   : > { %v4485_v35 = vmax.f32 %v4480_v12, 0.0  ;;  %v6975_v52 = vpop.f32.mrb[47].mxu0  ;;  %v6444_v43 = vcombine.low %v4870_v25, %v4874_v13 }
 0x8ae   : > { %v4878_v52 = vld [vmem:[%s8965_s1 + $0x48] sm:$0xff] }
 0x8af   : > { %v4486_v22 = vpack.c.bf16 %v4485_v35, %v4485_v35  ;;  %v6445_v35 = vcombine.high %v4870_v25, %v4874_v13  ;;  %v6453_v38 = vcombine.high %v4878_v52, %v4882_v18  ;;  %v4930_v25 = vld [vmem:[%s8965_s1 + $0x1e8] sm:$0xff] }
 0x8b1   : > { %6993 = vmatmul.mubr.bf16.vlgmr.msra.gmra.mrb[20].mxu1 %v4486_v22 }
 0x8b2   : > { %7032 = vmatprep.mubr.msk.bf16.mxu1 %vm7318_vm0, %v8394_v56  ;;  %7017 = vmatpush3.bf16.msra.mxu1 %v7176_v23  ;;  %v7319_v23 = vmov 0  }
 0x8b3   : > { %7018 = vmatprep.subr.bf16.mxu1 %v8394_v56 }
 0x8b6   : > { %7019 = vmatpush3.bf16.msra.mxu1 %v7177_v50  ;;  %v6452_v50 = vcombine.low %v4878_v52, %v4882_v18 }
 0x8b7   : > { %7020 = vmatprep.subr.bf16.mxu1 %v8394_v56 }
 0x8ba   : > { %7021 = vmatpush3.bf16.msra.mxu1 %v7178_v36  ;;  %v6459_v36 = vcombine.high %v4885_v45, %v4889_v24 }
 0x8bb   : > { %7022 = vmatprep.subr.bf16.mxu1 %v8394_v56 }
 0x8be   : > { %7023 = vmatpush3.bf16.msra.mxu1 %v7179_v0  ;;  %v4890_v0 = vld [vmem:[%s8965_s1 + $0xa8] sm:$0xff] }
 0x8bf   : > { %7024 = vmatprep.subr.bf16.mxu1 %v8394_v56 }
 0x8c2   : > { %7025 = vmatpush3.bf16.msra.mxu1 %v7180_v58  ;;  %v6461_v58 = vcombine.high %v4886_v40, %v4890_v0 }
 0x8c3   : > { %7026 = vmatprep.subr.bf16.mxu1 %v8394_v56 }
 0x8c6   : > { %7027 = vmatpush3.bf16.msra.mxu1 %v7181_v4  ;;  %v4894_v4 = vld [vmem:[%s8965_s1 + $0xc8] sm:$0xff] }
 0x8c7   : > { %7028 = vmatprep.subr.bf16.mxu1 %v8394_v56 }
 0x984   : > { %v4586_v42 = vpop.f32.mrb[20].mxu1 }
 0x985   : > { %v4587_v3 = vadd.f32 %v4586_v42, %v4503_v27  ;;  %v6994_v41 = vpop.f32.mrb[21].mxu1  ;;  %v4898_v27 = vld [vmem:[%s8965_s1 + $0xe8] sm:$0xff]  ;;  %v6458_v42 = vcombine.low %v4885_v45, %v4889_v24 }
 0x986   : > { %v4589_v47 = vpop.f32.mrb[22].mxu1  ;;  %v6467_v41 = vcombine.high %v4893_v33, %v4897_v53 }
 0x987   : > { %v4592_v17 = vadd.f32 3.0, %v4587_v3  ;;  %v6995_v7 = vpop.f32.mrb[23].mxu1  ;;  %v6460_v3 = vcombine.low %v4886_v40, %v4890_v0  ;;  %v6469_v47 = vcombine.high %v4894_v4, %v4898_v27 }
 0x988   : > { %v4905_v7 = vld [vmem:[%s8965_s1 + $0x120] sm:$0xff] }
 0x989   : > { %v4593_v46 = vmax.f32 %v4592_v17, 0.0  ;;  %v4901_v17 = vld [vmem:[%s8965_s1 + $0x100] sm:$0xff] }
 0x98b   : > { %v4594_v19 = vmin.f32 %v4593_v46, 6.0  ;;  %v4902_v46 = vld [vmem:[%s8965_s1 + $0x108] sm:$0xff] }
 0x98d   : > { %v4595_v15 = vmul.f32 0.16666667, %v4594_v19  ;;  %v4906_v19 = vld [vmem:[%s8965_s1 + $0x128] sm:$0xff] }
 0x98f   : > { %v4599_v30 = vrot.slane %v4595_v15, %v8222_v29  ;;  %v6466_v15 = vcombine.low %v4893_v33, %v4897_v53 }
 0x991   : > { %v4600_v34 = vmul.f32 %v4599_v30, %v8684_v10  ;;  %v4601_v63 = vmul.f32 %v4599_v30, %v8686_v57  ;;  %v7182_v10 = vld [vmem:[%s8962_s16 + $0x30] sm:$0xff]   ;;  %v7183_v57 = vld [vmem:[%s8962_s16 + $0x38] sm:$0xff]   ;;  %v6468_v30 = vcombine.low %v4894_v4, %v4898_v27 }
 0x992   : > { %7029 = vmatpush3.bf16.msra.mxu1 %v7182_v10  ;;  %v6476_v10 = vcombine.low %v4902_v46, %v4906_v19 }
 0x993   : > { %v4602_v54 = vadd.f32 3.0, %v4600_v34  ;;  %v4603_v48 = vadd.f32 3.0, %v4601_v63  ;;  %7030 = vmatprep.subr.bf16.mxu1 %v8394_v56  ;;  %v4873_v56 = vld [vmem:[%s8965_s1 + $0x20] sm:$0xff] }
 0x994   : > { %v6442_v31 = vcombine.low %v4869_v61, %v4873_v56  ;;  %v6443_v12 = vcombine.high %v4869_v61, %v4873_v56  ;;  %v4929_v61 = vld [vmem:[%s8965_s1 + $0x1e0] sm:$0xff]  ;;  %v4926_v56 = vld [vmem:[%s8965_s1 + $0x1c8] sm:$0xff] }
 0x995   : > { %v4604_v5 = vmax.f32 %v4602_v54, 0.0  ;;  %v4605_v39 = vmax.f32 %v4603_v48, 0.0  ;;  %v8760_v54 = vld [vmem:[%s8965_s1 + $0x10] sm:$0xff] }
 0x996   : > { %7031 = vmatpush3.bf16.msra.mxu1 %v7183_v57  ;;  %5295 = vmatprep.subr.bf16.mxu0 %v6443_v12  ;;  %v8763_v48 = vld [vmem:[%s8965_s1 + $0x30] sm:$0xff] }
 0x997   : > { %v4606_v20 = vmin.f32 %v4604_v5, 6.0  ;;  %v4607_v37 = vmin.f32 %v4605_v39, 6.0  ;;  %5336 = vmatprep.subr.bf16.mxu1 %v6445_v35  ;;  %v6477_v5 = vcombine.high %v4902_v46, %v4906_v19  ;;  %v4913_v39 = vld [vmem:[%s8965_s1 + $0x160] sm:$0xff] }
 0x999   : > { %v4608_v55 = vmul.f32 %v4606_v20, %v4600_v34  ;;  %v4609_v60 = vmul.f32 %v4607_v37, %v4601_v63  ;;  %v6475_v34 = vcombine.high %v4901_v17, %v4905_v7  ;;  %v4909_v63 = vld [vmem:[%s8965_s1 + $0x140] sm:$0xff]  ;;  %v6446_v20 = vcombine.low %v8760_v54, %v8763_v48  ;;  %v8769_v37 = vld [vmem:[%s8965_s1 + $0x18] sm:$0xff] }
 0x99a   : > { %v6483_v57 = vcombine.high %v4909_v63, %v4913_v39 }
 0x99b   : > { %v4610_v28 = vmul.f32 0.16666667, %v4608_v55  ;;  %v4611_v21 = vmul.f32 0.16666667, %v4609_v60  ;;  %v8772_v55 = vld [vmem:[%s8965_s1 + $0x38] sm:$0xff]  ;;  %v4910_v60 = vld [vmem:[%s8965_s1 + $0x148] sm:$0xff] }
 0x99c   : > { %v6449_v52 = vcombine.high %v8769_v37, %v8772_v55 }
 0x99d   : > { %4612 = vst [vmem:[#allocation15] sm:$0xff] %v4610_v28  ;;  %4613 = vst [vmem:[#allocation15 + $0x8] sm:$0xff] %v4611_v21  ;;  %v4616_v9 = vpack.c.bf16 %v4611_v21, %v4610_v28  ;;  %v4914_v28 = vld [vmem:[%s8965_s1 + $0x168] sm:$0xff]  ;;  %v6448_v21 = vcombine.low %v8769_v37, %v8772_v55  ;;  %v4903_v55 = vld [vmem:[%s8965_s1 + $0x110] sm:$0xff] }
 0x99f   : > { %7013 = vmatmul.mubr.bf16.vlgmr.msra.gmra.mrb[48].mxu0 %v4616_v9  ;;  %v6474_v9 = vcombine.low %v4901_v17, %v4905_v7 }
 0x9a0   : > { %5296 = vmatpush1.bf16.msra.mxu0 %v6442_v31  ;;  %5327 = vmatprep.mubr.bf16.mxu0 %v7319_v23 }
 0xa72   : > { %v4722_v11 = vpop.f32.mrb[48].mxu0 }
 0xa73   : > { %v4723_v6 = vadd.f32 %v6424_v44, %v4722_v11  ;;  %v7014_v26 = vpop.f32.mrb[49].mxu0  ;;  %v4917_v11 = vld [vmem:[%s8965_s1 + $0x180] sm:$0xff] }
 0xa74   : > { %v4725_v49 = vpop.f32.mrb[50].mxu0  ;;  %v4918_v26 = vld [vmem:[%s8965_s1 + $0x188] sm:$0xff] }
 0xa75   : > { %v4726_v32 = vadd.f32 %v6424_v44, %v4725_v49  ;;  %v7015_v51 = vpop.f32.mrb[51].mxu0  ;;  %v4731_v62 = vadd.f32 %v4723_v6, %v8388_v59  ;;  %v4877_v59 = vld [vmem:[%s8965_s1 + $0x40] sm:$0xff]  ;;  %v6485_v44 = vcombine.high %v4910_v60, %v4914_v28  ;;  %v4922_v49 = vld [vmem:[%s8965_s1 + $0x1a8] sm:$0xff] }
 0xa76   : > { %v4921_v6 = vld [vmem:[%s8965_s1 + $0x1a0] sm:$0xff]  ;;  %v6484_v51 = vcombine.low %v4910_v60, %v4914_v28  ;;  %v6492_v12 = vcombine.low %v4918_v26, %v4922_v49 }
 0xa77   : > { %v4732_v8 = vadd.f32 %v4726_v32, %v8390_v14  ;;  %v4881_v14 = vld [vmem:[%s8965_s1 + $0x60] sm:$0xff]  ;;  %v6482_v32 = vcombine.low %v4909_v63, %v4913_v39  ;;  %v6490_v31 = vcombine.low %v4917_v11, %v4921_v6  ;;  %v4880_v63 = vld [vmem:[%s8965_s1 + $0x58] sm:$0xff] }
 0xa78   : > { %v6450_v22 = vcombine.low %v4877_v59, %v4881_v14  ;;  %v6451_v16 = vcombine.high %v4877_v59, %v4881_v14  ;;  %v6500_v59 = vcombine.low %v4926_v56, %v4930_v25  ;;  %v6447_v14 = vcombine.high %v8760_v54, %v8763_v48 }
 0xa79   : > { %v4737_v1 = vpack.c.bf16 %v4732_v8, %v4731_v62  ;;  %v6491_v62 = vcombine.high %v4917_v11, %v4921_v6  ;;  %v6493_v8 = vcombine.high %v4918_v26, %v4922_v49  ;;  %v4892_v11 = vld [vmem:[%s8965_s1 + $0xb8] sm:$0xff] }
 0xa7a   : > { %5297 = vmatprep.subr.bf16.mxu0 %v6451_v16 }
 0xa7b   : > { %7033 = vmatmul.mubr.bf16.vlgmr.msra.gmra.mrb[24].mxu1 %v4737_v1  ;;  %5298 = vmatpush1.bf16.msra.mxu0 %v6450_v22  ;;  %v4925_v1 = vld [vmem:[%s8965_s1 + $0x1c0] sm:$0xff] }
 0xa7c   : > { %5337 = vmatpush1.bf16.msra.mxu1 %v6444_v43  ;;  %5368 = vmatprep.mubr.bf16.mxu1 %v7319_v23  ;;  %v6499_v13 = vcombine.high %v4925_v1, %v4929_v61  ;;  %v6501_v43 = vcombine.high %v4926_v56, %v4930_v25  ;;  %v6498_v35 = vcombine.low %v4925_v1, %v4929_v61  ;;  %v6433_v22 = vld [vmem:[%s8966_s0] ss:$0 sm:$0xff]  ;;  %v4900_v1 = vld [vmem:[%s8965_s1 + $0xf8] sm:$0xff] }
 0xa7d   : > { %5338 = vmatprep.subr.bf16.mxu1 %v6453_v38  ;;  %5299 = vmatprep.subr.bf16.mxu0 %v6459_v36  ;;  %v4904_v61 = vld [vmem:[%s8965_s1 + $0x118] sm:$0xff] }
 0xa7e   : > { %v4908_v56 = vld [vmem:[%s8965_s1 + $0x138] sm:$0xff] }
 0xa7f   : > { %5300 = vmatpush1.bf16.msra.mxu0 %v6458_v42 }
 0xa80   : > { %5339 = vmatpush1.bf16.msra.mxu1 %v6452_v50  ;;  %5301 = vmatprep.subr.bf16.mxu0 %v6467_v41 }
 0xa81   : > { %5340 = vmatprep.subr.bf16.mxu1 %v6461_v58 }
 0xa83   : > { %5302 = vmatpush1.bf16.msra.mxu0 %v6466_v15 }
 0xa84   : > { %5341 = vmatpush1.bf16.msra.mxu1 %v6460_v3  ;;  %5303 = vmatprep.subr.bf16.mxu0 %v6475_v34  ;;  %v4883_v34 = vld [vmem:[%s8965_s1 + $0x70] sm:$0xff] }
 0xa85   : > { %5342 = vmatprep.subr.bf16.mxu1 %v6469_v47 }
 0xa87   : > { %5304 = vmatpush1.bf16.msra.mxu0 %v6474_v9 }
 0xa88   : > { %5343 = vmatpush1.bf16.msra.mxu1 %v6468_v30  ;;  %5305 = vmatprep.subr.bf16.mxu0 %v6483_v57  ;;  %v4879_v30 = vld [vmem:[%s8965_s1 + $0x50] sm:$0xff] }
 0xa89   : > { %5344 = vmatprep.subr.bf16.mxu1 %v6477_v5  ;;  %v4884_v5 = vld [vmem:[%s8965_s1 + $0x78] sm:$0xff]  ;;  %v6455_v28 = vcombine.high %v4879_v30, %v4883_v34  ;;  %v4891_v57 = vld [vmem:[%s8965_s1 + $0xb0] sm:$0xff]  ;;  %v6454_v6 = vcombine.low %v4879_v30, %v4883_v34  ;;  %v7188_v30 = vld [vmem:[%s7483_s6 + $0x48] sm:$0xff]  }
 0xa8a   : > { %v6457_v9 = vcombine.high %v4880_v63, %v4884_v5  ;;  %v6456_v26 = vcombine.low %v4880_v63, %v4884_v5  ;;  %v7189_v34 = vld [vmem:[%s7483_s6 + $0xc8] sm:$0xff]  }
 0xa8b   : > { %5306 = vmatpush1.bf16.msra.mxu0 %v6482_v32  ;;  %v7190_v63 = vld [vmem:[%s7483_s6 + $0x8] sm:$0xff]  }
 0xa8c   : > { %5345 = vmatpush1.bf16.msra.mxu1 %v6476_v10  ;;  %5307 = vmatprep.subr.bf16.mxu0 %v6491_v62  ;;  %v4887_v10 = vld [vmem:[%s8965_s1 + $0x90] sm:$0xff]  ;;  %v7191_v5 = vld [vmem:[%s7483_s6 + $0x88] sm:$0xff]  }
 0xa8d   : > { %5346 = vmatprep.subr.bf16.mxu1 %v6485_v44  ;;  %v4888_v44 = vld [vmem:[%s8965_s1 + $0x98] sm:$0xff]  ;;  %v6463_v49 = vcombine.high %v4887_v10, %v4891_v57  ;;  %v4899_v62 = vld [vmem:[%s8965_s1 + $0xf0] sm:$0xff]  ;;  %v6462_v54 = vcombine.low %v4887_v10, %v4891_v57 }
 0xa8e   : > { %v6465_v32 = vcombine.high %v4888_v44, %v4892_v11  ;;  %v6464_v48 = vcombine.low %v4888_v44, %v4892_v11  ;;  %v7195_v10 = vld [vmem:[%s7483_s6 + $0x90] sm:$0xff]   ;;  %v7197_v57 = vld [vmem:[%s7483_s6 + $0xd8] sm:$0xff]  }
 0xa8f   : > { %5308 = vmatpush1.bf16.msra.mxu0 %v6490_v31  ;;  %v7198_v44 = vld [vmem:[%s7483_s6 + $0x18] sm:$0xff]  }
 0xa90   : > { %5347 = vmatpush1.bf16.msra.mxu1 %v6484_v51  ;;  %5309 = vmatprep.subr.bf16.mxu0 %v6499_v13  ;;  %v4895_v51 = vld [vmem:[%s8965_s1 + $0xd0] sm:$0xff]  ;;  %v7199_v11 = vld [vmem:[%s7483_s6 + $0x98] sm:$0xff]  }
 0xa91   : > { %5348 = vmatprep.subr.bf16.mxu1 %v6493_v8  ;;  %v4896_v8 = vld [vmem:[%s8965_s1 + $0xd8] sm:$0xff]  ;;  %v6470_v25 = vcombine.low %v4895_v51, %v4899_v62  ;;  %v4911_v13 = vld [vmem:[%s8965_s1 + $0x150] sm:$0xff] }
 0xa92   : > { %v6473_v37 = vcombine.high %v4896_v8, %v4900_v1 }
 0xa93   : > { %5310 = vmatpush1.bf16.msra.mxu0 %v6498_v35  ;;  %v4912_v35 = vld [vmem:[%s8965_s1 + $0x158] sm:$0xff] }
 0xa94   : > { %5349 = vmatpush1.bf16.msra.mxu1 %v6492_v12  ;;  %5377 = vmatprep.subr.bf16.mxu0 %v6447_v14  ;;  %v6481_v12 = vcombine.high %v4904_v61, %v4908_v56 }
 0xa95   : > { %5350 = vmatprep.subr.bf16.mxu1 %v6501_v43  ;;  %v4915_v43 = vld [vmem:[%s8965_s1 + $0x170] sm:$0xff] }
 0xa98   : > { %5351 = vmatpush1.bf16.msra.mxu1 %v6500_v59  ;;  %v4916_v59 = vld [vmem:[%s8965_s1 + $0x178] sm:$0xff] }
 0xa99   : > { %5418 = vmatprep.subr.bf16.mxu1 %v6449_v52  ;;  %v6480_v52 = vcombine.low %v4904_v61, %v4908_v56  ;;  %v7214_v61 = vld [vmem:[%s7483_s6 + $0x38] sm:$0xff]  }
 0xa9a   : > { %v7215_v56 = vld [vmem:[%s7483_s6 + $0xb8] sm:$0xff]  }
 0xb4e   : > { %v4843_v16 = vpop.f32.mrb[24].mxu1 }
 0xb4f   : > { %v4844_v18 = vadd.f32 %v6433_v22, %v4843_v16  ;;  %v7034_v45 = vpop.f32.mrb[25].mxu1  ;;  %v6489_v16 = vcombine.high %v4912_v35, %v4916_v59 }
 0xb50   : > { %v4846_v24 = vpop.f32.mrb[26].mxu1  ;;  %v4923_v45 = vld [vmem:[%s8965_s1 + $0x1b0] sm:$0xff] }
 0xb51   : > { %v4850_v50 = vadd.f32 3.0, %v4844_v18  ;;  %v4847_v38 = vadd.f32 %v6433_v22, %v4846_v24  ;;  %v7035_v36 = vpop.f32.mrb[27].mxu1  ;;  %v6487_v22 = vcombine.high %v4911_v13, %v4915_v43  ;;  %v4920_v24 = vld [vmem:[%s8965_s1 + $0x198] sm:$0xff] }
 0xb52   : > { %v6488_v36 = vcombine.low %v4912_v35, %v4916_v59 }
 0xb53   : > { %v4852_v40 = vmax.f32 %v4850_v50, 0.0  ;;  %v4851_v0 = vadd.f32 3.0, %v4847_v38  ;;  %v4924_v50 = vld [vmem:[%s8965_s1 + $0x1b8] sm:$0xff] }
 0xb55   : > { %v4854_v33 = vmin.f32 %v4852_v40, 6.0  ;;  %v4853_v58 = vmax.f32 %v4851_v0, 0.0  ;;  %v6497_v0 = vcombine.high %v4920_v24, %v4924_v50 }
 0xb57   : > { %v4856_v53 = vmul.f32 %v4854_v33, %v4844_v18  ;;  %v4855_v4 = vmin.f32 %v4853_v58, 6.0  ;;  %v4919_v18 = vld [vmem:[%s8965_s1 + $0x190] sm:$0xff] }
 0xb58   : > { %v6495_v40 = vcombine.high %v4919_v18, %v4923_v45  ;;  %v4927_v33 = vld [vmem:[%s8965_s1 + $0x1d0] sm:$0xff] }
 0xb59   : > { %v4857_v27 = vmul.f32 %v4855_v4, %v4847_v38  ;;  %v4858_v42 = vmul.f32 0.16666667, %v4856_v53  ;;  %v6486_v38 = vcombine.low %v4911_v13, %v4915_v43  ;;  %v4931_v58 = vld [vmem:[%s8965_s1 + $0x1f0] sm:$0xff]  ;;  %v4928_v53 = vld [vmem:[%s8965_s1 + $0x1d8] sm:$0xff]  ;;  %v5261_v13 = vsub.s32 1, %v8219_v2 }
 0xb5a   : > { %v4932_v4 = vld [vmem:[%s8965_s1 + $0x1f8] sm:$0xff]  ;;  %v5269_v43 = vsub.s32 3, %v8219_v2 }
 0xb5b   : > { %v4859_v3 = vmul.f32 0.16666667, %v4857_v27  ;;  %v6494_v27 = vcombine.low %v4919_v18, %v4923_v45 }
 0xb5d   : > { %v4860_v41 = vadd.f32 %v4859_v3, %v4858_v42  ;;  %v6496_v42 = vcombine.low %v4920_v24, %v4924_v50  ;;  %v6503_v3 = vcombine.high %v4927_v33, %v4931_v58 }
 0xb5f   : > { %v4861_v47 = vrot.slane %v4860_v41, 4 }
 0xb61   : > { %v4862_v17 = vadd.f32 %v4861_v47, %v4860_v41  ;;  %v6505_v41 = vcombine.high %v4928_v53, %v4932_v4  ;;  %v6502_v47 = vcombine.low %v4927_v33, %v4931_v58 }
 0xb63   : > { %v4863_v7 = vrot.slane %v4862_v17, 2 }
 0xb65   : > { %v4864_v46 = vadd.f32 %v4863_v7, %v4862_v17  ;;  %v6504_v17 = vcombine.low %v4928_v53, %v4932_v4  ;;  %v7184_v7 = vld [vmem:[%s7483_s6 + $0x40] sm:$0xff]  }
 0xb67   : > { %v4865_v19 = vrot.slane %v4864_v46, 1 }
 0xb69   : > { %v4866_v15 = vadd.f32 %v4865_v19, %v4864_v46  ;;  %v7185_v46 = vld [vmem:[%s7483_s6 + $0xc0] sm:$0xff]  }
 0xb6a   : > { %v7186_v19 = vld [vmem:[%s7483_s6] sm:$0xff]  }
 0xb6b   : > { %v4867_v39 = vmul.f32 0.0625, %v4866_v15  ;;  %v7187_v15 = vld [vmem:[%s7483_s6 + $0x80] sm:$0xff]  }
 0xb6d   : > { %v8795_v60 = vpack.c.bf16 %v4867_v39, %v4867_v39  ;;  %v7192_v39 = vld [vmem:[%s7483_s6 + $0x50] sm:$0xff]  }
 0xb6f   : > { %5328 = vmatmul.mubr.bf16.vlgmr.msra.gmra.mrb[52].mxu0 %v8795_v60  ;;  %5369 = vmatmul.mubr.bf16.vlgmr.msra.gmra.mrb[28].mxu1 %v8795_v60 }
 0xb70   : > { %5378 = vmatpush1.bf16.msra.mxu0 %v6446_v20  ;;  %5419 = vmatpush1.bf16.msra.mxu1 %v6448_v21  ;;  %v6471_v20 = vcombine.high %v4895_v51, %v4899_v62  ;;  %v4907_v21 = vld [vmem:[%s8965_s1 + $0x130] sm:$0xff]  ;;  %v7204_v51 = vld [vmem:[%s7483_s6 + $0x68] sm:$0xff]  }
 0xb71   : > { %5379 = vmatprep.subr.bf16.mxu0 %v6455_v28  ;;  %5420 = vmatprep.subr.bf16.mxu1 %v6457_v9  ;;  %v6479_v31 = vcombine.high %v4903_v55, %v4907_v21  ;;  %v6478_v14 = vcombine.low %v4903_v55, %v4907_v21  ;;  %v7193_v28 = vld [vmem:[%s7483_s6 + $0xd0] sm:$0xff]   ;;  %v7205_v62 = vld [vmem:[%s7483_s6 + $0xe8] sm:$0xff]   ;;  %v7212_v55 = vld [vmem:[%s7483_s6 + $0x78] sm:$0xff]  }
 0xb72   : > { %5409 = vmatprep.mubr.bf16.mxu0 %v7319_v23  ;;  %5450 = vmatprep.mubr.bf16.mxu1 %v7319_v23  ;;  %v6472_v23 = vcombine.low %v4896_v8, %v4900_v1  ;;  %v7194_v9 = vld [vmem:[%s7483_s6 + $0x10] sm:$0xff]   ;;  %v7206_v8 = vld [vmem:[%s7483_s6 + $0x28] sm:$0xff]   ;;  %v7213_v21 = vld [vmem:[%s7483_s6 + $0xf8] sm:$0xff]  }
 0xb73   : > { %v7207_v1 = vld [vmem:[%s7483_s6 + $0xa8] sm:$0xff]  }
 0xb74   : > { %5380 = vmatpush1.bf16.msra.mxu0 %v6454_v6  ;;  %5421 = vmatpush1.bf16.msra.mxu1 %v6456_v26  ;;  %v7200_v6 = vld [vmem:[%s7483_s6 + $0x60] sm:$0xff]  }
 0xb75   : > { %5381 = vmatprep.subr.bf16.mxu0 %v6463_v49  ;;  %5422 = vmatprep.subr.bf16.mxu1 %v6465_v32  ;;  %v7201_v26 = vld [vmem:[%s7483_s6 + $0xe0] sm:$0xff]  }
 0xb76   : > { %v7202_v49 = vld [vmem:[%s7483_s6 + $0x20] sm:$0xff]  }
 0xb77   : > { %v7203_v32 = vld [vmem:[%s7483_s6 + $0xa0] sm:$0xff]  }
 0xb78   : > { %5382 = vmatpush1.bf16.msra.mxu0 %v6462_v54  ;;  %5423 = vmatpush1.bf16.msra.mxu1 %v6464_v48  ;;  %v7208_v54 = vld [vmem:[%s7483_s6 + $0x70] sm:$0xff]  }
 0xb79   : > { %5383 = vmatprep.subr.bf16.mxu0 %v6471_v20  ;;  %5424 = vmatprep.subr.bf16.mxu1 %v6473_v37  ;;  %v7209_v48 = vld [vmem:[%s7483_s6 + $0xf0] sm:$0xff]  }
 0xb7a   : > { %v7210_v20 = vld [vmem:[%s7483_s6 + $0x30] sm:$0xff]  }
 0xb7b   : > { %v7211_v37 = vld [vmem:[%s7483_s6 + $0xb0] sm:$0xff]  }
 0xb7c   : > { %5384 = vmatpush1.bf16.msra.mxu0 %v6470_v25  ;;  %5425 = vmatpush1.bf16.msra.mxu1 %v6472_v23  ;;  %v7216_v25 = vld [vmem:[%s7483_s6 + $0x140] sm:$0xff]  }
 0xb7d   : > { %5385 = vmatprep.subr.bf16.mxu0 %v6479_v31  ;;  %5426 = vmatprep.subr.bf16.mxu1 %v6481_v12  ;;  %v7217_v23 = vld [vmem:[%s7483_s6 + $0x1c0] sm:$0xff]   ;;  %v5265_v31 = vsub.s32 2, %v8219_v2 }
 0xb7e   : > { %v8869_v12 = vld [vmem:[%s7478_s12] sm:$0xff] }
 0xb7f   : > { %v5258_v35 = vrot.slane %v8869_v12, %v8222_v29  ;;  %v5266_v59 = vrot.slane %v8869_v12, %v5265_v31  ;;  %v7232_v31 = vld [vmem:[%s7483_s6 + $0x160] sm:$0xff]  }
 0xb80   : > { %5386 = vmatpush1.bf16.msra.mxu0 %v6478_v14  ;;  %5427 = vmatpush1.bf16.msra.mxu1 %v6480_v52  ;;  %v5262_v14 = vrot.slane %v8869_v12, %v5261_v13  ;;  %v5270_v52 = vrot.slane %v8869_v12, %v5269_v43  ;;  %v7233_v13 = vld [vmem:[%s7483_s6 + $0x1e0] sm:$0xff]  }
 0xb81   : > { %5387 = vmatprep.subr.bf16.mxu0 %v6487_v22  ;;  %5428 = vmatprep.subr.bf16.mxu1 %v6489_v16 }
 0xb84   : > { %5388 = vmatpush1.bf16.msra.mxu0 %v6486_v38  ;;  %5429 = vmatpush1.bf16.msra.mxu1 %v6488_v36 }
 0xb85   : > { %5389 = vmatprep.subr.bf16.mxu0 %v6495_v40  ;;  %5430 = vmatprep.subr.bf16.mxu1 %v6497_v0 }
 0xb88   : > { %5390 = vmatpush1.bf16.msra.mxu0 %v6494_v27  ;;  %5431 = vmatpush1.bf16.msra.mxu1 %v6496_v42 }
 0xb89   : > { %5391 = vmatprep.subr.bf16.mxu0 %v6503_v3  ;;  %5432 = vmatprep.subr.bf16.mxu1 %v6505_v41 }
 0xb8c   : > { %5392 = vmatpush1.bf16.msra.mxu0 %v6502_v47  ;;  %5433 = vmatpush1.bf16.msra.mxu1 %v6504_v17 }
 0xb8d   : > { %6692 = vmatprep.subr.bf16.mxu0 %v7184_v7  ;;  %6714 = vmatprep.subr.bf16.mxu1 %v7185_v46 }
 0xb8f   : > { %5410 = vmatmul.mubr.bf16.vlgmr.msra.gmra.mrb[56].mxu0 %v8795_v60  ;;  %5451 = vmatmul.mubr.bf16.vlgmr.msra.gmra.mrb[32].mxu1 %v8795_v60  ;;  %v7196_v60 = vld [vmem:[%s7483_s6 + $0x58] sm:$0xff]  }
 0xb90   : > { %6693 = vmatpush3.bf16.msra.mxu0 %v7186_v19  ;;  %6715 = vmatpush3.bf16.msra.mxu1 %v7187_v15 }
 0xb91   : > { %6694 = vmatprep.subr.bf16.mxu0 %v7188_v30  ;;  %6716 = vmatprep.subr.bf16.mxu1 %v7189_v34 }
 0xb94   : > { %6695 = vmatpush3.bf16.msra.mxu0 %v7190_v63  ;;  %6717 = vmatpush3.bf16.msra.mxu1 %v7191_v5 }
 0xb95   : > { %6696 = vmatprep.subr.bf16.mxu0 %v7192_v39  ;;  %6718 = vmatprep.subr.bf16.mxu1 %v7193_v28 }
 0xb98   : > { %6697 = vmatpush3.bf16.msra.mxu0 %v7194_v9  ;;  %6719 = vmatpush3.bf16.msra.mxu1 %v7195_v10 }
 0xb99   : > { %6698 = vmatprep.subr.bf16.mxu0 %v7196_v60  ;;  %6720 = vmatprep.subr.bf16.mxu1 %v7197_v57 }
 0xb9c   : > { %6699 = vmatpush3.bf16.msra.mxu0 %v7198_v44  ;;  %6721 = vmatpush3.bf16.msra.mxu1 %v7199_v11  ;;  %v7218_v44 = vld [vmem:[%s7483_s6 + $0x100] sm:$0xff]  }
 0xb9d   : > { %6700 = vmatprep.subr.bf16.mxu0 %v7200_v6  ;;  %6722 = vmatprep.subr.bf16.mxu1 %v7201_v26  ;;  %v7219_v11 = vld [vmem:[%s7483_s6 + $0x180] sm:$0xff]  }
 0xba0   : > { %6701 = vmatpush3.bf16.msra.mxu0 %v7202_v49  ;;  %6723 = vmatpush3.bf16.msra.mxu1 %v7203_v32  ;;  %v7220_v49 = vld [vmem:[%s7483_s6 + $0x148] sm:$0xff]  }
 0xba1   : > { %6702 = vmatprep.subr.bf16.mxu0 %v7204_v51  ;;  %6724 = vmatprep.subr.bf16.mxu1 %v7205_v62  ;;  %v7221_v32 = vld [vmem:[%s7483_s6 + $0x1c8] sm:$0xff]  }
 0xba2   : > { %v7222_v51 = vld [vmem:[%s7483_s6 + $0x108] sm:$0xff]  }
 0xba3   : > { %v7223_v62 = vld [vmem:[%s7483_s6 + $0x188] sm:$0xff]  }
 0xba4   : > { %6703 = vmatpush3.bf16.msra.mxu0 %v7206_v8  ;;  %6725 = vmatpush3.bf16.msra.mxu1 %v7207_v1  ;;  %v7224_v8 = vld [vmem:[%s7483_s6 + $0x150] sm:$0xff]  }
 0xba5   : > { %6704 = vmatprep.subr.bf16.mxu0 %v7208_v54  ;;  %6726 = vmatprep.subr.bf16.mxu1 %v7209_v48  ;;  %v7225_v1 = vld [vmem:[%s7483_s6 + $0x1d0] sm:$0xff]  }
 0xba6   : > { %v7226_v54 = vld [vmem:[%s7483_s6 + $0x110] sm:$0xff]  }
 0xba7   : > { %v7227_v48 = vld [vmem:[%s7483_s6 + $0x190] sm:$0xff]  }
 0xba8   : > { %6705 = vmatpush3.bf16.msra.mxu0 %v7210_v20  ;;  %6727 = vmatpush3.bf16.msra.mxu1 %v7211_v37  ;;  %v7228_v20 = vld [vmem:[%s7483_s6 + $0x158] sm:$0xff]  }
 0xba9   : > { %6706 = vmatprep.subr.bf16.mxu0 %v7212_v55  ;;  %6728 = vmatprep.subr.bf16.mxu1 %v7213_v21  ;;  %v7229_v37 = vld [vmem:[%s7483_s6 + $0x1d8] sm:$0xff]   ;;  %v5273_v55 = vsub.s32 4, %v8219_v2  ;;  %v5281_v21 = vsub.s32 6, %v8219_v2 }
 0xbab   : > { %v5274_v43 = vrot.slane %v8869_v12, %v5273_v55 }
 0xbac   : > { %6707 = vmatpush3.bf16.msra.mxu0 %v7214_v61  ;;  %6729 = vmatpush3.bf16.msra.mxu1 %v7215_v56  ;;  %v7230_v61 = vld [vmem:[%s7483_s6 + $0x118] sm:$0xff]  }
 0xbad   : > { %6736 = vmatprep.subr.bf16.mxu0 %v7216_v25  ;;  %6758 = vmatprep.subr.bf16.mxu1 %v7217_v23  ;;  %v7231_v56 = vld [vmem:[%s7483_s6 + $0x198] sm:$0xff]   ;;  %v5277_v25 = vsub.s32 5, %v8219_v2  ;;  %v5285_v23 = vsub.s32 7, %v8219_v2  ;;  %v7236_v2 = vld [vmem:[%s7483_s6 + $0x168] sm:$0xff]  }
 0xc42   : > { %v5329_v22 = vpop.f32.mrb[52].mxu0  ;;  %v5370_v16 = vpop.f32.mrb[28].mxu1 }
 0xc43   : > { %v5330_v18 = vadd.f32 %v5329_v22, %v5258_v35  ;;  %v5371_v45 = vadd.f32 %v5370_v16, %v5266_v59  ;;  %v5331_v24 = vpop.f32.mrb[53].mxu0  ;;  %v5372_v50 = vpop.f32.mrb[29].mxu1  ;;  %v5282_v35 = vrot.slane %v8869_v12, %v5281_v21  ;;  %v5278_v59 = vrot.slane %v8869_v12, %v5277_v25  ;;  %v7235_v22 = vld [vmem:[%s7483_s6 + $0x1a0] sm:$0xff]   ;;  %v7237_v16 = vld [vmem:[%s7483_s6 + $0x1e8] sm:$0xff]  }
 0xc44   : > { %v5332_v38 = vadd.f32 %v5331_v24, %v5262_v14  ;;  %v5373_v36 = vadd.f32 %v5372_v50, %v5270_v52  ;;  %v5333_v40 = vpop.f32.mrb[54].mxu0  ;;  %v5374_v0 = vpop.f32.mrb[30].mxu1  ;;  %v5286_v14 = vrot.slane %v8869_v12, %v5285_v23  ;;  %v7234_v52 = vld [vmem:[%s7483_s6 + $0x120] sm:$0xff]  }
 0xc45   : > { %v5459_v33 = vadd.f32 3.0, %v5330_v18  ;;  %v5461_v58 = vadd.f32 3.0, %v5371_v45  ;;  %v5334_v53 = vpop.f32.mrb[55].mxu0  ;;  %v5375_v4 = vpop.f32.mrb[31].mxu1  ;;  %v5635_v21 = vld [vmem:[%s7488_s27] sm:$0x1] }
 0xc46   : > { %v5460_v27 = vadd.f32 3.0, %v5332_v38  ;;  %v5462_v42 = vadd.f32 3.0, %v5373_v36  ;;  %v7239_v53 = vld [vmem:[%s7483_s6 + $0x1a8] sm:$0xff]  }
 0xc47   : > { %v5467_v3 = vmax.f32 %v5459_v33, 0.0  ;;  %v5469_v41 = vmax.f32 %v5461_v58, 0.0  ;;  %v7238_v58 = vld [vmem:[%s7483_s6 + $0x128] sm:$0xff]  }
 0xc48   : > { %v5468_v47 = vmax.f32 %v5460_v27, 0.0  ;;  %v5470_v17 = vmax.f32 %v5462_v42, 0.0 }
 0xc49   : > { %v5475_v7 = vmin.f32 %v5467_v3, 6.0  ;;  %v5477_v46 = vmin.f32 %v5469_v41, 6.0  ;;  %v7240_v41 = vld [vmem:[%s7483_s6 + $0x170] sm:$0xff]  }
 0xc4a   : > { %v5476_v19 = vmin.f32 %v5468_v47, 6.0  ;;  %v5478_v15 = vmin.f32 %v5470_v17, 6.0  ;;  %v7241_v47 = vld [vmem:[%s7483_s6 + $0x1f0] sm:$0xff]  }
 0xc4b   : > { %v5483_v30 = vmul.f32 %v5475_v7, %v5330_v18  ;;  %v5485_v34 = vmul.f32 %v5477_v46, %v5371_v45 }
 0xc4c   : > { %v5484_v63 = vmul.f32 %v5476_v19, %v5332_v38  ;;  %v5486_v5 = vmul.f32 %v5478_v15, %v5373_v36 }
 0xc4d   : > { %v5491_v39 = vmul.f32 0.16666667, %v5483_v30  ;;  %v5493_v28 = vmul.f32 0.16666667, %v5485_v34  ;;  %v7242_v34 = vld [vmem:[%s7483_s6 + $0x130] sm:$0xff]  }
 0xc4e   : > { %v5492_v9 = vmul.f32 0.16666667, %v5484_v63  ;;  %v5494_v10 = vmul.f32 0.16666667, %v5486_v5  ;;  %v7243_v63 = vld [vmem:[%s7483_s6 + $0x1b0] sm:$0xff]  }
 0xc4f   : > { %v5499_v6 = vpack.c.bf16 %v5491_v39, %v5491_v39  ;;  %v5501_v26 = vpack.c.bf16 %v5493_v28, %v5493_v28  ;;  %v7244_v28 = vld [vmem:[%s7483_s6 + $0x178] sm:$0xff]  }
 0xc50   : > { %v5500_v60 = vpack.c.bf16 %v5492_v9, %v5492_v9  ;;  %v5502_v57 = vpack.c.bf16 %v5494_v10, %v5494_v10  ;;  %v7245_v9 = vld [vmem:[%s7483_s6 + $0x1f8] sm:$0xff]  }
 0xc52   : > { %6052 = vmatprep.mubr.bf16.mxu0 %v5500_v60  ;;  %6092 = vmatprep.mubr.bf16.mxu1 %v5502_v57 }
 0xc53   : > { %6053 = vmatmul.mubr.bf16.vlgmr.msra.gmra.mrb[60].mxu0 %v5499_v6  ;;  %6093 = vmatmul.mubr.bf16.vlgmr.msra.gmra.mrb[36].mxu1 %v5501_v26  ;;  %v7246_v26 = vld [vmem:[%s7483_s6 + $0x138] sm:$0xff]  }
 0xc54   : > { %6737 = vmatpush3.bf16.msra.mxu0 %v7218_v44  ;;  %6759 = vmatpush3.bf16.msra.mxu1 %v7219_v11 }
 0xc55   : > { %6738 = vmatprep.subr.bf16.mxu0 %v7220_v49  ;;  %6760 = vmatprep.subr.bf16.mxu1 %v7221_v32  ;;  %v7247_v49 = vld [vmem:[%s7483_s6 + $0x1b8] sm:$0xff]  }
 0xc58   : > { %6739 = vmatpush3.bf16.msra.mxu0 %v7222_v51  ;;  %6761 = vmatpush3.bf16.msra.mxu1 %v7223_v62 }
 0xc59   : > { %6740 = vmatprep.subr.bf16.mxu0 %v7224_v8  ;;  %6762 = vmatprep.subr.bf16.mxu1 %v7225_v1 }
 0xc5c   : > { %6741 = vmatpush3.bf16.msra.mxu0 %v7226_v54  ;;  %6763 = vmatpush3.bf16.msra.mxu1 %v7227_v48 }
 0xc5d   : > { %6742 = vmatprep.subr.bf16.mxu0 %v7228_v20  ;;  %6764 = vmatprep.subr.bf16.mxu1 %v7229_v37 }
 0xc60   : > { %6743 = vmatpush3.bf16.msra.mxu0 %v7230_v61  ;;  %6765 = vmatpush3.bf16.msra.mxu1 %v7231_v56 }
 0xc61   : > { %6744 = vmatprep.subr.bf16.mxu0 %v7232_v31  ;;  %6766 = vmatprep.subr.bf16.mxu1 %v7233_v13 }
 0xc62   : > { %v5411_v18 = vpop.f32.mrb[56].mxu0  ;;  %v5452_v45 = vpop.f32.mrb[32].mxu1 }
 0xc63   : > { %v5412_v24 = vadd.f32 %v5411_v18, %v5274_v43  ;;  %v5453_v50 = vadd.f32 %v5452_v45, %v5282_v35  ;;  %v5413_v38 = vpop.f32.mrb[57].mxu0  ;;  %v5454_v36 = vpop.f32.mrb[33].mxu1 }
 0xc64   : > { %v5414_v40 = vadd.f32 %v5413_v38, %v5278_v59  ;;  %v5455_v0 = vadd.f32 %v5454_v36, %v5286_v14  ;;  %v5415_v33 = vpop.f32.mrb[58].mxu0  ;;  %v5456_v12 = vpop.f32.mrb[34].mxu1  ;;  %6745 = vmatpush3.bf16.msra.mxu0 %v7234_v52  ;;  %6767 = vmatpush3.bf16.msra.mxu1 %v7235_v22 }
 0xc65   : > { %v5463_v4 = vadd.f32 3.0, %v5412_v24  ;;  %v5465_v27 = vadd.f32 3.0, %v5453_v50  ;;  %v5416_v42 = vpop.f32.mrb[59].mxu0  ;;  %v5457_v3 = vpop.f32.mrb[35].mxu1  ;;  %6746 = vmatprep.subr.bf16.mxu0 %v7236_v2  ;;  %6768 = vmatprep.subr.bf16.mxu1 %v7237_v16 }
 0xc66   : > { %v5464_v17 = vadd.f32 3.0, %v5414_v40  ;;  %v5466_v7 = vadd.f32 3.0, %v5455_v0 }
 0xc67   : > { %v5471_v46 = vmax.f32 %v5463_v4, 0.0  ;;  %v5473_v19 = vmax.f32 %v5465_v27, 0.0 }
 0xc68   : > { %v5472_v15 = vmax.f32 %v5464_v17, 0.0  ;;  %v5474_v30 = vmax.f32 %v5466_v7, 0.0  ;;  %6747 = vmatpush3.bf16.msra.mxu0 %v7238_v58  ;;  %6769 = vmatpush3.bf16.msra.mxu1 %v7239_v53 }
 0xc69   : > { %v5479_v5 = vmin.f32 %v5471_v46, 6.0  ;;  %v5481_v39 = vmin.f32 %v5473_v19, 6.0  ;;  %6748 = vmatprep.subr.bf16.mxu0 %v7240_v41  ;;  %6770 = vmatprep.subr.bf16.mxu1 %v7241_v47 }
 0xc6a   : > { %v5480_v10 = vmin.f32 %v5472_v15, 6.0  ;;  %v5482_v60 = vmin.f32 %v5474_v30, 6.0 }
 0xc6b   : > { %v5487_v57 = vmul.f32 %v5479_v5, %v5412_v24  ;;  %v5489_v44 = vmul.f32 %v5481_v39, %v5453_v50 }
 0xc6c   : > { %v5488_v11 = vmul.f32 %v5480_v10, %v5414_v40  ;;  %v5490_v6 = vmul.f32 %v5482_v60, %v5455_v0  ;;  %6749 = vmatpush3.bf16.msra.mxu0 %v7242_v34  ;;  %6771 = vmatpush3.bf16.msra.mxu1 %v7243_v63 }
 0xc6d   : > { %v5495_v32 = vmul.f32 0.16666667, %v5487_v57  ;;  %v5497_v51 = vmul.f32 0.16666667, %v5489_v44  ;;  %6750 = vmatprep.subr.bf16.mxu0 %v7244_v28  ;;  %6772 = vmatprep.subr.bf16.mxu1 %v7245_v9 }
 0xc6e   : > { %v5496_v62 = vmul.f32 0.16666667, %v5488_v11  ;;  %v5498_v8 = vmul.f32 0.16666667, %v5490_v6 }
 0xc6f   : > { %v5503_v48 = vpack.c.bf16 %v5495_v32, %v5495_v32  ;;  %v5505_v20 = vpack.c.bf16 %v5497_v51, %v5497_v51 }
 0xc70   : > { %v5504_v1 = vpack.c.bf16 %v5496_v62, %v5496_v62  ;;  %v5506_v54 = vpack.c.bf16 %v5498_v8, %v5498_v8  ;;  %6751 = vmatpush3.bf16.msra.mxu0 %v7246_v26  ;;  %6773 = vmatpush3.bf16.msra.mxu1 %v7247_v49 }
 0xc72   : > { %6132 = vmatprep.mubr.bf16.mxu0 %v5504_v1  ;;  %6172 = vmatprep.mubr.bf16.mxu1 %v5506_v54 }
 0xc73   : > { %6133 = vmatmul.mubr.bf16.vlgmr.msra.gmra.mrb[64].mxu0 %v5503_v48  ;;  %6173 = vmatmul.mubr.bf16.vlgmr.msra.gmra.mrb[40].mxu1 %v5505_v20 }
 0xd26   : > { %v6708_v37 = vpop.f32.mrb[60].mxu0  ;;  %v6730_v55 = vpop.f32.mrb[36].mxu1 }
 0xd27   : > { %v6709_v61 = vpop.f32.mrb[61].mxu0  ;;  %v6731_v56 = vpop.f32.mrb[37].mxu1 }
 0xd28   : > { %v6710_v25 = vadd.f32 %v6709_v61, %v6708_v37  ;;  %v6732_v23 = vadd.f32 %v6731_v56, %v6730_v55  ;;  %v6711_v31 = vpop.f32.mrb[62].mxu0  ;;  %v6733_v13 = vpop.f32.mrb[38].mxu1 }
 0xd29   : > { %v6712_v43 = vpop.f32.mrb[63].mxu0  ;;  %v6734_v35 = vpop.f32.mrb[39].mxu1 }
 0xd2a   : > { %v6055_v59 = vadd.f32 %v6710_v25, %v5635_v21 }
 0xd2c   : > { %v6095_v14 = vadd.f32 %v6732_v23, %v6055_v59 }
 0xd46   : > { %v6752_v52 = vpop.f32.mrb[64].mxu0  ;;  %v6774_v22 = vpop.f32.mrb[40].mxu1 }
 0xd47   : > { %v6753_v2 = vpop.f32.mrb[65].mxu0  ;;  %v6775_v16 = vpop.f32.mrb[41].mxu1 }
 0xd48   : > { %v6754_v18 = vadd.f32 %v6753_v2, %v6752_v52  ;;  %v6776_v45 = vadd.f32 %v6775_v16, %v6774_v22  ;;  %v6755_v24 = vpop.f32.mrb[66].mxu0  ;;  %v6777_v50 = vpop.f32.mrb[42].mxu1 }
 0xd49   : > { %v6756_v38 = vpop.f32.mrb[67].mxu0  ;;  %v6778_v36 = vpop.f32.mrb[43].mxu1 }
 0xd4a   : > { %v6135_v40 = vadd.f32 %v6754_v18, %v6095_v14 }
 0xd4c   : > { %v6175_v0 = vadd.f32 %v6776_v45, %v6135_v40 }
 0xd4e   : > { %v6180_v33 = vsub.f32 0.0, %v6175_v0 }
 0xd50   : > { %v6181_v12 = vmul.f32 1.442695, %v6180_v33 }
 0xd52   : > { %7248 = vpow2.f32 %v6181_v12 }
 0xd5c   : > { %v7249_v58 = vpop.eup %7248 }
 0xd5d   : > { %v6183_v53 = vadd.f32 1.0, %v7249_v58 }
 0xd5f   : > { %7250 = vrcp.f32 %v6183_v53 }
 0xd69   : > { %v7251_v4 = vpop.eup %7250 }
 0xd6a   : > { %v6189_v27 = vrot.slane %v7251_v4, %v8222_v29 }
 0xd6c   : > { %6190 = vst [vmem:[%s1014_s22] sm:$0xff] %v6189_v27 }
 0xd6d PF: > { %s77_s7 = sadd.s32 1, %s7282_s7  }
 0xd6e   : > { %p74_p5 = scmp.ge.s32.totalorder %s77_s7, 4  }
 0xd70   :  { %76 = sbr.rel (!%p74_p5) target bundleno = 54 (0x36), region = 225 }

</bundles_post_ra>
